<compile_context>
chip_gen: v7x
topology: tpu7x:2x2x1
jax: 0.10.0
libtpu: 0.0.40
codegen_flags: <defaults>
</compile_context>

<pallas_src>
import functools

import jax
import jax.numpy as jnp
from jax.experimental import pallas as pl
from jax.experimental.pallas import tpu as pltpu


# -----------------------------------------------------------------------------
# Scaled-down AlexNet constants (same topology as the reference config classes,
# small sizes so the script runs quickly on a single TPU core).
# -----------------------------------------------------------------------------
class Kernel1:
    NUM_CHANNELS, KERNEL_SIZE, STRIDE, PADDING = 16, 11, 4, 2


class Kernel2:
    NUM_CHANNELS, KERNEL_SIZE, STRIDE, PADDING = 32, 5, 1, 2


class Kernel3:
    NUM_CHANNELS, KERNEL_SIZE, STRIDE, PADDING = 48, 3, 1, 1


class Kernel4:
    NUM_CHANNELS, KERNEL_SIZE, STRIDE, PADDING = 48, 3, 1, 1


class Kernel5:
    NUM_CHANNELS, KERNEL_SIZE, STRIDE, PADDING = 32, 3, 1, 1
    OUTPUT_SIZE = 2  # AdaptiveAvgPool2d target


class NormConsts:
    SIZE, ALPHA, BETA, K = 5, 1e-4, 0.75, 2.0


class Pool:
    KERNEL_SIZE, STRIDE = 3, 2


class FullyConnected:
    INPUT = Kernel5.NUM_CHANNELS * Kernel5.OUTPUT_SIZE ** 2  # 32*2*2 = 128
    NUM = 256


class DataConsts:
    NUM_CLASSES = 10


def _round_up(x, m):
    return (x + m - 1) // m * m


# -----------------------------------------------------------------------------
# Pallas kernel 1: conv + bias + ReLU (+ LocalResponseNorm) for one output row.
#
# Grid = (B, OH).  The whole padded image of the current batch element lives in
# VMEM as one block (re-used across all OH steps), the grouped weights are a
# single resident block.  The conv is an accumulation of kh*G small MXU dots
# (in-kernel im2col == static slices of the loaded rows), bf16 operands / f32
# accumulation.  LRN uses lane rolls (XLU), exp/log on the EUP.
# -----------------------------------------------------------------------------
def _conv_row_kernel(x_ref, w_ref, b_ref, o_ref, *, kh, G, OW, stride, cout,
                     lrn):
    # x_ref: (Hp, W4, stride*Cin) bf16  -- padded image, width folded by stride
    # w_ref: (kh, G, stride*Cin, 128) bf16 -- grouped weights, Cout padded -> 128
    # b_ref: (1, 128) f32               -- bias, zero-padded
    # o_ref: (OW, cout) f32             -- one output row
    oh = pl.program_id(1)
    h0 = oh * stride
    acc = jnp.zeros((OW, 128), jnp.float32)
    for dy in range(kh):
        row = x_ref[h0 + dy]                          # (W4, stride*Cin) bf16
        for j in range(G):
            a = row[j:j + OW, :]                      # static contiguous slice
            acc += jnp.dot(a, w_ref[dy, j],
                           preferred_element_type=jnp.float32)
    r = jnp.maximum(acc + b_ref[...], 0.0)            # padded lanes stay exactly 0
    if lrn is not None:
        size, alpha, beta, kconst = lrn
        x2 = r * r
        win = x2
        # +/-1 and +/-2 channel shifts as lane rolls; wrap-around lanes are the
        # zero-padded ones (cout <= 126), matching PyTorch's zero-padded window.
        for sh in (1, 2, 126, 127):
            win = win + pltpu.roll(x2, shift=sh, axis=1)
        denom = kconst + (alpha / size) * win         # >= k = 2 > 0
        r = r * jnp.exp(-beta * jnp.log(denom))
    o_ref[...] = r[:, :cout]


def conv2d_pallas(x_nhwc, w_oihw, b, stride, pad, *, lrn=None):
    """Conv2d + bias + ReLU (+ LRN) on an NHWC activation.  w is OIHW (torch)."""
    B, H, W, Cin = x_nhwc.shape
    Cout, Cin2, kh, kw = w_oihw.shape
    assert Cin == Cin2 and Cout <= 126  # <=126 keeps LRN roll wrap-around exact
    s = stride
    Hp, Wp = H + 2 * pad, W + 2 * pad
    OH = (Hp - kh) // s + 1
    OW = (Wp - kw) // s + 1
    G = -(-kw // s)                    # dx groups per dy (ceil(kw / stride))
    W4 = -(-Wp // s)                   # width in stride-groups
    Kg = s * Cin                       # per-dot contraction size

    # Pad spatially (+ a few zero columns so width is a multiple of stride),
    # fold the width-stride into the channel axis, cast to bf16 for the MXU.
    xp = jnp.pad(x_nhwc, ((0, 0), (pad, pad), (pad, W4 * s - W - pad), (0, 0)))
    xr = xp.reshape(B, Hp, W4, Kg).astype(jnp.bfloat16)

    # OIHW -> (kh, G, stride*Cin, 128): dx grouped by stride phase (zero-padded
    # beyond kw), Cout zero-padded to 128 so the accumulator is lane-dense and
    # the LRN zero-lane invariant holds.
    wt = jnp.transpose(w_oihw, (2, 3, 1, 0))                   # (kh, kw, Cin, Cout)
    wt = jnp.pad(wt, ((0, 0), (0, G * s - kw), (0, 0), (0, 128 - Cout)))
    wg = wt.reshape(kh, G, s, Cin, 128).reshape(kh, G, Kg, 128)
    wg = wg.astype(jnp.bfloat16)
    bp = jnp.pad(b, (0, 128 - Cout)).reshape(1, 128).astype(jnp.float32)

    kernel = functools.partial(_conv_row_kernel, kh=kh, G=G, OW=OW,
                               stride=s, cout=Cout, lrn=lrn)
    return pl.pallas_call(
        kernel,
        out_shape=jax.ShapeDtypeStruct((B, OH, OW, Cout), jnp.float32),
        grid_spec=pltpu.PrefetchScalarGridSpec(
            num_scalar_prefetch=0,
            grid=(B, OH),
            in_specs=[
                # whole padded image of batch b: DMA'd once per batch element
                pl.BlockSpec((None, Hp, W4, Kg), lambda bb, oo: (bb, 0, 0, 0)),
                # full weight / bias blocks, resident across the grid
                pl.BlockSpec((kh, G, Kg, 128), lambda bb, oo: (0, 0, 0, 0)),
                pl.BlockSpec((1, 128), lambda bb, oo: (0, 0)),
            ],
            out_specs=pl.BlockSpec((None, None, OW, Cout),
                                   lambda bb, oo: (bb, oo, 0, 0)),
        ),
        compiler_params=pltpu.CompilerParams(
            dimension_semantics=("parallel", "parallel")),
    )(xr, wg, bp)


# -----------------------------------------------------------------------------
# Pallas kernel 2: 3x3 / stride-2 max pool, one output row per grid step.
# One read of the NHWC image block, pure-VPU max over 9 static slices, one
# write — no identity conv, no transpose, no patch tensor.
# -----------------------------------------------------------------------------
def _maxpool_row_kernel(x_ref, o_ref, *, OW, C):
    # x_ref: (H, W2, 2*C)  (width folded in stride-2 pairs);  o_ref: (OW, C)
    oh = pl.program_id(1)
    h0 = oh * 2
    r = None
    for dy in range(3):
        row = x_ref[h0 + dy]                          # (W2, 2*C)
        for g, lo in ((0, 0), (0, C), (1, 0)):        # dx = 0, 1, 2
            v = row[g:g + OW, lo:lo + C]
            r = v if r is None else jnp.maximum(r, v)
    o_ref[...] = r


def max_pool2d_pallas(x):
    k, s = Pool.KERNEL_SIZE, Pool.STRIDE              # 3, 2
    B, H, W, C = x.shape
    OH = (H - k) // s + 1
    OW = (W - k) // s + 1
    W2 = -(-W // s)
    # One zero column at most; never read by any pooling window (values are
    # >= 0 post-ReLU anyway).
    xp = jnp.pad(x, ((0, 0), (0, 0), (0, W2 * s - W), (0, 0)))
    xr = xp.reshape(B, H, W2, s * C)
    kernel = functools.partial(_maxpool_row_kernel, OW=OW, C=C)
    return pl.pallas_call(
        kernel,
        out_shape=jax.ShapeDtypeStruct((B, OH, OW, C), x.dtype),
        grid_spec=pltpu.PrefetchScalarGridSpec(
            num_scalar_prefetch=0,
            grid=(B, OH),
            in_specs=[pl.BlockSpec((None, H, W2, s * C),
                                   lambda bb, oo: (bb, 0, 0, 0))],
            out_specs=pl.BlockSpec((None, None, OW, C),
                                   lambda bb, oo: (bb, oo, 0, 0)),
        ),
        compiler_params=pltpu.CompilerParams(
            dimension_semantics=("parallel", "parallel")),
    )(xr)


# -----------------------------------------------------------------------------
# Pallas kernel 3: the three fully-connected layers fused into one call.
# bf16 operands / f32 accumulation, lane-dense (8, 128) output tile.
# -----------------------------------------------------------------------------
def _fc_fused_kernel(x_ref, w1_ref, b1_ref, w2_ref, b2_ref, w3_ref, b3_ref,
                     o_ref):
    h = jnp.dot(x_ref[...].astype(jnp.bfloat16), w1_ref[...],
                preferred_element_type=jnp.float32) + b1_ref[...]
    h = jnp.maximum(h, 0.0)
    h = jnp.dot(h.astype(jnp.bfloat16), w2_ref[...],
                preferred_element_type=jnp.float32) + b2_ref[...]
    h = jnp.maximum(h, 0.0)
    o = jnp.dot(h.astype(jnp.bfloat16), w3_ref[...],
                preferred_element_type=jnp.float32) + b3_ref[...]
    o_ref[...] = o.astype(o_ref.dtype)


def fc_stack(x, params):
    # TODO(synk): Dropout(0.5) uses eval-mode (identity) semantics; stochastic
    # training-mode masking not implemented.
    # TODO(synk): add a grid + BlockSpecs over hidden/output dims before
    # widening the FC layers (v7x has only 64 MiB physical VMEM); at the
    # current < 0.5 MiB of weights, full VMEM blocks are the right choice.
    B, _ = x.shape
    nb = _round_up(max(B, 8), 8)                       # sublane-dense rows
    ncls = DataConsts.NUM_CLASSES
    xp = jnp.pad(x, ((0, nb - B), (0, 0)))
    w1 = params["fc1_w"].astype(jnp.bfloat16)
    w2 = params["fc2_w"].astype(jnp.bfloat16)
    w3 = jnp.pad(params["fc3_w"], ((0, 0), (0, 128 - ncls))).astype(jnp.bfloat16)
    b1 = params["fc1_b"].reshape(1, -1)
    b2 = params["fc2_b"].reshape(1, -1)
    b3 = jnp.pad(params["fc3_b"], (0, 128 - ncls)).reshape(1, 128)
    out = pl.pallas_call(
        _fc_fused_kernel,
        out_shape=jax.ShapeDtypeStruct((nb, 128), jnp.float32),  # lane-dense
    )(xp, w1, b1, w2, b2, w3, b3)
    return out[:B, :ncls]


# -----------------------------------------------------------------------------
# Adaptive average pool (3x3 -> 2x2): tiny plain-JAX glue matching
# torch.nn.AdaptiveAvgPool2d window math, operating on NHWC.
# -----------------------------------------------------------------------------
def adaptive_avg_pool_nhwc(x, oh, ow):
    B, H, W, C = x.shape
    rows = []
    for i in range(oh):
        h0, h1 = (i * H) // oh, -((-(i + 1) * H) // oh)
        cols = []
        for j in range(ow):
            w0, w1 = (j * W) // ow, -((-(j + 1) * W) // ow)
            cols.append(jnp.mean(x[:, h0:h1, w0:w1, :], axis=(1, 2)))
        rows.append(jnp.stack(cols, axis=1))
    return jnp.stack(rows, axis=1)                     # (B, oh, ow, C)


# -----------------------------------------------------------------------------
# Parameters (deterministic synthetic init) and forward pass.
# -----------------------------------------------------------------------------
def init_params(key):
    ks = jax.random.split(key, 16)

    def rnd(k, shape):
        return (0.05 * jax.random.normal(k, shape)).astype(jnp.float32)

    p = {}
    conv_defs = [
        ("conv1", 3, Kernel1),
        ("conv2", Kernel1.NUM_CHANNELS, Kernel2),
        ("conv3", Kernel2.NUM_CHANNELS, Kernel3),
        ("conv4", Kernel3.NUM_CHANNELS, Kernel4),
        ("conv5", Kernel4.NUM_CHANNELS, Kernel5),
    ]
    i = 0
    for name, cin, kdef in conv_defs:
        p[name + "_w"] = rnd(ks[i], (kdef.NUM_CHANNELS, cin,
                                     kdef.KERNEL_SIZE, kdef.KERNEL_SIZE))
        i += 1
        p[name + "_b"] = rnd(ks[i], (kdef.NUM_CHANNELS,))
        i += 1
    fc_defs = [
        ("fc1", FullyConnected.INPUT, FullyConnected.NUM),
        ("fc2", FullyConnected.NUM, FullyConnected.NUM),
        ("fc3", FullyConnected.NUM, DataConsts.NUM_CLASSES),
    ]
    for name, fin, fout in fc_defs:
        p[name + "_w"] = rnd(ks[i], (fin, fout))       # stored (in, out) = torch W.T
        i += 1
        p[name + "_b"] = rnd(ks[i], (fout,))
        i += 1
    return p


def alexnet_forward(params, x):
    lrn = (NormConsts.SIZE, NormConsts.ALPHA, NormConsts.BETA, NormConsts.K)
    x = x.transpose(0, 2, 3, 1)                        # NCHW -> NHWC once
    # conv1 -> ReLU -> LRN (fused) -> pool
    x = conv2d_pallas(x, params["conv1_w"], params["conv1_b"],
                      Kernel1.STRIDE, Kernel1.PADDING, lrn=lrn)
    x = max_pool2d_pallas(x)
    # conv2 -> ReLU -> LRN (fused) -> pool
    x = conv2d_pallas(x, params["conv2_w"], params["conv2_b"],
                      Kernel2.STRIDE, Kernel2.PADDING, lrn=lrn)
    x = max_pool2d_pallas(x)
    # conv3 -> ReLU, conv4 -> ReLU, conv5 -> ReLU, pool
    x = conv2d_pallas(x, params["conv3_w"], params["conv3_b"],
                      Kernel3.STRIDE, Kernel3.PADDING)
    x = conv2d_pallas(x, params["conv4_w"], params["conv4_b"],
                      Kernel4.STRIDE, Kernel4.PADDING)
    x = conv2d_pallas(x, params["conv5_w"], params["conv5_b"],
                      Kernel5.STRIDE, Kernel5.PADDING)
    x = max_pool2d_pallas(x)
    # adaptive avg pool + torch-order (channel-major) flatten
    x = adaptive_avg_pool_nhwc(x, Kernel5.OUTPUT_SIZE, Kernel5.OUTPUT_SIZE)
    x = x.transpose(0, 3, 1, 2).reshape(x.shape[0], -1)   # == torch.flatten(x, 1)
    # fullyconnected (Dropout = identity in eval mode), fused into one kernel
    return fc_stack(x, params)


if __name__ == "__main__":
    key = jax.random.PRNGKey(0)
    pkey, xkey = jax.random.split(key)
    params = init_params(pkey)
    x = jax.random.normal(xkey, (2, 3, 127, 127), dtype=jnp.float32)  # NCHW

    logits = jax.jit(alexnet_forward)(params, x)
    jax.block_until_ready(logits)
    assert logits.shape == (2, DataConsts.NUM_CLASSES)
    assert bool(jnp.all(jnp.isfinite(logits)))
    print("KERNEL_OK")
</pallas_src>

<mosaic_0001>
module attributes {stable_mosaic.version = 11 : i64} {
  func.func @_conv_row_kernel(%arg0: i32, %arg1: i32, %arg2: memref<1x131x33x12xbf16, #tpu.memory_space<vmem>>, %arg3: memref<11x3x12x128xbf16, #tpu.memory_space<vmem>>, %arg4: memref<1x128xf32, #tpu.memory_space<vmem>>, %arg5: memref<1x1x31x16xf32, #tpu.memory_space<vmem>>) attributes {dimension_semantics = [#tpu.dimension_semantics<parallel>, #tpu.dimension_semantics<parallel>], iteration_bounds = array<i64: 2, 31>, scalar_prefetch = 0 : i64, scratch_operands = 0 : i64, tpu.core_type = #tpu.core_type<tc>, window_params = [{transform_indices = @transform_0, window_bounds = array<i64: 1, 131, 33, 12>}, {pipeline_mode = #tpu.pipeline_mode<synchronous>, transform_indices = @transform_1, window_bounds = array<i64: 11, 3, 12, 128>}, {pipeline_mode = #tpu.pipeline_mode<synchronous>, transform_indices = @transform_2, window_bounds = array<i64: 1, 128>}, {transform_indices = @transform_3, window_bounds = array<i64: 1, 1, 31, 16>}]} {
    %c4_i32 = arith.constant 4 : i32
    %0 = arith.muli %arg1, %c4_i32 : i32
    %cst = arith.constant 0.000000e+00 : f32
    %1 = vector.broadcast %cst : f32 to vector<31x128xf32>
    %c0_i32 = arith.constant 0 : i32
    %2 = arith.addi %0, %c0_i32 : i32
    %c0 = arith.constant 0 : index
    %3 = arith.index_cast %2 : i32 to index
    %c0_0 = arith.constant 0 : index
    %c0_1 = arith.constant 0 : index
    %4 = vector.load %arg2[%c0, %3, %c0_0, %c0_1] : memref<1x131x33x12xbf16, #tpu.memory_space<vmem>>, vector<1x1x33x12xbf16>
    %5 = vector.shape_cast %4 : vector<1x1x33x12xbf16> to vector<33x12xbf16>
    %6 = vector.extract_strided_slice %5 {offsets = [0, 0], sizes = [31, 12], strides = [1, 1]} : vector<33x12xbf16> to vector<31x12xbf16>
    %c0_2 = arith.constant 0 : index
    %c0_3 = arith.constant 0 : index
    %c0_4 = arith.constant 0 : index
    %c0_5 = arith.constant 0 : index
    %7 = vector.load %arg3[%c0_2, %c0_3, %c0_4, %c0_5] : memref<11x3x12x128xbf16, #tpu.memory_space<vmem>>, vector<1x1x12x128xbf16>
    %8 = vector.shape_cast %7 : vector<1x1x12x128xbf16> to vector<12x128xbf16>
    %cst_6 = arith.constant dense<0.000000e+00> : vector<31x128xf32>
    %9 = tpu.matmul %6, %8, %cst_6 {dimension_numbers = #tpu.dot_dimension_numbers<[1], [0], [0], [1], [0, 0, 1, 1], [], []>} : vector<31x12xbf16>, vector<12x128xbf16>, vector<31x128xf32> -> vector<31x128xf32>
    %10 = arith.addf %1, %9 : vector<31x128xf32>
    %11 = vector.extract_strided_slice %5 {offsets = [1, 0], sizes = [31, 12], strides = [1, 1]} : vector<33x12xbf16> to vector<31x12xbf16>
    %c0_7 = arith.constant 0 : index
    %c1 = arith.constant 1 : index
    %c0_8 = arith.constant 0 : index
    %c0_9 = arith.constant 0 : index
    %12 = vector.load %arg3[%c0_7, %c1, %c0_8, %c0_9] : memref<11x3x12x128xbf16, #tpu.memory_space<vmem>>, vector<1x1x12x128xbf16>
    %13 = vector.shape_cast %12 : vector<1x1x12x128xbf16> to vector<12x128xbf16>
    %cst_10 = arith.constant dense<0.000000e+00> : vector<31x128xf32>
    %14 = tpu.matmul %11, %13, %cst_10 {dimension_numbers = #tpu.dot_dimension_numbers<[1], [0], [0], [1], [0, 0, 1, 1], [], []>} : vector<31x12xbf16>, vector<12x128xbf16>, vector<31x128xf32> -> vector<31x128xf32>
    %15 = arith.addf %10, %14 : vector<31x128xf32>
    %16 = vector.extract_strided_slice %5 {offsets = [2, 0], sizes = [31, 12], strides = [1, 1]} : vector<33x12xbf16> to vector<31x12xbf16>
    %c0_11 = arith.constant 0 : index
    %c2 = arith.constant 2 : index
    %c0_12 = arith.constant 0 : index
    %c0_13 = arith.constant 0 : index
    %17 = vector.load %arg3[%c0_11, %c2, %c0_12, %c0_13] : memref<11x3x12x128xbf16, #tpu.memory_space<vmem>>, vector<1x1x12x128xbf16>
    %18 = vector.shape_cast %17 : vector<1x1x12x128xbf16> to vector<12x128xbf16>
    %cst_14 = arith.constant dense<0.000000e+00> : vector<31x128xf32>
    %19 = tpu.matmul %16, %18, %cst_14 {dimension_numbers = #tpu.dot_dimension_numbers<[1], [0], [0], [1], [0, 0, 1, 1], [], []>} : vector<31x12xbf16>, vector<12x128xbf16>, vector<31x128xf32> -> vector<31x128xf32>
    %20 = arith.addf %15, %19 : vector<31x128xf32>
    %c1_i32 = arith.constant 1 : i32
    %21 = arith.addi %0, %c1_i32 : i32
    %c0_15 = arith.constant 0 : index
    %22 = arith.index_cast %21 : i32 to index
    %c0_16 = arith.constant 0 : index
    %c0_17 = arith.constant 0 : index
    %23 = vector.load %arg2[%c0_15, %22, %c0_16, %c0_17] : memref<1x131x33x12xbf16, #tpu.memory_space<vmem>>, vector<1x1x33x12xbf16>
    %24 = vector.shape_cast %23 : vector<1x1x33x12xbf16> to vector<33x12xbf16>
    %25 = vector.extract_strided_slice %24 {offsets = [0, 0], sizes = [31, 12], strides = [1, 1]} : vector<33x12xbf16> to vector<31x12xbf16>
    %c1_18 = arith.constant 1 : index
    %c0_19 = arith.constant 0 : index
    %c0_20 = arith.constant 0 : index
    %c0_21 = arith.constant 0 : index
    %26 = vector.load %arg3[%c1_18, %c0_19, %c0_20, %c0_21] : memref<11x3x12x128xbf16, #tpu.memory_space<vmem>>, vector<1x1x12x128xbf16>
    %27 = vector.shape_cast %26 : vector<1x1x12x128xbf16> to vector<12x128xbf16>
    %cst_22 = arith.constant dense<0.000000e+00> : vector<31x128xf32>
    %28 = tpu.matmul %25, %27, %cst_22 {dimension_numbers = #tpu.dot_dimension_numbers<[1], [0], [0], [1], [0, 0, 1, 1], [], []>} : vector<31x12xbf16>, vector<12x128xbf16>, vector<31x128xf32> -> vector<31x128xf32>
    %29 = arith.addf %20, %28 : vector<31x128xf32>
    %30 = vector.extract_strided_slice %24 {offsets = [1, 0], sizes = [31, 12], strides = [1, 1]} : vector<33x12xbf16> to vector<31x12xbf16>
    %c1_23 = arith.constant 1 : index
    %c1_24 = arith.constant 1 : index
    %c0_25 = arith.constant 0 : index
    %c0_26 = arith.constant 0 : index
    %31 = vector.load %arg3[%c1_23, %c1_24, %c0_25, %c0_26] : memref<11x3x12x128xbf16, #tpu.memory_space<vmem>>, vector<1x1x12x128xbf16>
    %32 = vector.shape_cast %31 : vector<1x1x12x128xbf16> to vector<12x128xbf16>
    %cst_27 = arith.constant dense<0.000000e+00> : vector<31x128xf32>
    %33 = tpu.matmul %30, %32, %cst_27 {dimension_numbers = #tpu.dot_dimension_numbers<[1], [0], [0], [1], [0, 0, 1, 1], [], []>} : vector<31x12xbf16>, vector<12x128xbf16>, vector<31x128xf32> -> vector<31x128xf32>
    %34 = arith.addf %29, %33 : vector<31x128xf32>
    %35 = vector.extract_strided_slice %24 {offsets = [2, 0], sizes = [31, 12], strides = [1, 1]} : vector<33x12xbf16> to vector<31x12xbf16>
    %c1_28 = arith.constant 1 : index
    %c2_29 = arith.constant 2 : index
    %c0_30 = arith.constant 0 : index
    %c0_31 = arith.constant 0 : index
    %36 = vector.load %arg3[%c1_28, %c2_29, %c0_30, %c0_31] : memref<11x3x12x128xbf16, #tpu.memory_space<vmem>>, vector<1x1x12x128xbf16>
    %37 = vector.shape_cast %36 : vector<1x1x12x128xbf16> to vector<12x128xbf16>
    %cst_32 = arith.constant dense<0.000000e+00> : vector<31x128xf32>
    %38 = tpu.matmul %35, %37, %cst_32 {dimension_numbers = #tpu.dot_dimension_numbers<[1], [0], [0], [1], [0, 0, 1, 1], [], []>} : vector<31x12xbf16>, vector<12x128xbf16>, vector<31x128xf32> -> vector<31x128xf32>
    %39 = arith.addf %34, %38 : vector<31x128xf32>
    %c2_i32 = arith.constant 2 : i32
    %40 = arith.addi %0, %c2_i32 : i32
    %c0_33 = arith.constant 0 : index
    %41 = arith.index_cast %40 : i32 to index
    %c0_34 = arith.constant 0 : index
    %c0_35 = arith.constant 0 : index
    %42 = vector.load %arg2[%c0_33, %41, %c0_34, %c0_35] : memref<1x131x33x12xbf16, #tpu.memory_space<vmem>>, vector<1x1x33x12xbf16>
    %43 = vector.shape_cast %42 : vector<1x1x33x12xbf16> to vector<33x12xbf16>
    %44 = vector.extract_strided_slice %43 {offsets = [0, 0], sizes = [31, 12], strides = [1, 1]} : vector<33x12xbf16> to vector<31x12xbf16>
    %c2_36 = arith.constant 2 : index
    %c0_37 = arith.constant 0 : index
    %c0_38 = arith.constant 0 : index
    %c0_39 = arith.constant 0 : index
    %45 = vector.load %arg3[%c2_36, %c0_37, %c0_38, %c0_39] : memref<11x3x12x128xbf16, #tpu.memory_space<vmem>>, vector<1x1x12x128xbf16>
    %46 = vector.shape_cast %45 : vector<1x1x12x128xbf16> to vector<12x128xbf16>
    %cst_40 = arith.constant dense<0.000000e+00> : vector<31x128xf32>
    %47 = tpu.matmul %44, %46, %cst_40 {dimension_numbers = #tpu.dot_dimension_numbers<[1], [0], [0], [1], [0, 0, 1, 1], [], []>} : vector<31x12xbf16>, vector<12x128xbf16>, vector<31x128xf32> -> vector<31x128xf32>
    %48 = arith.addf %39, %47 : vector<31x128xf32>
    %49 = vector.extract_strided_slice %43 {offsets = [1, 0], sizes = [31, 12], strides = [1, 1]} : vector<33x12xbf16> to vector<31x12xbf16>
    %c2_41 = arith.constant 2 : index
    %c1_42 = arith.constant 1 : index
    %c0_43 = arith.constant 0 : index
    %c0_44 = arith.constant 0 : index
    %50 = vector.load %arg3[%c2_41, %c1_42, %c0_43, %c0_44] : memref<11x3x12x128xbf16, #tpu.memory_space<vmem>>, vector<1x1x12x128xbf16>
    %51 = vector.shape_cast %50 : vector<1x1x12x128xbf16> to vector<12x128xbf16>
    %cst_45 = arith.constant dense<0.000000e+00> : vector<31x128xf32>
    %52 = tpu.matmul %49, %51, %cst_45 {dimension_numbers = #tpu.dot_dimension_numbers<[1], [0], [0], [1], [0, 0, 1, 1], [], []>} : vector<31x12xbf16>, vector<12x128xbf16>, vector<31x128xf32> -> vector<31x128xf32>
    %53 = arith.addf %48, %52 : vector<31x128xf32>
    %54 = vector.extract_strided_slice %43 {offsets = [2, 0], sizes = [31, 12], strides = [1, 1]} : vector<33x12xbf16> to vector<31x12xbf16>
    %c2_46 = arith.constant 2 : index
    %c2_47 = arith.constant 2 : index
    %c0_48 = arith.constant 0 : index
    %c0_49 = arith.constant 0 : index
    %55 = vector.load %arg3[%c2_46, %c2_47, %c0_48, %c0_49] : memref<11x3x12x128xbf16, #tpu.memory_space<vmem>>, vector<1x1x12x128xbf16>
    %56 = vector.shape_cast %55 : vector<1x1x12x128xbf16> to vector<12x128xbf16>
    %cst_50 = arith.constant dense<0.000000e+00> : vector<31x128xf32>
    %57 = tpu.matmul %54, %56, %cst_50 {dimension_numbers = #tpu.dot_dimension_numbers<[1], [0], [0], [1], [0, 0, 1, 1], [], []>} : vector<31x12xbf16>, vector<12x128xbf16>, vector<31x128xf32> -> vector<31x128xf32>
    %58 = arith.addf %53, %57 : vector<31x128xf32>
    %c3_i32 = arith.constant 3 : i32
    %59 = arith.addi %0, %c3_i32 : i32
    %c0_51 = arith.constant 0 : index
    %60 = arith.index_cast %59 : i32 to index
    %c0_52 = arith.constant 0 : index
    %c0_53 = arith.constant 0 : index
    %61 = vector.load %arg2[%c0_51, %60, %c0_52, %c0_53] : memref<1x131x33x12xbf16, #tpu.memory_space<vmem>>, vector<1x1x33x12xbf16>
    %62 = vector.shape_cast %61 : vector<1x1x33x12xbf16> to vector<33x12xbf16>
    %63 = vector.extract_strided_slice %62 {offsets = [0, 0], sizes = [31, 12], strides = [1, 1]} : vector<33x12xbf16> to vector<31x12xbf16>
    %c3 = arith.constant 3 : index
    %c0_54 = arith.constant 0 : index
    %c0_55 = arith.constant 0 : index
    %c0_56 = arith.constant 0 : index
    %64 = vector.load %arg3[%c3, %c0_54, %c0_55, %c0_56] : memref<11x3x12x128xbf16, #tpu.memory_space<vmem>>, vector<1x1x12x128xbf16>
    %65 = vector.shape_cast %64 : vector<1x1x12x128xbf16> to vector<12x128xbf16>
    %cst_57 = arith.constant dense<0.000000e+00> : vector<31x128xf32>
    %66 = tpu.matmul %63, %65, %cst_57 {dimension_numbers = #tpu.dot_dimension_numbers<[1], [0], [0], [1], [0, 0, 1, 1], [], []>} : vector<31x12xbf16>, vector<12x128xbf16>, vector<31x128xf32> -> vector<31x128xf32>
    %67 = arith.addf %58, %66 : vector<31x128xf32>
    %68 = vector.extract_strided_slice %62 {offsets = [1, 0], sizes = [31, 12], strides = [1, 1]} : vector<33x12xbf16> to vector<31x12xbf16>
    %c3_58 = arith.constant 3 : index
    %c1_59 = arith.constant 1 : index
    %c0_60 = arith.constant 0 : index
    %c0_61 = arith.constant 0 : index
    %69 = vector.load %arg3[%c3_58, %c1_59, %c0_60, %c0_61] : memref<11x3x12x128xbf16, #tpu.memory_space<vmem>>, vector<1x1x12x128xbf16>
    %70 = vector.shape_cast %69 : vector<1x1x12x128xbf16> to vector<12x128xbf16>
    %cst_62 = arith.constant dense<0.000000e+00> : vector<31x128xf32>
    %71 = tpu.matmul %68, %70, %cst_62 {dimension_numbers = #tpu.dot_dimension_numbers<[1], [0], [0], [1], [0, 0, 1, 1], [], []>} : vector<31x12xbf16>, vector<12x128xbf16>, vector<31x128xf32> -> vector<31x128xf32>
    %72 = arith.addf %67, %71 : vector<31x128xf32>
    %73 = vector.extract_strided_slice %62 {offsets = [2, 0], sizes = [31, 12], strides = [1, 1]} : vector<33x12xbf16> to vector<31x12xbf16>
    %c3_63 = arith.constant 3 : index
    %c2_64 = arith.constant 2 : index
    %c0_65 = arith.constant 0 : index
    %c0_66 = arith.constant 0 : index
    %74 = vector.load %arg3[%c3_63, %c2_64, %c0_65, %c0_66] : memref<11x3x12x128xbf16, #tpu.memory_space<vmem>>, vector<1x1x12x128xbf16>
    %75 = vector.shape_cast %74 : vector<1x1x12x128xbf16> to vector<12x128xbf16>
    %cst_67 = arith.constant dense<0.000000e+00> : vector<31x128xf32>
    %76 = tpu.matmul %73, %75, %cst_67 {dimension_numbers = #tpu.dot_dimension_numbers<[1], [0], [0], [1], [0, 0, 1, 1], [], []>} : vector<31x12xbf16>, vector<12x128xbf16>, vector<31x128xf32> -> vector<31x128xf32>
    %77 = arith.addf %72, %76 : vector<31x128xf32>
    %c4_i32_68 = arith.constant 4 : i32
    %78 = arith.addi %0, %c4_i32_68 : i32
    %c0_69 = arith.constant 0 : index
    %79 = arith.index_cast %78 : i32 to index
    %c0_70 = arith.constant 0 : index
    %c0_71 = arith.constant 0 : index
    %80 = vector.load %arg2[%c0_69, %79, %c0_70, %c0_71] : memref<1x131x33x12xbf16, #tpu.memory_space<vmem>>, vector<1x1x33x12xbf16>
    %81 = vector.shape_cast %80 : vector<1x1x33x12xbf16> to vector<33x12xbf16>
    %82 = vector.extract_strided_slice %81 {offsets = [0, 0], sizes = [31, 12], strides = [1, 1]} : vector<33x12xbf16> to vector<31x12xbf16>
    %c4 = arith.constant 4 : index
    %c0_72 = arith.constant 0 : index
    %c0_73 = arith.constant 0 : index
    %c0_74 = arith.constant 0 : index
    %83 = vector.load %arg3[%c4, %c0_72, %c0_73, %c0_74] : memref<11x3x12x128xbf16, #tpu.memory_space<vmem>>, vector<1x1x12x128xbf16>
    %84 = vector.shape_cast %83 : vector<1x1x12x128xbf16> to vector<12x128xbf16>
    %cst_75 = arith.constant dense<0.000000e+00> : vector<31x128xf32>
    %85 = tpu.matmul %82, %84, %cst_75 {dimension_numbers = #tpu.dot_dimension_numbers<[1], [0], [0], [1], [0, 0, 1, 1], [], []>} : vector<31x12xbf16>, vector<12x128xbf16>, vector<31x128xf32> -> vector<31x128xf32>
    %86 = arith.addf %77, %85 : vector<31x128xf32>
    %87 = vector.extract_strided_slice %81 {offsets = [1, 0], sizes = [31, 12], strides = [1, 1]} : vector<33x12xbf16> to vector<31x12xbf16>
    %c4_76 = arith.constant 4 : index
    %c1_77 = arith.constant 1 : index
    %c0_78 = arith.constant 0 : index
    %c0_79 = arith.constant 0 : index
    %88 = vector.load %arg3[%c4_76, %c1_77, %c0_78, %c0_79] : memref<11x3x12x128xbf16, #tpu.memory_space<vmem>>, vector<1x1x12x128xbf16>
    %89 = vector.shape_cast %88 : vector<1x1x12x128xbf16> to vector<12x128xbf16>
    %cst_80 = arith.constant dense<0.000000e+00> : vector<31x128xf32>
    %90 = tpu.matmul %87, %89, %cst_80 {dimension_numbers = #tpu.dot_dimension_numbers<[1], [0], [0], [1], [0, 0, 1, 1], [], []>} : vector<31x12xbf16>, vector<12x128xbf16>, vector<31x128xf32> -> vector<31x128xf32>
    %91 = arith.addf %86, %90 : vector<31x128xf32>
    %92 = vector.extract_strided_slice %81 {offsets = [2, 0], sizes = [31, 12], strides = [1, 1]} : vector<33x12xbf16> to vector<31x12xbf16>
    %c4_81 = arith.constant 4 : index
    %c2_82 = arith.constant 2 : index
    %c0_83 = arith.constant 0 : index
    %c0_84 = arith.constant 0 : index
    %93 = vector.load %arg3[%c4_81, %c2_82, %c0_83, %c0_84] : memref<11x3x12x128xbf16, #tpu.memory_space<vmem>>, vector<1x1x12x128xbf16>
    %94 = vector.shape_cast %93 : vector<1x1x12x128xbf16> to vector<12x128xbf16>
    %cst_85 = arith.constant dense<0.000000e+00> : vector<31x128xf32>
    %95 = tpu.matmul %92, %94, %cst_85 {dimension_numbers = #tpu.dot_dimension_numbers<[1], [0], [0], [1], [0, 0, 1, 1], [], []>} : vector<31x12xbf16>, vector<12x128xbf16>, vector<31x128xf32> -> vector<31x128xf32>
    %96 = arith.addf %91, %95 : vector<31x128xf32>
    %c5_i32 = arith.constant 5 : i32
    %97 = arith.addi %0, %c5_i32 : i32
    %c0_86 = arith.constant 0 : index
    %98 = arith.index_cast %97 : i32 to index
    %c0_87 = arith.constant 0 : index
    %c0_88 = arith.constant 0 : index
    %99 = vector.load %arg2[%c0_86, %98, %c0_87, %c0_88] : memref<1x131x33x12xbf16, #tpu.memory_space<vmem>>, vector<1x1x33x12xbf16>
    %100 = vector.shape_cast %99 : vector<1x1x33x12xbf16> to vector<33x12xbf16>
    %101 = vector.extract_strided_slice %100 {offsets = [0, 0], sizes = [31, 12], strides = [1, 1]} : vector<33x12xbf16> to vector<31x12xbf16>
    %c5 = arith.constant 5 : index
    %c0_89 = arith.constant 0 : index
    %c0_90 = arith.constant 0 : index
    %c0_91 = arith.constant 0 : index
    %102 = vector.load %arg3[%c5, %c0_89, %c0_90, %c0_91] : memref<11x3x12x128xbf16, #tpu.memory_space<vmem>>, vector<1x1x12x128xbf16>
    %103 = vector.shape_cast %102 : vector<1x1x12x128xbf16> to vector<12x128xbf16>
    %cst_92 = arith.constant dense<0.000000e+00> : vector<31x128xf32>
    %104 = tpu.matmul %101, %103, %cst_92 {dimension_numbers = #tpu.dot_dimension_numbers<[1], [0], [0], [1], [0, 0, 1, 1], [], []>} : vector<31x12xbf16>, vector<12x128xbf16>, vector<31x128xf32> -> vector<31x128xf32>
    %105 = arith.addf %96, %104 : vector<31x128xf32>
    %106 = vector.extract_strided_slice %100 {offsets = [1, 0], sizes = [31, 12], strides = [1, 1]} : vector<33x12xbf16> to vector<31x12xbf16>
    %c5_93 = arith.constant 5 : index
    %c1_94 = arith.constant 1 : index
    %c0_95 = arith.constant 0 : index
    %c0_96 = arith.constant 0 : index
    %107 = vector.load %arg3[%c5_93, %c1_94, %c0_95, %c0_96] : memref<11x3x12x128xbf16, #tpu.memory_space<vmem>>, vector<1x1x12x128xbf16>
    %108 = vector.shape_cast %107 : vector<1x1x12x128xbf16> to vector<12x128xbf16>
    %cst_97 = arith.constant dense<0.000000e+00> : vector<31x128xf32>
    %109 = tpu.matmul %106, %108, %cst_97 {dimension_numbers = #tpu.dot_dimension_numbers<[1], [0], [0], [1], [0, 0, 1, 1], [], []>} : vector<31x12xbf16>, vector<12x128xbf16>, vector<31x128xf32> -> vector<31x128xf32>
    %110 = arith.addf %105, %109 : vector<31x128xf32>
    %111 = vector.extract_strided_slice %100 {offsets = [2, 0], sizes = [31, 12], strides = [1, 1]} : vector<33x12xbf16> to vector<31x12xbf16>
    %c5_98 = arith.constant 5 : index
    %c2_99 = arith.constant 2 : index
    %c0_100 = arith.constant 0 : index
    %c0_101 = arith.constant 0 : index
    %112 = vector.load %arg3[%c5_98, %c2_99, %c0_100, %c0_101] : memref<11x3x12x128xbf16, #tpu.memory_space<vmem>>, vector<1x1x12x128xbf16>
    %113 = vector.shape_cast %112 : vector<1x1x12x128xbf16> to vector<12x128xbf16>
    %cst_102 = arith.constant dense<0.000000e+00> : vector<31x128xf32>
    %114 = tpu.matmul %111, %113, %cst_102 {dimension_numbers = #tpu.dot_dimension_numbers<[1], [0], [0], [1], [0, 0, 1, 1], [], []>} : vector<31x12xbf16>, vector<12x128xbf16>, vector<31x128xf32> -> vector<31x128xf32>
    %115 = arith.addf %110, %114 : vector<31x128xf32>
    %c6_i32 = arith.constant 6 : i32
    %116 = arith.addi %0, %c6_i32 : i32
    %c0_103 = arith.constant 0 : index
    %117 = arith.index_cast %116 : i32 to index
    %c0_104 = arith.constant 0 : index
    %c0_105 = arith.constant 0 : index
    %118 = vector.load %arg2[%c0_103, %117, %c0_104, %c0_105] : memref<1x131x33x12xbf16, #tpu.memory_space<vmem>>, vector<1x1x33x12xbf16>
    %119 = vector.shape_cast %118 : vector<1x1x33x12xbf16> to vector<33x12xbf16>
    %120 = vector.extract_strided_slice %119 {offsets = [0, 0], sizes = [31, 12], strides = [1, 1]} : vector<33x12xbf16> to vector<31x12xbf16>
    %c6 = arith.constant 6 : index
    %c0_106 = arith.constant 0 : index
    %c0_107 = arith.constant 0 : index
    %c0_108 = arith.constant 0 : index
    %121 = vector.load %arg3[%c6, %c0_106, %c0_107, %c0_108] : memref<11x3x12x128xbf16, #tpu.memory_space<vmem>>, vector<1x1x12x128xbf16>
    %122 = vector.shape_cast %121 : vector<1x1x12x128xbf16> to vector<12x128xbf16>
    %cst_109 = arith.constant dense<0.000000e+00> : vector<31x128xf32>
    %123 = tpu.matmul %120, %122, %cst_109 {dimension_numbers = #tpu.dot_dimension_numbers<[1], [0], [0], [1], [0, 0, 1, 1], [], []>} : vector<31x12xbf16>, vector<12x128xbf16>, vector<31x128xf32> -> vector<31x128xf32>
    %124 = arith.addf %115, %123 : vector<31x128xf32>
    %125 = vector.extract_strided_slice %119 {offsets = [1, 0], sizes = [31, 12], strides = [1, 1]} : vector<33x12xbf16> to vector<31x12xbf16>
    %c6_110 = arith.constant 6 : index
    %c1_111 = arith.constant 1 : index
    %c0_112 = arith.constant 0 : index
    %c0_113 = arith.constant 0 : index
    %126 = vector.load %arg3[%c6_110, %c1_111, %c0_112, %c0_113] : memref<11x3x12x128xbf16, #tpu.memory_space<vmem>>, vector<1x1x12x128xbf16>
    %127 = vector.shape_cast %126 : vector<1x1x12x128xbf16> to vector<12x128xbf16>
    %cst_114 = arith.constant dense<0.000000e+00> : vector<31x128xf32>
    %128 = tpu.matmul %125, %127, %cst_114 {dimension_numbers = #tpu.dot_dimension_numbers<[1], [0], [0], [1], [0, 0, 1, 1], [], []>} : vector<31x12xbf16>, vector<12x128xbf16>, vector<31x128xf32> -> vector<31x128xf32>
    %129 = arith.addf %124, %128 : vector<31x128xf32>
    %130 = vector.extract_strided_slice %119 {offsets = [2, 0], sizes = [31, 12], strides = [1, 1]} : vector<33x12xbf16> to vector<31x12xbf16>
    %c6_115 = arith.constant 6 : index
    %c2_116 = arith.constant 2 : index
    %c0_117 = arith.constant 0 : index
    %c0_118 = arith.constant 0 : index
    %131 = vector.load %arg3[%c6_115, %c2_116, %c0_117, %c0_118] : memref<11x3x12x128xbf16, #tpu.memory_space<vmem>>, vector<1x1x12x128xbf16>
    %132 = vector.shape_cast %131 : vector<1x1x12x128xbf16> to vector<12x128xbf16>
    %cst_119 = arith.constant dense<0.000000e+00> : vector<31x128xf32>
    %133 = tpu.matmul %130, %132, %cst_119 {dimension_numbers = #tpu.dot_dimension_numbers<[1], [0], [0], [1], [0, 0, 1, 1], [], []>} : vector<31x12xbf16>, vector<12x128xbf16>, vector<31x128xf32> -> vector<31x128xf32>
    %134 = arith.addf %129, %133 : vector<31x128xf32>
    %c7_i32 = arith.constant 7 : i32
    %135 = arith.addi %0, %c7_i32 : i32
    %c0_120 = arith.constant 0 : index
    %136 = arith.index_cast %135 : i32 to index
    %c0_121 = arith.constant 0 : index
    %c0_122 = arith.constant 0 : index
    %137 = vector.load %arg2[%c0_120, %136, %c0_121, %c0_122] : memref<1x131x33x12xbf16, #tpu.memory_space<vmem>>, vector<1x1x33x12xbf16>
    %138 = vector.shape_cast %137 : vector<1x1x33x12xbf16> to vector<33x12xbf16>
    %139 = vector.extract_strided_slice %138 {offsets = [0, 0], sizes = [31, 12], strides = [1, 1]} : vector<33x12xbf16> to vector<31x12xbf16>
    %c7 = arith.constant 7 : index
    %c0_123 = arith.constant 0 : index
    %c0_124 = arith.constant 0 : index
    %c0_125 = arith.constant 0 : index
    %140 = vector.load %arg3[%c7, %c0_123, %c0_124, %c0_125] : memref<11x3x12x128xbf16, #tpu.memory_space<vmem>>, vector<1x1x12x128xbf16>
    %141 = vector.shape_cast %140 : vector<1x1x12x128xbf16> to vector<12x128xbf16>
    %cst_126 = arith.constant dense<0.000000e+00> : vector<31x128xf32>
    %142 = tpu.matmul %139, %141, %cst_126 {dimension_numbers = #tpu.dot_dimension_numbers<[1], [0], [0], [1], [0, 0, 1, 1], [], []>} : vector<31x12xbf16>, vector<12x128xbf16>, vector<31x128xf32> -> vector<31x128xf32>
    %143 = arith.addf %134, %142 : vector<31x128xf32>
    %144 = vector.extract_strided_slice %138 {offsets = [1, 0], sizes = [31, 12], strides = [1, 1]} : vector<33x12xbf16> to vector<31x12xbf16>
    %c7_127 = arith.constant 7 : index
    %c1_128 = arith.constant 1 : index
    %c0_129 = arith.constant 0 : index
    %c0_130 = arith.constant 0 : index
    %145 = vector.load %arg3[%c7_127, %c1_128, %c0_129, %c0_130] : memref<11x3x12x128xbf16, #tpu.memory_space<vmem>>, vector<1x1x12x128xbf16>
    %146 = vector.shape_cast %145 : vector<1x1x12x128xbf16> to vector<12x128xbf16>
    %cst_131 = arith.constant dense<0.000000e+00> : vector<31x128xf32>
    %147 = tpu.matmul %144, %146, %cst_131 {dimension_numbers = #tpu.dot_dimension_numbers<[1], [0], [0], [1], [0, 0, 1, 1], [], []>} : vector<31x12xbf16>, vector<12x128xbf16>, vector<31x128xf32> -> vector<31x128xf32>
    %148 = arith.addf %143, %147 : vector<31x128xf32>
    %149 = vector.extract_strided_slice %138 {offsets = [2, 0], sizes = [31, 12], strides = [1, 1]} : vector<33x12xbf16> to vector<31x12xbf16>
    %c7_132 = arith.constant 7 : index
    %c2_133 = arith.constant 2 : index
    %c0_134 = arith.constant 0 : index
    %c0_135 = arith.constant 0 : index
    %150 = vector.load %arg3[%c7_132, %c2_133, %c0_134, %c0_135] : memref<11x3x12x128xbf16, #tpu.memory_space<vmem>>, vector<1x1x12x128xbf16>
    %151 = vector.shape_cast %150 : vector<1x1x12x128xbf16> to vector<12x128xbf16>
    %cst_136 = arith.constant dense<0.000000e+00> : vector<31x128xf32>
    %152 = tpu.matmul %149, %151, %cst_136 {dimension_numbers = #tpu.dot_dimension_numbers<[1], [0], [0], [1], [0, 0, 1, 1], [], []>} : vector<31x12xbf16>, vector<12x128xbf16>, vector<31x128xf32> -> vector<31x128xf32>
    %153 = arith.addf %148, %152 : vector<31x128xf32>
    %c8_i32 = arith.constant 8 : i32
    %154 = arith.addi %0, %c8_i32 : i32
    %c0_137 = arith.constant 0 : index
    %155 = arith.index_cast %154 : i32 to index
    %c0_138 = arith.constant 0 : index
    %c0_139 = arith.constant 0 : index
    %156 = vector.load %arg2[%c0_137, %155, %c0_138, %c0_139] : memref<1x131x33x12xbf16, #tpu.memory_space<vmem>>, vector<1x1x33x12xbf16>
    %157 = vector.shape_cast %156 : vector<1x1x33x12xbf16> to vector<33x12xbf16>
    %158 = vector.extract_strided_slice %157 {offsets = [0, 0], sizes = [31, 12], strides = [1, 1]} : vector<33x12xbf16> to vector<31x12xbf16>
    %c8 = arith.constant 8 : index
    %c0_140 = arith.constant 0 : index
    %c0_141 = arith.constant 0 : index
    %c0_142 = arith.constant 0 : index
    %159 = vector.load %arg3[%c8, %c0_140, %c0_141, %c0_142] : memref<11x3x12x128xbf16, #tpu.memory_space<vmem>>, vector<1x1x12x128xbf16>
    %160 = vector.shape_cast %159 : vector<1x1x12x128xbf16> to vector<12x128xbf16>
    %cst_143 = arith.constant dense<0.000000e+00> : vector<31x128xf32>
    %161 = tpu.matmul %158, %160, %cst_143 {dimension_numbers = #tpu.dot_dimension_numbers<[1], [0], [0], [1], [0, 0, 1, 1], [], []>} : vector<31x12xbf16>, vector<12x128xbf16>, vector<31x128xf32> -> vector<31x128xf32>
    %162 = arith.addf %153, %161 : vector<31x128xf32>
    %163 = vector.extract_strided_slice %157 {offsets = [1, 0], sizes = [31, 12], strides = [1, 1]} : vector<33x12xbf16> to vector<31x12xbf16>
    %c8_144 = arith.constant 8 : index
    %c1_145 = arith.constant 1 : index
    %c0_146 = arith.constant 0 : index
    %c0_147 = arith.constant 0 : index
    %164 = vector.load %arg3[%c8_144, %c1_145, %c0_146, %c0_147] : memref<11x3x12x128xbf16, #tpu.memory_space<vmem>>, vector<1x1x12x128xbf16>
    %165 = vector.shape_cast %164 : vector<1x1x12x128xbf16> to vector<12x128xbf16>
    %cst_148 = arith.constant dense<0.000000e+00> : vector<31x128xf32>
    %166 = tpu.matmul %163, %165, %cst_148 {dimension_numbers = #tpu.dot_dimension_numbers<[1], [0], [0], [1], [0, 0, 1, 1], [], []>} : vector<31x12xbf16>, vector<12x128xbf16>, vector<31x128xf32> -> vector<31x128xf32>
    %167 = arith.addf %162, %166 : vector<31x128xf32>
    %168 = vector.extract_strided_slice %157 {offsets = [2, 0], sizes = [31, 12], strides = [1, 1]} : vector<33x12xbf16> to vector<31x12xbf16>
    %c8_149 = arith.constant 8 : index
    %c2_150 = arith.constant 2 : index
    %c0_151 = arith.constant 0 : index
    %c0_152 = arith.constant 0 : index
    %169 = vector.load %arg3[%c8_149, %c2_150, %c0_151, %c0_152] : memref<11x3x12x128xbf16, #tpu.memory_space<vmem>>, vector<1x1x12x128xbf16>
    %170 = vector.shape_cast %169 : vector<1x1x12x128xbf16> to vector<12x128xbf16>
    %cst_153 = arith.constant dense<0.000000e+00> : vector<31x128xf32>
    %171 = tpu.matmul %168, %170, %cst_153 {dimension_numbers = #tpu.dot_dimension_numbers<[1], [0], [0], [1], [0, 0, 1, 1], [], []>} : vector<31x12xbf16>, vector<12x128xbf16>, vector<31x128xf32> -> vector<31x128xf32>
    %172 = arith.addf %167, %171 : vector<31x128xf32>
    %c9_i32 = arith.constant 9 : i32
    %173 = arith.addi %0, %c9_i32 : i32
    %c0_154 = arith.constant 0 : index
    %174 = arith.index_cast %173 : i32 to index
    %c0_155 = arith.constant 0 : index
    %c0_156 = arith.constant 0 : index
    %175 = vector.load %arg2[%c0_154, %174, %c0_155, %c0_156] : memref<1x131x33x12xbf16, #tpu.memory_space<vmem>>, vector<1x1x33x12xbf16>
    %176 = vector.shape_cast %175 : vector<1x1x33x12xbf16> to vector<33x12xbf16>
    %177 = vector.extract_strided_slice %176 {offsets = [0, 0], sizes = [31, 12], strides = [1, 1]} : vector<33x12xbf16> to vector<31x12xbf16>
    %c9 = arith.constant 9 : index
    %c0_157 = arith.constant 0 : index
    %c0_158 = arith.constant 0 : index
    %c0_159 = arith.constant 0 : index
    %178 = vector.load %arg3[%c9, %c0_157, %c0_158, %c0_159] : memref<11x3x12x128xbf16, #tpu.memory_space<vmem>>, vector<1x1x12x128xbf16>
    %179 = vector.shape_cast %178 : vector<1x1x12x128xbf16> to vector<12x128xbf16>
    %cst_160 = arith.constant dense<0.000000e+00> : vector<31x128xf32>
    %180 = tpu.matmul %177, %179, %cst_160 {dimension_numbers = #tpu.dot_dimension_numbers<[1], [0], [0], [1], [0, 0, 1, 1], [], []>} : vector<31x12xbf16>, vector<12x128xbf16>, vector<31x128xf32> -> vector<31x128xf32>
    %181 = arith.addf %172, %180 : vector<31x128xf32>
    %182 = vector.extract_strided_slice %176 {offsets = [1, 0], sizes = [31, 12], strides = [1, 1]} : vector<33x12xbf16> to vector<31x12xbf16>
    %c9_161 = arith.constant 9 : index
    %c1_162 = arith.constant 1 : index
    %c0_163 = arith.constant 0 : index
    %c0_164 = arith.constant 0 : index
    %183 = vector.load %arg3[%c9_161, %c1_162, %c0_163, %c0_164] : memref<11x3x12x128xbf16, #tpu.memory_space<vmem>>, vector<1x1x12x128xbf16>
    %184 = vector.shape_cast %183 : vector<1x1x12x128xbf16> to vector<12x128xbf16>
    %cst_165 = arith.constant dense<0.000000e+00> : vector<31x128xf32>
    %185 = tpu.matmul %182, %184, %cst_165 {dimension_numbers = #tpu.dot_dimension_numbers<[1], [0], [0], [1], [0, 0, 1, 1], [], []>} : vector<31x12xbf16>, vector<12x128xbf16>, vector<31x128xf32> -> vector<31x128xf32>
    %186 = arith.addf %181, %185 : vector<31x128xf32>
    %187 = vector.extract_strided_slice %176 {offsets = [2, 0], sizes = [31, 12], strides = [1, 1]} : vector<33x12xbf16> to vector<31x12xbf16>
    %c9_166 = arith.constant 9 : index
    %c2_167 = arith.constant 2 : index
    %c0_168 = arith.constant 0 : index
    %c0_169 = arith.constant 0 : index
    %188 = vector.load %arg3[%c9_166, %c2_167, %c0_168, %c0_169] : memref<11x3x12x128xbf16, #tpu.memory_space<vmem>>, vector<1x1x12x128xbf16>
    %189 = vector.shape_cast %188 : vector<1x1x12x128xbf16> to vector<12x128xbf16>
    %cst_170 = arith.constant dense<0.000000e+00> : vector<31x128xf32>
    %190 = tpu.matmul %187, %189, %cst_170 {dimension_numbers = #tpu.dot_dimension_numbers<[1], [0], [0], [1], [0, 0, 1, 1], [], []>} : vector<31x12xbf16>, vector<12x128xbf16>, vector<31x128xf32> -> vector<31x128xf32>
    %191 = arith.addf %186, %190 : vector<31x128xf32>
    %c10_i32 = arith.constant 10 : i32
    %192 = arith.addi %0, %c10_i32 : i32
    %c0_171 = arith.constant 0 : index
    %193 = arith.index_cast %192 : i32 to index
    %c0_172 = arith.constant 0 : index
    %c0_173 = arith.constant 0 : index
    %194 = vector.load %arg2[%c0_171, %193, %c0_172, %c0_173] : memref<1x131x33x12xbf16, #tpu.memory_space<vmem>>, vector<1x1x33x12xbf16>
    %195 = vector.shape_cast %194 : vector<1x1x33x12xbf16> to vector<33x12xbf16>
    %196 = vector.extract_strided_slice %195 {offsets = [0, 0], sizes = [31, 12], strides = [1, 1]} : vector<33x12xbf16> to vector<31x12xbf16>
    %c10 = arith.constant 10 : index
    %c0_174 = arith.constant 0 : index
    %c0_175 = arith.constant 0 : index
    %c0_176 = arith.constant 0 : index
    %197 = vector.load %arg3[%c10, %c0_174, %c0_175, %c0_176] : memref<11x3x12x128xbf16, #tpu.memory_space<vmem>>, vector<1x1x12x128xbf16>
    %198 = vector.shape_cast %197 : vector<1x1x12x128xbf16> to vector<12x128xbf16>
    %cst_177 = arith.constant dense<0.000000e+00> : vector<31x128xf32>
    %199 = tpu.matmul %196, %198, %cst_177 {dimension_numbers = #tpu.dot_dimension_numbers<[1], [0], [0], [1], [0, 0, 1, 1], [], []>} : vector<31x12xbf16>, vector<12x128xbf16>, vector<31x128xf32> -> vector<31x128xf32>
    %200 = arith.addf %191, %199 : vector<31x128xf32>
    %201 = vector.extract_strided_slice %195 {offsets = [1, 0], sizes = [31, 12], strides = [1, 1]} : vector<33x12xbf16> to vector<31x12xbf16>
    %c10_178 = arith.constant 10 : index
    %c1_179 = arith.constant 1 : index
    %c0_180 = arith.constant 0 : index
    %c0_181 = arith.constant 0 : index
    %202 = vector.load %arg3[%c10_178, %c1_179, %c0_180, %c0_181] : memref<11x3x12x128xbf16, #tpu.memory_space<vmem>>, vector<1x1x12x128xbf16>
    %203 = vector.shape_cast %202 : vector<1x1x12x128xbf16> to vector<12x128xbf16>
    %cst_182 = arith.constant dense<0.000000e+00> : vector<31x128xf32>
    %204 = tpu.matmul %201, %203, %cst_182 {dimension_numbers = #tpu.dot_dimension_numbers<[1], [0], [0], [1], [0, 0, 1, 1], [], []>} : vector<31x12xbf16>, vector<12x128xbf16>, vector<31x128xf32> -> vector<31x128xf32>
    %205 = arith.addf %200, %204 : vector<31x128xf32>
    %206 = vector.extract_strided_slice %195 {offsets = [2, 0], sizes = [31, 12], strides = [1, 1]} : vector<33x12xbf16> to vector<31x12xbf16>
    %c10_183 = arith.constant 10 : index
    %c2_184 = arith.constant 2 : index
    %c0_185 = arith.constant 0 : index
    %c0_186 = arith.constant 0 : index
    %207 = vector.load %arg3[%c10_183, %c2_184, %c0_185, %c0_186] : memref<11x3x12x128xbf16, #tpu.memory_space<vmem>>, vector<1x1x12x128xbf16>
    %208 = vector.shape_cast %207 : vector<1x1x12x128xbf16> to vector<12x128xbf16>
    %cst_187 = arith.constant dense<0.000000e+00> : vector<31x128xf32>
    %209 = tpu.matmul %206, %208, %cst_187 {dimension_numbers = #tpu.dot_dimension_numbers<[1], [0], [0], [1], [0, 0, 1, 1], [], []>} : vector<31x12xbf16>, vector<12x128xbf16>, vector<31x128xf32> -> vector<31x128xf32>
    %210 = arith.addf %205, %209 : vector<31x128xf32>
    %c0_188 = arith.constant 0 : index
    %c0_189 = arith.constant 0 : index
    %211 = vector.load %arg4[%c0_188, %c0_189] : memref<1x128xf32, #tpu.memory_space<vmem>>, vector<1x128xf32>
    %212 = vector.broadcast %211 : vector<1x128xf32> to vector<31x128xf32>
    %213 = arith.addf %210, %212 : vector<31x128xf32>
    %cst_190 = arith.constant 0.000000e+00 : f32
    %214 = vector.broadcast %cst_190 : f32 to vector<31x128xf32>
    %215 = arith.maximumf %213, %214 : vector<31x128xf32>
    %216 = arith.mulf %215, %215 : vector<31x128xf32>
    %c1_i32_191 = arith.constant 1 : i32
    %217 = tpu.dynamic_rotate %216 by %c1_i32_191 dim 1 : vector<31x128xf32>, i32 -> vector<31x128xf32>
    %218 = arith.addf %216, %217 : vector<31x128xf32>
    %c2_i32_192 = arith.constant 2 : i32
    %219 = tpu.dynamic_rotate %216 by %c2_i32_192 dim 1 : vector<31x128xf32>, i32 -> vector<31x128xf32>
    %220 = arith.addf %218, %219 : vector<31x128xf32>
    %c126_i32 = arith.constant 126 : i32
    %221 = tpu.dynamic_rotate %216 by %c126_i32 dim 1 : vector<31x128xf32>, i32 -> vector<31x128xf32>
    %222 = arith.addf %220, %221 : vector<31x128xf32>
    %c127_i32 = arith.constant 127 : i32
    %223 = tpu.dynamic_rotate %216 by %c127_i32 dim 1 : vector<31x128xf32>, i32 -> vector<31x128xf32>
    %224 = arith.addf %222, %223 : vector<31x128xf32>
    %cst_193 = arith.constant 2.000000e-05 : f32
    %225 = vector.broadcast %cst_193 : f32 to vector<31x128xf32>
    %226 = arith.mulf %225, %224 : vector<31x128xf32>
    %cst_194 = arith.constant 2.000000e+00 : f32
    %227 = vector.broadcast %cst_194 : f32 to vector<31x128xf32>
    %228 = arith.addf %227, %226 : vector<31x128xf32>
    %229 = math.log %228 : vector<31x128xf32>
    %cst_195 = arith.constant -7.500000e-01 : f32
    %230 = vector.broadcast %cst_195 : f32 to vector<31x128xf32>
    %231 = arith.mulf %230, %229 : vector<31x128xf32>
    %232 = math.exp %231 : vector<31x128xf32>
    %233 = arith.mulf %215, %232 : vector<31x128xf32>
    %234 = vector.extract_strided_slice %233 {offsets = [0, 0], sizes = [31, 16], strides = [1, 1]} : vector<31x128xf32> to vector<31x16xf32>
    %c0_196 = arith.constant 0 : index
    %c0_197 = arith.constant 0 : index
    %c0_198 = arith.constant 0 : index
    %c0_199 = arith.constant 0 : index
    %235 = vector.load %arg5[%c0_196, %c0_197, %c0_198, %c0_199] : memref<1x1x31x16xf32, #tpu.memory_space<vmem>>, vector<1x1x31x16xf32>
    %236 = vector.shape_cast %235 : vector<1x1x31x16xf32> to vector<31x16xf32>
    %237 = vector.shape_cast %234 : vector<31x16xf32> to vector<1x1x31x16xf32>
    tpu.vector_store %arg5[%c0_196, %c0_197, %c0_198, %c0_199], %237 {strides = array<i32>} : memref<1x1x31x16xf32, #tpu.memory_space<vmem>>, vector<1x1x31x16xf32>,
    return
  }
  func.func @transform_0(%arg0: i32, %arg1: i32) -> (i32, i32, i32, i32) {
    %c0_i32 = arith.constant 0 : i32
    %c0_i32_0 = arith.constant 0 : i32
    %c0_i32_1 = arith.constant 0 : i32
    %c0_i32_2 = arith.constant 0 : i32
    return %arg0, %c0_i32, %c0_i32_0, %c0_i32_1 : i32, i32, i32, i32
  }
  func.func @transform_1(%arg0: i32, %arg1: i32) -> (i32, i32, i32, i32) {
    %c0_i32 = arith.constant 0 : i32
    %c0_i32_0 = arith.constant 0 : i32
    %c0_i32_1 = arith.constant 0 : i32
    %c0_i32_2 = arith.constant 0 : i32
    %c0_i32_3 = arith.constant 0 : i32
    return %c0_i32, %c0_i32_0, %c0_i32_1, %c0_i32_2 : i32, i32, i32, i32
  }
  func.func @transform_2(%arg0: i32, %arg1: i32) -> (i32, i32) {
    %c0_i32 = arith.constant 0 : i32
    %c0_i32_0 = arith.constant 0 : i32
    %c0_i32_1 = arith.constant 0 : i32
    return %c0_i32, %c0_i32_0 : i32, i32
  }
  func.func @transform_3(%arg0: i32, %arg1: i32) -> (i32, i32, i32, i32) {
    %c0_i32 = arith.constant 0 : i32
    %c0_i32_0 = arith.constant 0 : i32
    %c0_i32_1 = arith.constant 0 : i32
    return %arg0, %arg1, %c0_i32, %c0_i32_0 : i32, i32, i32, i32
  }
}

module attributes {stable_mosaic.version = 11 : i64} {
  func.func @_maxpool_row_kernel(%arg0: i32, %arg1: i32, %arg2: memref<1x31x16x32xf32, #tpu.memory_space<vmem>>, %arg3: memref<1x1x15x16xf32, #tpu.memory_space<vmem>>) attributes {dimension_semantics = [#tpu.dimension_semantics<parallel>, #tpu.dimension_semantics<parallel>], iteration_bounds = array<i64: 2, 15>, scalar_prefetch = 0 : i64, scratch_operands = 0 : i64, tpu.core_type = #tpu.core_type<tc>, window_params = [{transform_indices = @transform_0, window_bounds = array<i64: 1, 31, 16, 32>}, {transform_indices = @transform_1, window_bounds = array<i64: 1, 1, 15, 16>}]} {
    %c2_i32 = arith.constant 2 : i32
    %0 = arith.muli %arg1, %c2_i32 : i32
    %c0_i32 = arith.constant 0 : i32
    %1 = arith.addi %0, %c0_i32 : i32
    %c0 = arith.constant 0 : index
    %2 = arith.index_cast %1 : i32 to index
    %c0_0 = arith.constant 0 : index
    %c0_1 = arith.constant 0 : index
    %3 = vector.load %arg2[%c0, %2, %c0_0, %c0_1] : memref<1x31x16x32xf32, #tpu.memory_space<vmem>>, vector<1x1x16x32xf32>
    %4 = vector.shape_cast %3 : vector<1x1x16x32xf32> to vector<16x32xf32>
    %5 = vector.extract_strided_slice %4 {offsets = [0, 0], sizes = [15, 16], strides = [1, 1]} : vector<16x32xf32> to vector<15x16xf32>
    %6 = vector.extract_strided_slice %4 {offsets = [0, 16], sizes = [15, 16], strides = [1, 1]} : vector<16x32xf32> to vector<15x16xf32>
    %7 = arith.maximumf %5, %6 : vector<15x16xf32>
    %8 = vector.extract_strided_slice %4 {offsets = [1, 0], sizes = [15, 16], strides = [1, 1]} : vector<16x32xf32> to vector<15x16xf32>
    %9 = arith.maximumf %7, %8 : vector<15x16xf32>
    %c1_i32 = arith.constant 1 : i32
    %10 = arith.addi %0, %c1_i32 : i32
    %c0_2 = arith.constant 0 : index
    %11 = arith.index_cast %10 : i32 to index
    %c0_3 = arith.constant 0 : index
    %c0_4 = arith.constant 0 : index
    %12 = vector.load %arg2[%c0_2, %11, %c0_3, %c0_4] : memref<1x31x16x32xf32, #tpu.memory_space<vmem>>, vector<1x1x16x32xf32>
    %13 = vector.shape_cast %12 : vector<1x1x16x32xf32> to vector<16x32xf32>
    %14 = vector.extract_strided_slice %13 {offsets = [0, 0], sizes = [15, 16], strides = [1, 1]} : vector<16x32xf32> to vector<15x16xf32>
    %15 = arith.maximumf %9, %14 : vector<15x16xf32>
    %16 = vector.extract_strided_slice %13 {offsets = [0, 16], sizes = [15, 16], strides = [1, 1]} : vector<16x32xf32> to vector<15x16xf32>
    %17 = arith.maximumf %15, %16 : vector<15x16xf32>
    %18 = vector.extract_strided_slice %13 {offsets = [1, 0], sizes = [15, 16], strides = [1, 1]} : vector<16x32xf32> to vector<15x16xf32>
    %19 = arith.maximumf %17, %18 : vector<15x16xf32>
    %c2_i32_5 = arith.constant 2 : i32
    %20 = arith.addi %0, %c2_i32_5 : i32
    %c0_6 = arith.constant 0 : index
    %21 = arith.index_cast %20 : i32 to index
    %c0_7 = arith.constant 0 : index
    %c0_8 = arith.constant 0 : index
    %22 = vector.load %arg2[%c0_6, %21, %c0_7, %c0_8] : memref<1x31x16x32xf32, #tpu.memory_space<vmem>>, vector<1x1x16x32xf32>
    %23 = vector.shape_cast %22 : vector<1x1x16x32xf32> to vector<16x32xf32>
    %24 = vector.extract_strided_slice %23 {offsets = [0, 0], sizes = [15, 16], strides = [1, 1]} : vector<16x32xf32> to vector<15x16xf32>
    %25 = arith.maximumf %19, %24 : vector<15x16xf32>
    %26 = vector.extract_strided_slice %23 {offsets = [0, 16], sizes = [15, 16], strides = [1, 1]} : vector<16x32xf32> to vector<15x16xf32>
    %27 = arith.maximumf %25, %26 : vector<15x16xf32>
    %28 = vector.extract_strided_slice %23 {offsets = [1, 0], sizes = [15, 16], strides = [1, 1]} : vector<16x32xf32> to vector<15x16xf32>
    %29 = arith.maximumf %27, %28 : vector<15x16xf32>
    %c0_9 = arith.constant 0 : index
    %c0_10 = arith.constant 0 : index
    %c0_11 = arith.constant 0 : index
    %c0_12 = arith.constant 0 : index
    %30 = vector.load %arg3[%c0_9, %c0_10, %c0_11, %c0_12] : memref<1x1x15x16xf32, #tpu.memory_space<vmem>>, vector<1x1x15x16xf32>
    %31 = vector.shape_cast %30 : vector<1x1x15x16xf32> to vector<15x16xf32>
    %32 = vector.shape_cast %29 : vector<15x16xf32> to vector<1x1x15x16xf32>
    tpu.vector_store %arg3[%c0_9, %c0_10, %c0_11, %c0_12], %32 {strides = array<i32>} : memref<1x1x15x16xf32, #tpu.memory_space<vmem>>, vector<1x1x15x16xf32>,
    return
  }
  func.func @transform_0(%arg0: i32, %arg1: i32) -> (i32, i32, i32, i32) {
    %c0_i32 = arith.constant 0 : i32
    %c0_i32_0 = arith.constant 0 : i32
    %c0_i32_1 = arith.constant 0 : i32
    %c0_i32_2 = arith.constant 0 : i32
    return %arg0, %c0_i32, %c0_i32_0, %c0_i32_1 : i32, i32, i32, i32
  }
  func.func @transform_1(%arg0: i32, %arg1: i32) -> (i32, i32, i32, i32) {
    %c0_i32 = arith.constant 0 : i32
    %c0_i32_0 = arith.constant 0 : i32
    %c0_i32_1 = arith.constant 0 : i32
    return %arg0, %arg1, %c0_i32, %c0_i32_0 : i32, i32, i32, i32
  }
}

module attributes {stable_mosaic.version = 11 : i64} {
  func.func @_conv_row_kernel(%arg0: i32, %arg1: i32, %arg2: memref<1x19x19x16xbf16, #tpu.memory_space<vmem>>, %arg3: memref<5x5x16x128xbf16, #tpu.memory_space<vmem>>, %arg4: memref<1x128xf32, #tpu.memory_space<vmem>>, %arg5: memref<1x1x15x32xf32, #tpu.memory_space<vmem>>) attributes {dimension_semantics = [#tpu.dimension_semantics<parallel>, #tpu.dimension_semantics<parallel>], iteration_bounds = array<i64: 2, 15>, scalar_prefetch = 0 : i64, scratch_operands = 0 : i64, tpu.core_type = #tpu.core_type<tc>, window_params = [{transform_indices = @transform_0, window_bounds = array<i64: 1, 19, 19, 16>}, {pipeline_mode = #tpu.pipeline_mode<synchronous>, transform_indices = @transform_1, window_bounds = array<i64: 5, 5, 16, 128>}, {pipeline_mode = #tpu.pipeline_mode<synchronous>, transform_indices = @transform_2, window_bounds = array<i64: 1, 128>}, {transform_indices = @transform_3, window_bounds = array<i64: 1, 1, 15, 32>}]} {
    %c1_i32 = arith.constant 1 : i32
    %0 = arith.muli %arg1, %c1_i32 : i32
    %cst = arith.constant 0.000000e+00 : f32
    %1 = vector.broadcast %cst : f32 to vector<15x128xf32>
    %c0_i32 = arith.constant 0 : i32
    %2 = arith.addi %0, %c0_i32 : i32
    %c0 = arith.constant 0 : index
    %3 = arith.index_cast %2 : i32 to index
    %c0_0 = arith.constant 0 : index
    %c0_1 = arith.constant 0 : index
    %4 = vector.load %arg2[%c0, %3, %c0_0, %c0_1] : memref<1x19x19x16xbf16, #tpu.memory_space<vmem>>, vector<1x1x19x16xbf16>
    %5 = vector.shape_cast %4 : vector<1x1x19x16xbf16> to vector<19x16xbf16>
    %6 = vector.extract_strided_slice %5 {offsets = [0, 0], sizes = [15, 16], strides = [1, 1]} : vector<19x16xbf16> to vector<15x16xbf16>
    %c0_2 = arith.constant 0 : index
    %c0_3 = arith.constant 0 : index
    %c0_4 = arith.constant 0 : index
    %c0_5 = arith.constant 0 : index
    %7 = vector.load %arg3[%c0_2, %c0_3, %c0_4, %c0_5] : memref<5x5x16x128xbf16, #tpu.memory_space<vmem>>, vector<1x1x16x128xbf16>
    %8 = vector.shape_cast %7 : vector<1x1x16x128xbf16> to vector<16x128xbf16>
    %cst_6 = arith.constant dense<0.000000e+00> : vector<15x128xf32>
    %9 = tpu.matmul %6, %8, %cst_6 {dimension_numbers = #tpu.dot_dimension_numbers<[1], [0], [0], [1], [0, 0, 1, 1], [], []>} : vector<15x16xbf16>, vector<16x128xbf16>, vector<15x128xf32> -> vector<15x128xf32>
    %10 = arith.addf %1, %9 : vector<15x128xf32>
    %11 = vector.extract_strided_slice %5 {offsets = [1, 0], sizes = [15, 16], strides = [1, 1]} : vector<19x16xbf16> to vector<15x16xbf16>
    %c0_7 = arith.constant 0 : index
    %c1 = arith.constant 1 : index
    %c0_8 = arith.constant 0 : index
    %c0_9 = arith.constant 0 : index
    %12 = vector.load %arg3[%c0_7, %c1, %c0_8, %c0_9] : memref<5x5x16x128xbf16, #tpu.memory_space<vmem>>, vector<1x1x16x128xbf16>
    %13 = vector.shape_cast %12 : vector<1x1x16x128xbf16> to vector<16x128xbf16>
    %cst_10 = arith.constant dense<0.000000e+00> : vector<15x128xf32>
    %14 = tpu.matmul %11, %13, %cst_10 {dimension_numbers = #tpu.dot_dimension_numbers<[1], [0], [0], [1], [0, 0, 1, 1], [], []>} : vector<15x16xbf16>, vector<16x128xbf16>, vector<15x128xf32> -> vector<15x128xf32>
    %15 = arith.addf %10, %14 : vector<15x128xf32>
    %16 = vector.extract_strided_slice %5 {offsets = [2, 0], sizes = [15, 16], strides = [1, 1]} : vector<19x16xbf16> to vector<15x16xbf16>
    %c0_11 = arith.constant 0 : index
    %c2 = arith.constant 2 : index
    %c0_12 = arith.constant 0 : index
    %c0_13 = arith.constant 0 : index
    %17 = vector.load %arg3[%c0_11, %c2, %c0_12, %c0_13] : memref<5x5x16x128xbf16, #tpu.memory_space<vmem>>, vector<1x1x16x128xbf16>
    %18 = vector.shape_cast %17 : vector<1x1x16x128xbf16> to vector<16x128xbf16>
    %cst_14 = arith.constant dense<0.000000e+00> : vector<15x128xf32>
    %19 = tpu.matmul %16, %18, %cst_14 {dimension_numbers = #tpu.dot_dimension_numbers<[1], [0], [0], [1], [0, 0, 1, 1], [], []>} : vector<15x16xbf16>, vector<16x128xbf16>, vector<15x128xf32> -> vector<15x128xf32>
    %20 = arith.addf %15, %19 : vector<15x128xf32>
    %21 = vector.extract_strided_slice %5 {offsets = [3, 0], sizes = [15, 16], strides = [1, 1]} : vector<19x16xbf16> to vector<15x16xbf16>
    %c0_15 = arith.constant 0 : index
    %c3 = arith.constant 3 : index
    %c0_16 = arith.constant 0 : index
    %c0_17 = arith.constant 0 : index
    %22 = vector.load %arg3[%c0_15, %c3, %c0_16, %c0_17] : memref<5x5x16x128xbf16, #tpu.memory_space<vmem>>, vector<1x1x16x128xbf16>
    %23 = vector.shape_cast %22 : vector<1x1x16x128xbf16> to vector<16x128xbf16>
    %cst_18 = arith.constant dense<0.000000e+00> : vector<15x128xf32>
    %24 = tpu.matmul %21, %23, %cst_18 {dimension_numbers = #tpu.dot_dimension_numbers<[1], [0], [0], [1], [0, 0, 1, 1], [], []>} : vector<15x16xbf16>, vector<16x128xbf16>, vector<15x128xf32> -> vector<15x128xf32>
    %25 = arith.addf %20, %24 : vector<15x128xf32>
    %26 = vector.extract_strided_slice %5 {offsets = [4, 0], sizes = [15, 16], strides = [1, 1]} : vector<19x16xbf16> to vector<15x16xbf16>
    %c0_19 = arith.constant 0 : index
    %c4 = arith.constant 4 : index
    %c0_20 = arith.constant 0 : index
    %c0_21 = arith.constant 0 : index
    %27 = vector.load %arg3[%c0_19, %c4, %c0_20, %c0_21] : memref<5x5x16x128xbf16, #tpu.memory_space<vmem>>, vector<1x1x16x128xbf16>
    %28 = vector.shape_cast %27 : vector<1x1x16x128xbf16> to vector<16x128xbf16>
    %cst_22 = arith.constant dense<0.000000e+00> : vector<15x128xf32>
    %29 = tpu.matmul %26, %28, %cst_22 {dimension_numbers = #tpu.dot_dimension_numbers<[1], [0], [0], [1], [0, 0, 1, 1], [], []>} : vector<15x16xbf16>, vector<16x128xbf16>, vector<15x128xf32> -> vector<15x128xf32>
    %30 = arith.addf %25, %29 : vector<15x128xf32>
    %c1_i32_23 = arith.constant 1 : i32
    %31 = arith.addi %0, %c1_i32_23 : i32
    %c0_24 = arith.constant 0 : index
    %32 = arith.index_cast %31 : i32 to index
    %c0_25 = arith.constant 0 : index
    %c0_26 = arith.constant 0 : index
    %33 = vector.load %arg2[%c0_24, %32, %c0_25, %c0_26] : memref<1x19x19x16xbf16, #tpu.memory_space<vmem>>, vector<1x1x19x16xbf16>
    %34 = vector.shape_cast %33 : vector<1x1x19x16xbf16> to vector<19x16xbf16>
    %35 = vector.extract_strided_slice %34 {offsets = [0, 0], sizes = [15, 16], strides = [1, 1]} : vector<19x16xbf16> to vector<15x16xbf16>
    %c1_27 = arith.constant 1 : index
    %c0_28 = arith.constant 0 : index
    %c0_29 = arith.constant 0 : index
    %c0_30 = arith.constant 0 : index
    %36 = vector.load %arg3[%c1_27, %c0_28, %c0_29, %c0_30] : memref<5x5x16x128xbf16, #tpu.memory_space<vmem>>, vector<1x1x16x128xbf16>
    %37 = vector.shape_cast %36 : vector<1x1x16x128xbf16> to vector<16x128xbf16>
    %cst_31 = arith.constant dense<0.000000e+00> : vector<15x128xf32>
    %38 = tpu.matmul %35, %37, %cst_31 {dimension_numbers = #tpu.dot_dimension_numbers<[1], [0], [0], [1], [0, 0, 1, 1], [], []>} : vector<15x16xbf16>, vector<16x128xbf16>, vector<15x128xf32> -> vector<15x128xf32>
    %39 = arith.addf %30, %38 : vector<15x128xf32>
    %40 = vector.extract_strided_slice %34 {offsets = [1, 0], sizes = [15, 16], strides = [1, 1]} : vector<19x16xbf16> to vector<15x16xbf16>
    %c1_32 = arith.constant 1 : index
    %c1_33 = arith.constant 1 : index
    %c0_34 = arith.constant 0 : index
    %c0_35 = arith.constant 0 : index
    %41 = vector.load %arg3[%c1_32, %c1_33, %c0_34, %c0_35] : memref<5x5x16x128xbf16, #tpu.memory_space<vmem>>, vector<1x1x16x128xbf16>
    %42 = vector.shape_cast %41 : vector<1x1x16x128xbf16> to vector<16x128xbf16>
    %cst_36 = arith.constant dense<0.000000e+00> : vector<15x128xf32>
    %43 = tpu.matmul %40, %42, %cst_36 {dimension_numbers = #tpu.dot_dimension_numbers<[1], [0], [0], [1], [0, 0, 1, 1], [], []>} : vector<15x16xbf16>, vector<16x128xbf16>, vector<15x128xf32> -> vector<15x128xf32>
    %44 = arith.addf %39, %43 : vector<15x128xf32>
    %45 = vector.extract_strided_slice %34 {offsets = [2, 0], sizes = [15, 16], strides = [1, 1]} : vector<19x16xbf16> to vector<15x16xbf16>
    %c1_37 = arith.constant 1 : index
    %c2_38 = arith.constant 2 : index
    %c0_39 = arith.constant 0 : index
    %c0_40 = arith.constant 0 : index
    %46 = vector.load %arg3[%c1_37, %c2_38, %c0_39, %c0_40] : memref<5x5x16x128xbf16, #tpu.memory_space<vmem>>, vector<1x1x16x128xbf16>
    %47 = vector.shape_cast %46 : vector<1x1x16x128xbf16> to vector<16x128xbf16>
    %cst_41 = arith.constant dense<0.000000e+00> : vector<15x128xf32>
    %48 = tpu.matmul %45, %47, %cst_41 {dimension_numbers = #tpu.dot_dimension_numbers<[1], [0], [0], [1], [0, 0, 1, 1], [], []>} : vector<15x16xbf16>, vector<16x128xbf16>, vector<15x128xf32> -> vector<15x128xf32>
    %49 = arith.addf %44, %48 : vector<15x128xf32>
    %50 = vector.extract_strided_slice %34 {offsets = [3, 0], sizes = [15, 16], strides = [1, 1]} : vector<19x16xbf16> to vector<15x16xbf16>
    %c1_42 = arith.constant 1 : index
    %c3_43 = arith.constant 3 : index
    %c0_44 = arith.constant 0 : index
    %c0_45 = arith.constant 0 : index
    %51 = vector.load %arg3[%c1_42, %c3_43, %c0_44, %c0_45] : memref<5x5x16x128xbf16, #tpu.memory_space<vmem>>, vector<1x1x16x128xbf16>
    %52 = vector.shape_cast %51 : vector<1x1x16x128xbf16> to vector<16x128xbf16>
    %cst_46 = arith.constant dense<0.000000e+00> : vector<15x128xf32>
    %53 = tpu.matmul %50, %52, %cst_46 {dimension_numbers = #tpu.dot_dimension_numbers<[1], [0], [0], [1], [0, 0, 1, 1], [], []>} : vector<15x16xbf16>, vector<16x128xbf16>, vector<15x128xf32> -> vector<15x128xf32>
    %54 = arith.addf %49, %53 : vector<15x128xf32>
    %55 = vector.extract_strided_slice %34 {offsets = [4, 0], sizes = [15, 16], strides = [1, 1]} : vector<19x16xbf16> to vector<15x16xbf16>
    %c1_47 = arith.constant 1 : index
    %c4_48 = arith.constant 4 : index
    %c0_49 = arith.constant 0 : index
    %c0_50 = arith.constant 0 : index
    %56 = vector.load %arg3[%c1_47, %c4_48, %c0_49, %c0_50] : memref<5x5x16x128xbf16, #tpu.memory_space<vmem>>, vector<1x1x16x128xbf16>
    %57 = vector.shape_cast %56 : vector<1x1x16x128xbf16> to vector<16x128xbf16>
    %cst_51 = arith.constant dense<0.000000e+00> : vector<15x128xf32>
    %58 = tpu.matmul %55, %57, %cst_51 {dimension_numbers = #tpu.dot_dimension_numbers<[1], [0], [0], [1], [0, 0, 1, 1], [], []>} : vector<15x16xbf16>, vector<16x128xbf16>, vector<15x128xf32> -> vector<15x128xf32>
    %59 = arith.addf %54, %58 : vector<15x128xf32>
    %c2_i32 = arith.constant 2 : i32
    %60 = arith.addi %0, %c2_i32 : i32
    %c0_52 = arith.constant 0 : index
    %61 = arith.index_cast %60 : i32 to index
    %c0_53 = arith.constant 0 : index
    %c0_54 = arith.constant 0 : index
    %62 = vector.load %arg2[%c0_52, %61, %c0_53, %c0_54] : memref<1x19x19x16xbf16, #tpu.memory_space<vmem>>, vector<1x1x19x16xbf16>
    %63 = vector.shape_cast %62 : vector<1x1x19x16xbf16> to vector<19x16xbf16>
    %64 = vector.extract_strided_slice %63 {offsets = [0, 0], sizes = [15, 16], strides = [1, 1]} : vector<19x16xbf16> to vector<15x16xbf16>
    %c2_55 = arith.constant 2 : index
    %c0_56 = arith.constant 0 : index
    %c0_57 = arith.constant 0 : index
    %c0_58 = arith.constant 0 : index
    %65 = vector.load %arg3[%c2_55, %c0_56, %c0_57, %c0_58] : memref<5x5x16x128xbf16, #tpu.memory_space<vmem>>, vector<1x1x16x128xbf16>
    %66 = vector.shape_cast %65 : vector<1x1x16x128xbf16> to vector<16x128xbf16>
    %cst_59 = arith.constant dense<0.000000e+00> : vector<15x128xf32>
    %67 = tpu.matmul %64, %66, %cst_59 {dimension_numbers = #tpu.dot_dimension_numbers<[1], [0], [0], [1], [0, 0, 1, 1], [], []>} : vector<15x16xbf16>, vector<16x128xbf16>, vector<15x128xf32> -> vector<15x128xf32>
    %68 = arith.addf %59, %67 : vector<15x128xf32>
    %69 = vector.extract_strided_slice %63 {offsets = [1, 0], sizes = [15, 16], strides = [1, 1]} : vector<19x16xbf16> to vector<15x16xbf16>
    %c2_60 = arith.constant 2 : index
    %c1_61 = arith.constant 1 : index
    %c0_62 = arith.constant 0 : index
    %c0_63 = arith.constant 0 : index
    %70 = vector.load %arg3[%c2_60, %c1_61, %c0_62, %c0_63] : memref<5x5x16x128xbf16, #tpu.memory_space<vmem>>, vector<1x1x16x128xbf16>
    %71 = vector.shape_cast %70 : vector<1x1x16x128xbf16> to vector<16x128xbf16>
    %cst_64 = arith.constant dense<0.000000e+00> : vector<15x128xf32>
    %72 = tpu.matmul %69, %71, %cst_64 {dimension_numbers = #tpu.dot_dimension_numbers<[1], [0], [0], [1], [0, 0, 1, 1], [], []>} : vector<15x16xbf16>, vector<16x128xbf16>, vector<15x128xf32> -> vector<15x128xf32>
    %73 = arith.addf %68, %72 : vector<15x128xf32>
    %74 = vector.extract_strided_slice %63 {offsets = [2, 0], sizes = [15, 16], strides = [1, 1]} : vector<19x16xbf16> to vector<15x16xbf16>
    %c2_65 = arith.constant 2 : index
    %c2_66 = arith.constant 2 : index
    %c0_67 = arith.constant 0 : index
    %c0_68 = arith.constant 0 : index
    %75 = vector.load %arg3[%c2_65, %c2_66, %c0_67, %c0_68] : memref<5x5x16x128xbf16, #tpu.memory_space<vmem>>, vector<1x1x16x128xbf16>
    %76 = vector.shape_cast %75 : vector<1x1x16x128xbf16> to vector<16x128xbf16>
    %cst_69 = arith.constant dense<0.000000e+00> : vector<15x128xf32>
    %77 = tpu.matmul %74, %76, %cst_69 {dimension_numbers = #tpu.dot_dimension_numbers<[1], [0], [0], [1], [0, 0, 1, 1], [], []>} : vector<15x16xbf16>, vector<16x128xbf16>, vector<15x128xf32> -> vector<15x128xf32>
    %78 = arith.addf %73, %77 : vector<15x128xf32>
    %79 = vector.extract_strided_slice %63 {offsets = [3, 0], sizes = [15, 16], strides = [1, 1]} : vector<19x16xbf16> to vector<15x16xbf16>
    %c2_70 = arith.constant 2 : index
    %c3_71 = arith.constant 3 : index
    %c0_72 = arith.constant 0 : index
    %c0_73 = arith.constant 0 : index
    %80 = vector.load %arg3[%c2_70, %c3_71, %c0_72, %c0_73] : memref<5x5x16x128xbf16, #tpu.memory_space<vmem>>, vector<1x1x16x128xbf16>
    %81 = vector.shape_cast %80 : vector<1x1x16x128xbf16> to vector<16x128xbf16>
    %cst_74 = arith.constant dense<0.000000e+00> : vector<15x128xf32>
    %82 = tpu.matmul %79, %81, %cst_74 {dimension_numbers = #tpu.dot_dimension_numbers<[1], [0], [0], [1], [0, 0, 1, 1], [], []>} : vector<15x16xbf16>, vector<16x128xbf16>, vector<15x128xf32> -> vector<15x128xf32>
    %83 = arith.addf %78, %82 : vector<15x128xf32>
    %84 = vector.extract_strided_slice %63 {offsets = [4, 0], sizes = [15, 16], strides = [1, 1]} : vector<19x16xbf16> to vector<15x16xbf16>
    %c2_75 = arith.constant 2 : index
    %c4_76 = arith.constant 4 : index
    %c0_77 = arith.constant 0 : index
    %c0_78 = arith.constant 0 : index
    %85 = vector.load %arg3[%c2_75, %c4_76, %c0_77, %c0_78] : memref<5x5x16x128xbf16, #tpu.memory_space<vmem>>, vector<1x1x16x128xbf16>
    %86 = vector.shape_cast %85 : vector<1x1x16x128xbf16> to vector<16x128xbf16>
    %cst_79 = arith.constant dense<0.000000e+00> : vector<15x128xf32>
    %87 = tpu.matmul %84, %86, %cst_79 {dimension_numbers = #tpu.dot_dimension_numbers<[1], [0], [0], [1], [0, 0, 1, 1], [], []>} : vector<15x16xbf16>, vector<16x128xbf16>, vector<15x128xf32> -> vector<15x128xf32>
    %88 = arith.addf %83, %87 : vector<15x128xf32>
    %c3_i32 = arith.constant 3 : i32
    %89 = arith.addi %0, %c3_i32 : i32
    %c0_80 = arith.constant 0 : index
    %90 = arith.index_cast %89 : i32 to index
    %c0_81 = arith.constant 0 : index
    %c0_82 = arith.constant 0 : index
    %91 = vector.load %arg2[%c0_80, %90, %c0_81, %c0_82] : memref<1x19x19x16xbf16, #tpu.memory_space<vmem>>, vector<1x1x19x16xbf16>
    %92 = vector.shape_cast %91 : vector<1x1x19x16xbf16> to vector<19x16xbf16>
    %93 = vector.extract_strided_slice %92 {offsets = [0, 0], sizes = [15, 16], strides = [1, 1]} : vector<19x16xbf16> to vector<15x16xbf16>
    %c3_83 = arith.constant 3 : index
    %c0_84 = arith.constant 0 : index
    %c0_85 = arith.constant 0 : index
    %c0_86 = arith.constant 0 : index
    %94 = vector.load %arg3[%c3_83, %c0_84, %c0_85, %c0_86] : memref<5x5x16x128xbf16, #tpu.memory_space<vmem>>, vector<1x1x16x128xbf16>
    %95 = vector.shape_cast %94 : vector<1x1x16x128xbf16> to vector<16x128xbf16>
    %cst_87 = arith.constant dense<0.000000e+00> : vector<15x128xf32>
    %96 = tpu.matmul %93, %95, %cst_87 {dimension_numbers = #tpu.dot_dimension_numbers<[1], [0], [0], [1], [0, 0, 1, 1], [], []>} : vector<15x16xbf16>, vector<16x128xbf16>, vector<15x128xf32> -> vector<15x128xf32>
    %97 = arith.addf %88, %96 : vector<15x128xf32>
    %98 = vector.extract_strided_slice %92 {offsets = [1, 0], sizes = [15, 16], strides = [1, 1]} : vector<19x16xbf16> to vector<15x16xbf16>
    %c3_88 = arith.constant 3 : index
    %c1_89 = arith.constant 1 : index
    %c0_90 = arith.constant 0 : index
    %c0_91 = arith.constant 0 : index
    %99 = vector.load %arg3[%c3_88, %c1_89, %c0_90, %c0_91] : memref<5x5x16x128xbf16, #tpu.memory_space<vmem>>, vector<1x1x16x128xbf16>
    %100 = vector.shape_cast %99 : vector<1x1x16x128xbf16> to vector<16x128xbf16>
    %cst_92 = arith.constant dense<0.000000e+00> : vector<15x128xf32>
    %101 = tpu.matmul %98, %100, %cst_92 {dimension_numbers = #tpu.dot_dimension_numbers<[1], [0], [0], [1], [0, 0, 1, 1], [], []>} : vector<15x16xbf16>, vector<16x128xbf16>, vector<15x128xf32> -> vector<15x128xf32>
    %102 = arith.addf %97, %101 : vector<15x128xf32>
    %103 = vector.extract_strided_slice %92 {offsets = [2, 0], sizes = [15, 16], strides = [1, 1]} : vector<19x16xbf16> to vector<15x16xbf16>
    %c3_93 = arith.constant 3 : index
    %c2_94 = arith.constant 2 : index
    %c0_95 = arith.constant 0 : index
    %c0_96 = arith.constant 0 : index
    %104 = vector.load %arg3[%c3_93, %c2_94, %c0_95, %c0_96] : memref<5x5x16x128xbf16, #tpu.memory_space<vmem>>, vector<1x1x16x128xbf16>
    %105 = vector.shape_cast %104 : vector<1x1x16x128xbf16> to vector<16x128xbf16>
    %cst_97 = arith.constant dense<0.000000e+00> : vector<15x128xf32>
    %106 = tpu.matmul %103, %105, %cst_97 {dimension_numbers = #tpu.dot_dimension_numbers<[1], [0], [0], [1], [0, 0, 1, 1], [], []>} : vector<15x16xbf16>, vector<16x128xbf16>, vector<15x128xf32> -> vector<15x128xf32>
    %107 = arith.addf %102, %106 : vector<15x128xf32>
    %108 = vector.extract_strided_slice %92 {offsets = [3, 0], sizes = [15, 16], strides = [1, 1]} : vector<19x16xbf16> to vector<15x16xbf16>
    %c3_98 = arith.constant 3 : index
    %c3_99 = arith.constant 3 : index
    %c0_100 = arith.constant 0 : index
    %c0_101 = arith.constant 0 : index
    %109 = vector.load %arg3[%c3_98, %c3_99, %c0_100, %c0_101] : memref<5x5x16x128xbf16, #tpu.memory_space<vmem>>, vector<1x1x16x128xbf16>
    %110 = vector.shape_cast %109 : vector<1x1x16x128xbf16> to vector<16x128xbf16>
    %cst_102 = arith.constant dense<0.000000e+00> : vector<15x128xf32>
    %111 = tpu.matmul %108, %110, %cst_102 {dimension_numbers = #tpu.dot_dimension_numbers<[1], [0], [0], [1], [0, 0, 1, 1], [], []>} : vector<15x16xbf16>, vector<16x128xbf16>, vector<15x128xf32> -> vector<15x128xf32>
    %112 = arith.addf %107, %111 : vector<15x128xf32>
    %113 = vector.extract_strided_slice %92 {offsets = [4, 0], sizes = [15, 16], strides = [1, 1]} : vector<19x16xbf16> to vector<15x16xbf16>
    %c3_103 = arith.constant 3 : index
    %c4_104 = arith.constant 4 : index
    %c0_105 = arith.constant 0 : index
    %c0_106 = arith.constant 0 : index
    %114 = vector.load %arg3[%c3_103, %c4_104, %c0_105, %c0_106] : memref<5x5x16x128xbf16, #tpu.memory_space<vmem>>, vector<1x1x16x128xbf16>
    %115 = vector.shape_cast %114 : vector<1x1x16x128xbf16> to vector<16x128xbf16>
    %cst_107 = arith.constant dense<0.000000e+00> : vector<15x128xf32>
    %116 = tpu.matmul %113, %115, %cst_107 {dimension_numbers = #tpu.dot_dimension_numbers<[1], [0], [0], [1], [0, 0, 1, 1], [], []>} : vector<15x16xbf16>, vector<16x128xbf16>, vector<15x128xf32> -> vector<15x128xf32>
    %117 = arith.addf %112, %116 : vector<15x128xf32>
    %c4_i32 = arith.constant 4 : i32
    %118 = arith.addi %0, %c4_i32 : i32
    %c0_108 = arith.constant 0 : index
    %119 = arith.index_cast %118 : i32 to index
    %c0_109 = arith.constant 0 : index
    %c0_110 = arith.constant 0 : index
    %120 = vector.load %arg2[%c0_108, %119, %c0_109, %c0_110] : memref<1x19x19x16xbf16, #tpu.memory_space<vmem>>, vector<1x1x19x16xbf16>
    %121 = vector.shape_cast %120 : vector<1x1x19x16xbf16> to vector<19x16xbf16>
    %122 = vector.extract_strided_slice %121 {offsets = [0, 0], sizes = [15, 16], strides = [1, 1]} : vector<19x16xbf16> to vector<15x16xbf16>
    %c4_111 = arith.constant 4 : index
    %c0_112 = arith.constant 0 : index
    %c0_113 = arith.constant 0 : index
    %c0_114 = arith.constant 0 : index
    %123 = vector.load %arg3[%c4_111, %c0_112, %c0_113, %c0_114] : memref<5x5x16x128xbf16, #tpu.memory_space<vmem>>, vector<1x1x16x128xbf16>
    %124 = vector.shape_cast %123 : vector<1x1x16x128xbf16> to vector<16x128xbf16>
    %cst_115 = arith.constant dense<0.000000e+00> : vector<15x128xf32>
    %125 = tpu.matmul %122, %124, %cst_115 {dimension_numbers = #tpu.dot_dimension_numbers<[1], [0], [0], [1], [0, 0, 1, 1], [], []>} : vector<15x16xbf16>, vector<16x128xbf16>, vector<15x128xf32> -> vector<15x128xf32>
    %126 = arith.addf %117, %125 : vector<15x128xf32>
    %127 = vector.extract_strided_slice %121 {offsets = [1, 0], sizes = [15, 16], strides = [1, 1]} : vector<19x16xbf16> to vector<15x16xbf16>
    %c4_116 = arith.constant 4 : index
    %c1_117 = arith.constant 1 : index
    %c0_118 = arith.constant 0 : index
    %c0_119 = arith.constant 0 : index
    %128 = vector.load %arg3[%c4_116, %c1_117, %c0_118, %c0_119] : memref<5x5x16x128xbf16, #tpu.memory_space<vmem>>, vector<1x1x16x128xbf16>
    %129 = vector.shape_cast %128 : vector<1x1x16x128xbf16> to vector<16x128xbf16>
    %cst_120 = arith.constant dense<0.000000e+00> : vector<15x128xf32>
    %130 = tpu.matmul %127, %129, %cst_120 {dimension_numbers = #tpu.dot_dimension_numbers<[1], [0], [0], [1], [0, 0, 1, 1], [], []>} : vector<15x16xbf16>, vector<16x128xbf16>, vector<15x128xf32> -> vector<15x128xf32>
    %131 = arith.addf %126, %130 : vector<15x128xf32>
    %132 = vector.extract_strided_slice %121 {offsets = [2, 0], sizes = [15, 16], strides = [1, 1]} : vector<19x16xbf16> to vector<15x16xbf16>
    %c4_121 = arith.constant 4 : index
    %c2_122 = arith.constant 2 : index
    %c0_123 = arith.constant 0 : index
    %c0_124 = arith.constant 0 : index
    %133 = vector.load %arg3[%c4_121, %c2_122, %c0_123, %c0_124] : memref<5x5x16x128xbf16, #tpu.memory_space<vmem>>, vector<1x1x16x128xbf16>
    %134 = vector.shape_cast %133 : vector<1x1x16x128xbf16> to vector<16x128xbf16>
    %cst_125 = arith.constant dense<0.000000e+00> : vector<15x128xf32>
    %135 = tpu.matmul %132, %134, %cst_125 {dimension_numbers = #tpu.dot_dimension_numbers<[1], [0], [0], [1], [0, 0, 1, 1], [], []>} : vector<15x16xbf16>, vector<16x128xbf16>, vector<15x128xf32> -> vector<15x128xf32>
    %136 = arith.addf %131, %135 : vector<15x128xf32>
    %137 = vector.extract_strided_slice %121 {offsets = [3, 0], sizes = [15, 16], strides = [1, 1]} : vector<19x16xbf16> to vector<15x16xbf16>
    %c4_126 = arith.constant 4 : index
    %c3_127 = arith.constant 3 : index
    %c0_128 = arith.constant 0 : index
    %c0_129 = arith.constant 0 : index
    %138 = vector.load %arg3[%c4_126, %c3_127, %c0_128, %c0_129] : memref<5x5x16x128xbf16, #tpu.memory_space<vmem>>, vector<1x1x16x128xbf16>
    %139 = vector.shape_cast %138 : vector<1x1x16x128xbf16> to vector<16x128xbf16>
    %cst_130 = arith.constant dense<0.000000e+00> : vector<15x128xf32>
    %140 = tpu.matmul %137, %139, %cst_130 {dimension_numbers = #tpu.dot_dimension_numbers<[1], [0], [0], [1], [0, 0, 1, 1], [], []>} : vector<15x16xbf16>, vector<16x128xbf16>, vector<15x128xf32> -> vector<15x128xf32>
    %141 = arith.addf %136, %140 : vector<15x128xf32>
    %142 = vector.extract_strided_slice %121 {offsets = [4, 0], sizes = [15, 16], strides = [1, 1]} : vector<19x16xbf16> to vector<15x16xbf16>
    %c4_131 = arith.constant 4 : index
    %c4_132 = arith.constant 4 : index
    %c0_133 = arith.constant 0 : index
    %c0_134 = arith.constant 0 : index
    %143 = vector.load %arg3[%c4_131, %c4_132, %c0_133, %c0_134] : memref<5x5x16x128xbf16, #tpu.memory_space<vmem>>, vector<1x1x16x128xbf16>
    %144 = vector.shape_cast %143 : vector<1x1x16x128xbf16> to vector<16x128xbf16>
    %cst_135 = arith.constant dense<0.000000e+00> : vector<15x128xf32>
    %145 = tpu.matmul %142, %144, %cst_135 {dimension_numbers = #tpu.dot_dimension_numbers<[1], [0], [0], [1], [0, 0, 1, 1], [], []>} : vector<15x16xbf16>, vector<16x128xbf16>, vector<15x128xf32> -> vector<15x128xf32>
    %146 = arith.addf %141, %145 : vector<15x128xf32>
    %c0_136 = arith.constant 0 : index
    %c0_137 = arith.constant 0 : index
    %147 = vector.load %arg4[%c0_136, %c0_137] : memref<1x128xf32, #tpu.memory_space<vmem>>, vector<1x128xf32>
    %148 = vector.broadcast %147 : vector<1x128xf32> to vector<15x128xf32>
    %149 = arith.addf %146, %148 : vector<15x128xf32>
    %cst_138 = arith.constant 0.000000e+00 : f32
    %150 = vector.broadcast %cst_138 : f32 to vector<15x128xf32>
    %151 = arith.maximumf %149, %150 : vector<15x128xf32>
    %152 = arith.mulf %151, %151 : vector<15x128xf32>
    %c1_i32_139 = arith.constant 1 : i32
    %153 = tpu.dynamic_rotate %152 by %c1_i32_139 dim 1 : vector<15x128xf32>, i32 -> vector<15x128xf32>
    %154 = arith.addf %152, %153 : vector<15x128xf32>
    %c2_i32_140 = arith.constant 2 : i32
    %155 = tpu.dynamic_rotate %152 by %c2_i32_140 dim 1 : vector<15x128xf32>, i32 -> vector<15x128xf32>
    %156 = arith.addf %154, %155 : vector<15x128xf32>
    %c126_i32 = arith.constant 126 : i32
    %157 = tpu.dynamic_rotate %152 by %c126_i32 dim 1 : vector<15x128xf32>, i32 -> vector<15x128xf32>
    %158 = arith.addf %156, %157 : vector<15x128xf32>
    %c127_i32 = arith.constant 127 : i32
    %159 = tpu.dynamic_rotate %152 by %c127_i32 dim 1 : vector<15x128xf32>, i32 -> vector<15x128xf32>
    %160 = arith.addf %158, %159 : vector<15x128xf32>
    %cst_141 = arith.constant 2.000000e-05 : f32
    %161 = vector.broadcast %cst_141 : f32 to vector<15x128xf32>
    %162 = arith.mulf %161, %160 : vector<15x128xf32>
    %cst_142 = arith.constant 2.000000e+00 : f32
    %163 = vector.broadcast %cst_142 : f32 to vector<15x128xf32>
    %164 = arith.addf %163, %162 : vector<15x128xf32>
    %165 = math.log %164 : vector<15x128xf32>
    %cst_143 = arith.constant -7.500000e-01 : f32
    %166 = vector.broadcast %cst_143 : f32 to vector<15x128xf32>
    %167 = arith.mulf %166, %165 : vector<15x128xf32>
    %168 = math.exp %167 : vector<15x128xf32>
    %169 = arith.mulf %151, %168 : vector<15x128xf32>
    %170 = vector.extract_strided_slice %169 {offsets = [0, 0], sizes = [15, 32], strides = [1, 1]} : vector<15x128xf32> to vector<15x32xf32>
    %c0_144 = arith.constant 0 : index
    %c0_145 = arith.constant 0 : index
    %c0_146 = arith.constant 0 : index
    %c0_147 = arith.constant 0 : index
    %171 = vector.load %arg5[%c0_144, %c0_145, %c0_146, %c0_147] : memref<1x1x15x32xf32, #tpu.memory_space<vmem>>, vector<1x1x15x32xf32>
    %172 = vector.shape_cast %171 : vector<1x1x15x32xf32> to vector<15x32xf32>
    %173 = vector.shape_cast %170 : vector<15x32xf32> to vector<1x1x15x32xf32>
    tpu.vector_store %arg5[%c0_144, %c0_145, %c0_146, %c0_147], %173 {strides = array<i32>} : memref<1x1x15x32xf32, #tpu.memory_space<vmem>>, vector<1x1x15x32xf32>,
    return
  }
  func.func @transform_0(%arg0: i32, %arg1: i32) -> (i32, i32, i32, i32) {
    %c0_i32 = arith.constant 0 : i32
    %c0_i32_0 = arith.constant 0 : i32
    %c0_i32_1 = arith.constant 0 : i32
    %c0_i32_2 = arith.constant 0 : i32
    return %arg0, %c0_i32, %c0_i32_0, %c0_i32_1 : i32, i32, i32, i32
  }
  func.func @transform_1(%arg0: i32, %arg1: i32) -> (i32, i32, i32, i32) {
    %c0_i32 = arith.constant 0 : i32
    %c0_i32_0 = arith.constant 0 : i32
    %c0_i32_1 = arith.constant 0 : i32
    %c0_i32_2 = arith.constant 0 : i32
    %c0_i32_3 = arith.constant 0 : i32
    return %c0_i32, %c0_i32_0, %c0_i32_1, %c0_i32_2 : i32, i32, i32, i32
  }
  func.func @transform_2(%arg0: i32, %arg1: i32) -> (i32, i32) {
    %c0_i32 = arith.constant 0 : i32
    %c0_i32_0 = arith.constant 0 : i32
    %c0_i32_1 = arith.constant 0 : i32
    return %c0_i32, %c0_i32_0 : i32, i32
  }
  func.func @transform_3(%arg0: i32, %arg1: i32) -> (i32, i32, i32, i32) {
    %c0_i32 = arith.constant 0 : i32
    %c0_i32_0 = arith.constant 0 : i32
    %c0_i32_1 = arith.constant 0 : i32
    return %arg0, %arg1, %c0_i32, %c0_i32_0 : i32, i32, i32, i32
  }
}

module attributes {stable_mosaic.version = 11 : i64} {
  func.func @_maxpool_row_kernel(%arg0: i32, %arg1: i32, %arg2: memref<1x15x8x64xf32, #tpu.memory_space<vmem>>, %arg3: memref<1x1x7x32xf32, #tpu.memory_space<vmem>>) attributes {dimension_semantics = [#tpu.dimension_semantics<parallel>, #tpu.dimension_semantics<parallel>], iteration_bounds = array<i64: 2, 7>, scalar_prefetch = 0 : i64, scratch_operands = 0 : i64, tpu.core_type = #tpu.core_type<tc>, window_params = [{transform_indices = @transform_0, window_bounds = array<i64: 1, 15, 8, 64>}, {transform_indices = @transform_1, window_bounds = array<i64: 1, 1, 7, 32>}]} {
    %c2_i32 = arith.constant 2 : i32
    %0 = arith.muli %arg1, %c2_i32 : i32
    %c0_i32 = arith.constant 0 : i32
    %1 = arith.addi %0, %c0_i32 : i32
    %c0 = arith.constant 0 : index
    %2 = arith.index_cast %1 : i32 to index
    %c0_0 = arith.constant 0 : index
    %c0_1 = arith.constant 0 : index
    %3 = vector.load %arg2[%c0, %2, %c0_0, %c0_1] : memref<1x15x8x64xf32, #tpu.memory_space<vmem>>, vector<1x1x8x64xf32>
    %4 = vector.shape_cast %3 : vector<1x1x8x64xf32> to vector<8x64xf32>
    %5 = vector.extract_strided_slice %4 {offsets = [0, 0], sizes = [7, 32], strides = [1, 1]} : vector<8x64xf32> to vector<7x32xf32>
    %6 = vector.extract_strided_slice %4 {offsets = [0, 32], sizes = [7, 32], strides = [1, 1]} : vector<8x64xf32> to vector<7x32xf32>
    %7 = arith.maximumf %5, %6 : vector<7x32xf32>
    %8 = vector.extract_strided_slice %4 {offsets = [1, 0], sizes = [7, 32], strides = [1, 1]} : vector<8x64xf32> to vector<7x32xf32>
    %9 = arith.maximumf %7, %8 : vector<7x32xf32>
    %c1_i32 = arith.constant 1 : i32
    %10 = arith.addi %0, %c1_i32 : i32
    %c0_2 = arith.constant 0 : index
    %11 = arith.index_cast %10 : i32 to index
    %c0_3 = arith.constant 0 : index
    %c0_4 = arith.constant 0 : index
    %12 = vector.load %arg2[%c0_2, %11, %c0_3, %c0_4] : memref<1x15x8x64xf32, #tpu.memory_space<vmem>>, vector<1x1x8x64xf32>
    %13 = vector.shape_cast %12 : vector<1x1x8x64xf32> to vector<8x64xf32>
    %14 = vector.extract_strided_slice %13 {offsets = [0, 0], sizes = [7, 32], strides = [1, 1]} : vector<8x64xf32> to vector<7x32xf32>
    %15 = arith.maximumf %9, %14 : vector<7x32xf32>
    %16 = vector.extract_strided_slice %13 {offsets = [0, 32], sizes = [7, 32], strides = [1, 1]} : vector<8x64xf32> to vector<7x32xf32>
    %17 = arith.maximumf %15, %16 : vector<7x32xf32>
    %18 = vector.extract_strided_slice %13 {offsets = [1, 0], sizes = [7, 32], strides = [1, 1]} : vector<8x64xf32> to vector<7x32xf32>
    %19 = arith.maximumf %17, %18 : vector<7x32xf32>
    %c2_i32_5 = arith.constant 2 : i32
    %20 = arith.addi %0, %c2_i32_5 : i32
    %c0_6 = arith.constant 0 : index
    %21 = arith.index_cast %20 : i32 to index
    %c0_7 = arith.constant 0 : index
    %c0_8 = arith.constant 0 : index
    %22 = vector.load %arg2[%c0_6, %21, %c0_7, %c0_8] : memref<1x15x8x64xf32, #tpu.memory_space<vmem>>, vector<1x1x8x64xf32>
    %23 = vector.shape_cast %22 : vector<1x1x8x64xf32> to vector<8x64xf32>
    %24 = vector.extract_strided_slice %23 {offsets = [0, 0], sizes = [7, 32], strides = [1, 1]} : vector<8x64xf32> to vector<7x32xf32>
    %25 = arith.maximumf %19, %24 : vector<7x32xf32>
    %26 = vector.extract_strided_slice %23 {offsets = [0, 32], sizes = [7, 32], strides = [1, 1]} : vector<8x64xf32> to vector<7x32xf32>
    %27 = arith.maximumf %25, %26 : vector<7x32xf32>
    %28 = vector.extract_strided_slice %23 {offsets = [1, 0], sizes = [7, 32], strides = [1, 1]} : vector<8x64xf32> to vector<7x32xf32>
    %29 = arith.maximumf %27, %28 : vector<7x32xf32>
    %c0_9 = arith.constant 0 : index
    %c0_10 = arith.constant 0 : index
    %c0_11 = arith.constant 0 : index
    %c0_12 = arith.constant 0 : index
    %30 = vector.load %arg3[%c0_9, %c0_10, %c0_11, %c0_12] : memref<1x1x7x32xf32, #tpu.memory_space<vmem>>, vector<1x1x7x32xf32>
    %31 = vector.shape_cast %30 : vector<1x1x7x32xf32> to vector<7x32xf32>
    %32 = vector.shape_cast %29 : vector<7x32xf32> to vector<1x1x7x32xf32>
    tpu.vector_store %arg3[%c0_9, %c0_10, %c0_11, %c0_12], %32 {strides = array<i32>} : memref<1x1x7x32xf32, #tpu.memory_space<vmem>>, vector<1x1x7x32xf32>,
    return
  }
  func.func @transform_0(%arg0: i32, %arg1: i32) -> (i32, i32, i32, i32) {
    %c0_i32 = arith.constant 0 : i32
    %c0_i32_0 = arith.constant 0 : i32
    %c0_i32_1 = arith.constant 0 : i32
    %c0_i32_2 = arith.constant 0 : i32
    return %arg0, %c0_i32, %c0_i32_0, %c0_i32_1 : i32, i32, i32, i32
  }
  func.func @transform_1(%arg0: i32, %arg1: i32) -> (i32, i32, i32, i32) {
    %c0_i32 = arith.constant 0 : i32
    %c0_i32_0 = arith.constant 0 : i32
    %c0_i32_1 = arith.constant 0 : i32
    return %arg0, %arg1, %c0_i32, %c0_i32_0 : i32, i32, i32, i32
  }
}

module attributes {stable_mosaic.version = 11 : i64} {
  func.func @_conv_row_kernel(%arg0: i32, %arg1: i32, %arg2: memref<1x9x9x32xbf16, #tpu.memory_space<vmem>>, %arg3: memref<3x3x32x128xbf16, #tpu.memory_space<vmem>>, %arg4: memref<1x128xf32, #tpu.memory_space<vmem>>, %arg5: memref<1x1x7x48xf32, #tpu.memory_space<vmem>>) attributes {dimension_semantics = [#tpu.dimension_semantics<parallel>, #tpu.dimension_semantics<parallel>], iteration_bounds = array<i64: 2, 7>, scalar_prefetch = 0 : i64, scratch_operands = 0 : i64, tpu.core_type = #tpu.core_type<tc>, window_params = [{transform_indices = @transform_0, window_bounds = array<i64: 1, 9, 9, 32>}, {pipeline_mode = #tpu.pipeline_mode<synchronous>, transform_indices = @transform_1, window_bounds = array<i64: 3, 3, 32, 128>}, {pipeline_mode = #tpu.pipeline_mode<synchronous>, transform_indices = @transform_2, window_bounds = array<i64: 1, 128>}, {transform_indices = @transform_3, window_bounds = array<i64: 1, 1, 7, 48>}]} {
    %c1_i32 = arith.constant 1 : i32
    %0 = arith.muli %arg1, %c1_i32 : i32
    %cst = arith.constant 0.000000e+00 : f32
    %1 = vector.broadcast %cst : f32 to vector<7x128xf32>
    %c0_i32 = arith.constant 0 : i32
    %2 = arith.addi %0, %c0_i32 : i32
    %c0 = arith.constant 0 : index
    %3 = arith.index_cast %2 : i32 to index
    %c0_0 = arith.constant 0 : index
    %c0_1 = arith.constant 0 : index
    %4 = vector.load %arg2[%c0, %3, %c0_0, %c0_1] : memref<1x9x9x32xbf16, #tpu.memory_space<vmem>>, vector<1x1x9x32xbf16>
    %5 = vector.shape_cast %4 : vector<1x1x9x32xbf16> to vector<9x32xbf16>
    %6 = vector.extract_strided_slice %5 {offsets = [0, 0], sizes = [7, 32], strides = [1, 1]} : vector<9x32xbf16> to vector<7x32xbf16>
    %c0_2 = arith.constant 0 : index
    %c0_3 = arith.constant 0 : index
    %c0_4 = arith.constant 0 : index
    %c0_5 = arith.constant 0 : index
    %7 = vector.load %arg3[%c0_2, %c0_3, %c0_4, %c0_5] : memref<3x3x32x128xbf16, #tpu.memory_space<vmem>>, vector<1x1x32x128xbf16>
    %8 = vector.shape_cast %7 : vector<1x1x32x128xbf16> to vector<32x128xbf16>
    %cst_6 = arith.constant dense<0.000000e+00> : vector<7x128xf32>
    %9 = tpu.matmul %6, %8, %cst_6 {dimension_numbers = #tpu.dot_dimension_numbers<[1], [0], [0], [1], [0, 0, 1, 1], [], []>} : vector<7x32xbf16>, vector<32x128xbf16>, vector<7x128xf32> -> vector<7x128xf32>
    %10 = arith.addf %1, %9 : vector<7x128xf32>
    %11 = vector.extract_strided_slice %5 {offsets = [1, 0], sizes = [7, 32], strides = [1, 1]} : vector<9x32xbf16> to vector<7x32xbf16>
    %c0_7 = arith.constant 0 : index
    %c1 = arith.constant 1 : index
    %c0_8 = arith.constant 0 : index
    %c0_9 = arith.constant 0 : index
    %12 = vector.load %arg3[%c0_7, %c1, %c0_8, %c0_9] : memref<3x3x32x128xbf16, #tpu.memory_space<vmem>>, vector<1x1x32x128xbf16>
    %13 = vector.shape_cast %12 : vector<1x1x32x128xbf16> to vector<32x128xbf16>
    %cst_10 = arith.constant dense<0.000000e+00> : vector<7x128xf32>
    %14 = tpu.matmul %11, %13, %cst_10 {dimension_numbers = #tpu.dot_dimension_numbers<[1], [0], [0], [1], [0, 0, 1, 1], [], []>} : vector<7x32xbf16>, vector<32x128xbf16>, vector<7x128xf32> -> vector<7x128xf32>
    %15 = arith.addf %10, %14 : vector<7x128xf32>
    %16 = vector.extract_strided_slice %5 {offsets = [2, 0], sizes = [7, 32], strides = [1, 1]} : vector<9x32xbf16> to vector<7x32xbf16>
    %c0_11 = arith.constant 0 : index
    %c2 = arith.constant 2 : index
    %c0_12 = arith.constant 0 : index
    %c0_13 = arith.constant 0 : index
    %17 = vector.load %arg3[%c0_11, %c2, %c0_12, %c0_13] : memref<3x3x32x128xbf16, #tpu.memory_space<vmem>>, vector<1x1x32x128xbf16>
    %18 = vector.shape_cast %17 : vector<1x1x32x128xbf16> to vector<32x128xbf16>
    %cst_14 = arith.constant dense<0.000000e+00> : vector<7x128xf32>
    %19 = tpu.matmul %16, %18, %cst_14 {dimension_numbers = #tpu.dot_dimension_numbers<[1], [0], [0], [1], [0, 0, 1, 1], [], []>} : vector<7x32xbf16>, vector<32x128xbf16>, vector<7x128xf32> -> vector<7x128xf32>
    %20 = arith.addf %15, %19 : vector<7x128xf32>
    %c1_i32_15 = arith.constant 1 : i32
    %21 = arith.addi %0, %c1_i32_15 : i32
    %c0_16 = arith.constant 0 : index
    %22 = arith.index_cast %21 : i32 to index
    %c0_17 = arith.constant 0 : index
    %c0_18 = arith.constant 0 : index
    %23 = vector.load %arg2[%c0_16, %22, %c0_17, %c0_18] : memref<1x9x9x32xbf16, #tpu.memory_space<vmem>>, vector<1x1x9x32xbf16>
    %24 = vector.shape_cast %23 : vector<1x1x9x32xbf16> to vector<9x32xbf16>
    %25 = vector.extract_strided_slice %24 {offsets = [0, 0], sizes = [7, 32], strides = [1, 1]} : vector<9x32xbf16> to vector<7x32xbf16>
    %c1_19 = arith.constant 1 : index
    %c0_20 = arith.constant 0 : index
    %c0_21 = arith.constant 0 : index
    %c0_22 = arith.constant 0 : index
    %26 = vector.load %arg3[%c1_19, %c0_20, %c0_21, %c0_22] : memref<3x3x32x128xbf16, #tpu.memory_space<vmem>>, vector<1x1x32x128xbf16>
    %27 = vector.shape_cast %26 : vector<1x1x32x128xbf16> to vector<32x128xbf16>
    %cst_23 = arith.constant dense<0.000000e+00> : vector<7x128xf32>
    %28 = tpu.matmul %25, %27, %cst_23 {dimension_numbers = #tpu.dot_dimension_numbers<[1], [0], [0], [1], [0, 0, 1, 1], [], []>} : vector<7x32xbf16>, vector<32x128xbf16>, vector<7x128xf32> -> vector<7x128xf32>
    %29 = arith.addf %20, %28 : vector<7x128xf32>
    %30 = vector.extract_strided_slice %24 {offsets = [1, 0], sizes = [7, 32], strides = [1, 1]} : vector<9x32xbf16> to vector<7x32xbf16>
    %c1_24 = arith.constant 1 : index
    %c1_25 = arith.constant 1 : index
    %c0_26 = arith.constant 0 : index
    %c0_27 = arith.constant 0 : index
    %31 = vector.load %arg3[%c1_24, %c1_25, %c0_26, %c0_27] : memref<3x3x32x128xbf16, #tpu.memory_space<vmem>>, vector<1x1x32x128xbf16>
    %32 = vector.shape_cast %31 : vector<1x1x32x128xbf16> to vector<32x128xbf16>
    %cst_28 = arith.constant dense<0.000000e+00> : vector<7x128xf32>
    %33 = tpu.matmul %30, %32, %cst_28 {dimension_numbers = #tpu.dot_dimension_numbers<[1], [0], [0], [1], [0, 0, 1, 1], [], []>} : vector<7x32xbf16>, vector<32x128xbf16>, vector<7x128xf32> -> vector<7x128xf32>
    %34 = arith.addf %29, %33 : vector<7x128xf32>
    %35 = vector.extract_strided_slice %24 {offsets = [2, 0], sizes = [7, 32], strides = [1, 1]} : vector<9x32xbf16> to vector<7x32xbf16>
    %c1_29 = arith.constant 1 : index
    %c2_30 = arith.constant 2 : index
    %c0_31 = arith.constant 0 : index
    %c0_32 = arith.constant 0 : index
    %36 = vector.load %arg3[%c1_29, %c2_30, %c0_31, %c0_32] : memref<3x3x32x128xbf16, #tpu.memory_space<vmem>>, vector<1x1x32x128xbf16>
    %37 = vector.shape_cast %36 : vector<1x1x32x128xbf16> to vector<32x128xbf16>
    %cst_33 = arith.constant dense<0.000000e+00> : vector<7x128xf32>
    %38 = tpu.matmul %35, %37, %cst_33 {dimension_numbers = #tpu.dot_dimension_numbers<[1], [0], [0], [1], [0, 0, 1, 1], [], []>} : vector<7x32xbf16>, vector<32x128xbf16>, vector<7x128xf32> -> vector<7x128xf32>
    %39 = arith.addf %34, %38 : vector<7x128xf32>
    %c2_i32 = arith.constant 2 : i32
    %40 = arith.addi %0, %c2_i32 : i32
    %c0_34 = arith.constant 0 : index
    %41 = arith.index_cast %40 : i32 to index
    %c0_35 = arith.constant 0 : index
    %c0_36 = arith.constant 0 : index
    %42 = vector.load %arg2[%c0_34, %41, %c0_35, %c0_36] : memref<1x9x9x32xbf16, #tpu.memory_space<vmem>>, vector<1x1x9x32xbf16>
    %43 = vector.shape_cast %42 : vector<1x1x9x32xbf16> to vector<9x32xbf16>
    %44 = vector.extract_strided_slice %43 {offsets = [0, 0], sizes = [7, 32], strides = [1, 1]} : vector<9x32xbf16> to vector<7x32xbf16>
    %c2_37 = arith.constant 2 : index
    %c0_38 = arith.constant 0 : index
    %c0_39 = arith.constant 0 : index
    %c0_40 = arith.constant 0 : index
    %45 = vector.load %arg3[%c2_37, %c0_38, %c0_39, %c0_40] : memref<3x3x32x128xbf16, #tpu.memory_space<vmem>>, vector<1x1x32x128xbf16>
    %46 = vector.shape_cast %45 : vector<1x1x32x128xbf16> to vector<32x128xbf16>
    %cst_41 = arith.constant dense<0.000000e+00> : vector<7x128xf32>
    %47 = tpu.matmul %44, %46, %cst_41 {dimension_numbers = #tpu.dot_dimension_numbers<[1], [0], [0], [1], [0, 0, 1, 1], [], []>} : vector<7x32xbf16>, vector<32x128xbf16>, vector<7x128xf32> -> vector<7x128xf32>
    %48 = arith.addf %39, %47 : vector<7x128xf32>
    %49 = vector.extract_strided_slice %43 {offsets = [1, 0], sizes = [7, 32], strides = [1, 1]} : vector<9x32xbf16> to vector<7x32xbf16>
    %c2_42 = arith.constant 2 : index
    %c1_43 = arith.constant 1 : index
    %c0_44 = arith.constant 0 : index
    %c0_45 = arith.constant 0 : index
    %50 = vector.load %arg3[%c2_42, %c1_43, %c0_44, %c0_45] : memref<3x3x32x128xbf16, #tpu.memory_space<vmem>>, vector<1x1x32x128xbf16>
    %51 = vector.shape_cast %50 : vector<1x1x32x128xbf16> to vector<32x128xbf16>
    %cst_46 = arith.constant dense<0.000000e+00> : vector<7x128xf32>
    %52 = tpu.matmul %49, %51, %cst_46 {dimension_numbers = #tpu.dot_dimension_numbers<[1], [0], [0], [1], [0, 0, 1, 1], [], []>} : vector<7x32xbf16>, vector<32x128xbf16>, vector<7x128xf32> -> vector<7x128xf32>
    %53 = arith.addf %48, %52 : vector<7x128xf32>
    %54 = vector.extract_strided_slice %43 {offsets = [2, 0], sizes = [7, 32], strides = [1, 1]} : vector<9x32xbf16> to vector<7x32xbf16>
    %c2_47 = arith.constant 2 : index
    %c2_48 = arith.constant 2 : index
    %c0_49 = arith.constant 0 : index
    %c0_50 = arith.constant 0 : index
    %55 = vector.load %arg3[%c2_47, %c2_48, %c0_49, %c0_50] : memref<3x3x32x128xbf16, #tpu.memory_space<vmem>>, vector<1x1x32x128xbf16>
    %56 = vector.shape_cast %55 : vector<1x1x32x128xbf16> to vector<32x128xbf16>
    %cst_51 = arith.constant dense<0.000000e+00> : vector<7x128xf32>
    %57 = tpu.matmul %54, %56, %cst_51 {dimension_numbers = #tpu.dot_dimension_numbers<[1], [0], [0], [1], [0, 0, 1, 1], [], []>} : vector<7x32xbf16>, vector<32x128xbf16>, vector<7x128xf32> -> vector<7x128xf32>
    %58 = arith.addf %53, %57 : vector<7x128xf32>
    %c0_52 = arith.constant 0 : index
    %c0_53 = arith.constant 0 : index
    %59 = vector.load %arg4[%c0_52, %c0_53] : memref<1x128xf32, #tpu.memory_space<vmem>>, vector<1x128xf32>
    %60 = vector.broadcast %59 : vector<1x128xf32> to vector<7x128xf32>
    %61 = arith.addf %58, %60 : vector<7x128xf32>
    %cst_54 = arith.constant 0.000000e+00 : f32
    %62 = vector.broadcast %cst_54 : f32 to vector<7x128xf32>
    %63 = arith.maximumf %61, %62 : vector<7x128xf32>
    %64 = vector.extract_strided_slice %63 {offsets = [0, 0], sizes = [7, 48], strides = [1, 1]} : vector<7x128xf32> to vector<7x48xf32>
    %c0_55 = arith.constant 0 : index
    %c0_56 = arith.constant 0 : index
    %c0_57 = arith.constant 0 : index
    %c0_58 = arith.constant 0 : index
    %65 = vector.load %arg5[%c0_55, %c0_56, %c0_57, %c0_58] : memref<1x1x7x48xf32, #tpu.memory_space<vmem>>, vector<1x1x7x48xf32>
    %66 = vector.shape_cast %65 : vector<1x1x7x48xf32> to vector<7x48xf32>
    %67 = vector.shape_cast %64 : vector<7x48xf32> to vector<1x1x7x48xf32>
    tpu.vector_store %arg5[%c0_55, %c0_56, %c0_57, %c0_58], %67 {strides = array<i32>} : memref<1x1x7x48xf32, #tpu.memory_space<vmem>>, vector<1x1x7x48xf32>,
    return
  }
  func.func @transform_0(%arg0: i32, %arg1: i32) -> (i32, i32, i32, i32) {
    %c0_i32 = arith.constant 0 : i32
    %c0_i32_0 = arith.constant 0 : i32
    %c0_i32_1 = arith.constant 0 : i32
    %c0_i32_2 = arith.constant 0 : i32
    return %arg0, %c0_i32, %c0_i32_0, %c0_i32_1 : i32, i32, i32, i32
  }
  func.func @transform_1(%arg0: i32, %arg1: i32) -> (i32, i32, i32, i32) {
    %c0_i32 = arith.constant 0 : i32
    %c0_i32_0 = arith.constant 0 : i32
    %c0_i32_1 = arith.constant 0 : i32
    %c0_i32_2 = arith.constant 0 : i32
    %c0_i32_3 = arith.constant 0 : i32
    return %c0_i32, %c0_i32_0, %c0_i32_1, %c0_i32_2 : i32, i32, i32, i32
  }
  func.func @transform_2(%arg0: i32, %arg1: i32) -> (i32, i32) {
    %c0_i32 = arith.constant 0 : i32
    %c0_i32_0 = arith.constant 0 : i32
    %c0_i32_1 = arith.constant 0 : i32
    return %c0_i32, %c0_i32_0 : i32, i32
  }
  func.func @transform_3(%arg0: i32, %arg1: i32) -> (i32, i32, i32, i32) {
    %c0_i32 = arith.constant 0 : i32
    %c0_i32_0 = arith.constant 0 : i32
    %c0_i32_1 = arith.constant 0 : i32
    return %arg0, %arg1, %c0_i32, %c0_i32_0 : i32, i32, i32, i32
  }
}

module attributes {stable_mosaic.version = 11 : i64} {
  func.func @_conv_row_kernel(%arg0: i32, %arg1: i32, %arg2: memref<1x9x9x48xbf16, #tpu.memory_space<vmem>>, %arg3: memref<3x3x48x128xbf16, #tpu.memory_space<vmem>>, %arg4: memref<1x128xf32, #tpu.memory_space<vmem>>, %arg5: memref<1x1x7x48xf32, #tpu.memory_space<vmem>>) attributes {dimension_semantics = [#tpu.dimension_semantics<parallel>, #tpu.dimension_semantics<parallel>], iteration_bounds = array<i64: 2, 7>, scalar_prefetch = 0 : i64, scratch_operands = 0 : i64, tpu.core_type = #tpu.core_type<tc>, window_params = [{transform_indices = @transform_0, window_bounds = array<i64: 1, 9, 9, 48>}, {pipeline_mode = #tpu.pipeline_mode<synchronous>, transform_indices = @transform_1, window_bounds = array<i64: 3, 3, 48, 128>}, {pipeline_mode = #tpu.pipeline_mode<synchronous>, transform_indices = @transform_2, window_bounds = array<i64: 1, 128>}, {transform_indices = @transform_3, window_bounds = array<i64: 1, 1, 7, 48>}]} {
    %c1_i32 = arith.constant 1 : i32
    %0 = arith.muli %arg1, %c1_i32 : i32
    %cst = arith.constant 0.000000e+00 : f32
    %1 = vector.broadcast %cst : f32 to vector<7x128xf32>
    %c0_i32 = arith.constant 0 : i32
    %2 = arith.addi %0, %c0_i32 : i32
    %c0 = arith.constant 0 : index
    %3 = arith.index_cast %2 : i32 to index
    %c0_0 = arith.constant 0 : index
    %c0_1 = arith.constant 0 : index
    %4 = vector.load %arg2[%c0, %3, %c0_0, %c0_1] : memref<1x9x9x48xbf16, #tpu.memory_space<vmem>>, vector<1x1x9x48xbf16>
    %5 = vector.shape_cast %4 : vector<1x1x9x48xbf16> to vector<9x48xbf16>
    %6 = vector.extract_strided_slice %5 {offsets = [0, 0], sizes = [7, 48], strides = [1, 1]} : vector<9x48xbf16> to vector<7x48xbf16>
    %c0_2 = arith.constant 0 : index
    %c0_3 = arith.constant 0 : index
    %c0_4 = arith.constant 0 : index
    %c0_5 = arith.constant 0 : index
    %7 = vector.load %arg3[%c0_2, %c0_3, %c0_4, %c0_5] : memref<3x3x48x128xbf16, #tpu.memory_space<vmem>>, vector<1x1x48x128xbf16>
    %8 = vector.shape_cast %7 : vector<1x1x48x128xbf16> to vector<48x128xbf16>
    %cst_6 = arith.constant dense<0.000000e+00> : vector<7x128xf32>
    %9 = tpu.matmul %6, %8, %cst_6 {dimension_numbers = #tpu.dot_dimension_numbers<[1], [0], [0], [1], [0, 0, 1, 1], [], []>} : vector<7x48xbf16>, vector<48x128xbf16>, vector<7x128xf32> -> vector<7x128xf32>
    %10 = arith.addf %1, %9 : vector<7x128xf32>
    %11 = vector.extract_strided_slice %5 {offsets = [1, 0], sizes = [7, 48], strides = [1, 1]} : vector<9x48xbf16> to vector<7x48xbf16>
    %c0_7 = arith.constant 0 : index
    %c1 = arith.constant 1 : index
    %c0_8 = arith.constant 0 : index
    %c0_9 = arith.constant 0 : index
    %12 = vector.load %arg3[%c0_7, %c1, %c0_8, %c0_9] : memref<3x3x48x128xbf16, #tpu.memory_space<vmem>>, vector<1x1x48x128xbf16>
    %13 = vector.shape_cast %12 : vector<1x1x48x128xbf16> to vector<48x128xbf16>
    %cst_10 = arith.constant dense<0.000000e+00> : vector<7x128xf32>
    %14 = tpu.matmul %11, %13, %cst_10 {dimension_numbers = #tpu.dot_dimension_numbers<[1], [0], [0], [1], [0, 0, 1, 1], [], []>} : vector<7x48xbf16>, vector<48x128xbf16>, vector<7x128xf32> -> vector<7x128xf32>
    %15 = arith.addf %10, %14 : vector<7x128xf32>
    %16 = vector.extract_strided_slice %5 {offsets = [2, 0], sizes = [7, 48], strides = [1, 1]} : vector<9x48xbf16> to vector<7x48xbf16>
    %c0_11 = arith.constant 0 : index
    %c2 = arith.constant 2 : index
    %c0_12 = arith.constant 0 : index
    %c0_13 = arith.constant 0 : index
    %17 = vector.load %arg3[%c0_11, %c2, %c0_12, %c0_13] : memref<3x3x48x128xbf16, #tpu.memory_space<vmem>>, vector<1x1x48x128xbf16>
    %18 = vector.shape_cast %17 : vector<1x1x48x128xbf16> to vector<48x128xbf16>
    %cst_14 = arith.constant dense<0.000000e+00> : vector<7x128xf32>
    %19 = tpu.matmul %16, %18, %cst_14 {dimension_numbers = #tpu.dot_dimension_numbers<[1], [0], [0], [1], [0, 0, 1, 1], [], []>} : vector<7x48xbf16>, vector<48x128xbf16>, vector<7x128xf32> -> vector<7x128xf32>
    %20 = arith.addf %15, %19 : vector<7x128xf32>
    %c1_i32_15 = arith.constant 1 : i32
    %21 = arith.addi %0, %c1_i32_15 : i32
    %c0_16 = arith.constant 0 : index
    %22 = arith.index_cast %21 : i32 to index
    %c0_17 = arith.constant 0 : index
    %c0_18 = arith.constant 0 : index
    %23 = vector.load %arg2[%c0_16, %22, %c0_17, %c0_18] : memref<1x9x9x48xbf16, #tpu.memory_space<vmem>>, vector<1x1x9x48xbf16>
    %24 = vector.shape_cast %23 : vector<1x1x9x48xbf16> to vector<9x48xbf16>
    %25 = vector.extract_strided_slice %24 {offsets = [0, 0], sizes = [7, 48], strides = [1, 1]} : vector<9x48xbf16> to vector<7x48xbf16>
    %c1_19 = arith.constant 1 : index
    %c0_20 = arith.constant 0 : index
    %c0_21 = arith.constant 0 : index
    %c0_22 = arith.constant 0 : index
    %26 = vector.load %arg3[%c1_19, %c0_20, %c0_21, %c0_22] : memref<3x3x48x128xbf16, #tpu.memory_space<vmem>>, vector<1x1x48x128xbf16>
    %27 = vector.shape_cast %26 : vector<1x1x48x128xbf16> to vector<48x128xbf16>
    %cst_23 = arith.constant dense<0.000000e+00> : vector<7x128xf32>
    %28 = tpu.matmul %25, %27, %cst_23 {dimension_numbers = #tpu.dot_dimension_numbers<[1], [0], [0], [1], [0, 0, 1, 1], [], []>} : vector<7x48xbf16>, vector<48x128xbf16>, vector<7x128xf32> -> vector<7x128xf32>
    %29 = arith.addf %20, %28 : vector<7x128xf32>
    %30 = vector.extract_strided_slice %24 {offsets = [1, 0], sizes = [7, 48], strides = [1, 1]} : vector<9x48xbf16> to vector<7x48xbf16>
    %c1_24 = arith.constant 1 : index
    %c1_25 = arith.constant 1 : index
    %c0_26 = arith.constant 0 : index
    %c0_27 = arith.constant 0 : index
    %31 = vector.load %arg3[%c1_24, %c1_25, %c0_26, %c0_27] : memref<3x3x48x128xbf16, #tpu.memory_space<vmem>>, vector<1x1x48x128xbf16>
    %32 = vector.shape_cast %31 : vector<1x1x48x128xbf16> to vector<48x128xbf16>
    %cst_28 = arith.constant dense<0.000000e+00> : vector<7x128xf32>
    %33 = tpu.matmul %30, %32, %cst_28 {dimension_numbers = #tpu.dot_dimension_numbers<[1], [0], [0], [1], [0, 0, 1, 1], [], []>} : vector<7x48xbf16>, vector<48x128xbf16>, vector<7x128xf32> -> vector<7x128xf32>
    %34 = arith.addf %29, %33 : vector<7x128xf32>
    %35 = vector.extract_strided_slice %24 {offsets = [2, 0], sizes = [7, 48], strides = [1, 1]} : vector<9x48xbf16> to vector<7x48xbf16>
    %c1_29 = arith.constant 1 : index
    %c2_30 = arith.constant 2 : index
    %c0_31 = arith.constant 0 : index
    %c0_32 = arith.constant 0 : index
    %36 = vector.load %arg3[%c1_29, %c2_30, %c0_31, %c0_32] : memref<3x3x48x128xbf16, #tpu.memory_space<vmem>>, vector<1x1x48x128xbf16>
    %37 = vector.shape_cast %36 : vector<1x1x48x128xbf16> to vector<48x128xbf16>
    %cst_33 = arith.constant dense<0.000000e+00> : vector<7x128xf32>
    %38 = tpu.matmul %35, %37, %cst_33 {dimension_numbers = #tpu.dot_dimension_numbers<[1], [0], [0], [1], [0, 0, 1, 1], [], []>} : vector<7x48xbf16>, vector<48x128xbf16>, vector<7x128xf32> -> vector<7x128xf32>
    %39 = arith.addf %34, %38 : vector<7x128xf32>
    %c2_i32 = arith.constant 2 : i32
    %40 = arith.addi %0, %c2_i32 : i32
    %c0_34 = arith.constant 0 : index
    %41 = arith.index_cast %40 : i32 to index
    %c0_35 = arith.constant 0 : index
    %c0_36 = arith.constant 0 : index
    %42 = vector.load %arg2[%c0_34, %41, %c0_35, %c0_36] : memref<1x9x9x48xbf16, #tpu.memory_space<vmem>>, vector<1x1x9x48xbf16>
    %43 = vector.shape_cast %42 : vector<1x1x9x48xbf16> to vector<9x48xbf16>
    %44 = vector.extract_strided_slice %43 {offsets = [0, 0], sizes = [7, 48], strides = [1, 1]} : vector<9x48xbf16> to vector<7x48xbf16>
    %c2_37 = arith.constant 2 : index
    %c0_38 = arith.constant 0 : index
    %c0_39 = arith.constant 0 : index
    %c0_40 = arith.constant 0 : index
    %45 = vector.load %arg3[%c2_37, %c0_38, %c0_39, %c0_40] : memref<3x3x48x128xbf16, #tpu.memory_space<vmem>>, vector<1x1x48x128xbf16>
    %46 = vector.shape_cast %45 : vector<1x1x48x128xbf16> to vector<48x128xbf16>
    %cst_41 = arith.constant dense<0.000000e+00> : vector<7x128xf32>
    %47 = tpu.matmul %44, %46, %cst_41 {dimension_numbers = #tpu.dot_dimension_numbers<[1], [0], [0], [1], [0, 0, 1, 1], [], []>} : vector<7x48xbf16>, vector<48x128xbf16>, vector<7x128xf32> -> vector<7x128xf32>
    %48 = arith.addf %39, %47 : vector<7x128xf32>
    %49 = vector.extract_strided_slice %43 {offsets = [1, 0], sizes = [7, 48], strides = [1, 1]} : vector<9x48xbf16> to vector<7x48xbf16>
    %c2_42 = arith.constant 2 : index
    %c1_43 = arith.constant 1 : index
    %c0_44 = arith.constant 0 : index
    %c0_45 = arith.constant 0 : index
    %50 = vector.load %arg3[%c2_42, %c1_43, %c0_44, %c0_45] : memref<3x3x48x128xbf16, #tpu.memory_space<vmem>>, vector<1x1x48x128xbf16>
    %51 = vector.shape_cast %50 : vector<1x1x48x128xbf16> to vector<48x128xbf16>
    %cst_46 = arith.constant dense<0.000000e+00> : vector<7x128xf32>
    %52 = tpu.matmul %49, %51, %cst_46 {dimension_numbers = #tpu.dot_dimension_numbers<[1], [0], [0], [1], [0, 0, 1, 1], [], []>} : vector<7x48xbf16>, vector<48x128xbf16>, vector<7x128xf32> -> vector<7x128xf32>
    %53 = arith.addf %48, %52 : vector<7x128xf32>
    %54 = vector.extract_strided_slice %43 {offsets = [2, 0], sizes = [7, 48], strides = [1, 1]} : vector<9x48xbf16> to vector<7x48xbf16>
    %c2_47 = arith.constant 2 : index
    %c2_48 = arith.constant 2 : index
    %c0_49 = arith.constant 0 : index
    %c0_50 = arith.constant 0 : index
    %55 = vector.load %arg3[%c2_47, %c2_48, %c0_49, %c0_50] : memref<3x3x48x128xbf16, #tpu.memory_space<vmem>>, vector<1x1x48x128xbf16>
    %56 = vector.shape_cast %55 : vector<1x1x48x128xbf16> to vector<48x128xbf16>
    %cst_51 = arith.constant dense<0.000000e+00> : vector<7x128xf32>
    %57 = tpu.matmul %54, %56, %cst_51 {dimension_numbers = #tpu.dot_dimension_numbers<[1], [0], [0], [1], [0, 0, 1, 1], [], []>} : vector<7x48xbf16>, vector<48x128xbf16>, vector<7x128xf32> -> vector<7x128xf32>
    %58 = arith.addf %53, %57 : vector<7x128xf32>
    %c0_52 = arith.constant 0 : index
    %c0_53 = arith.constant 0 : index
    %59 = vector.load %arg4[%c0_52, %c0_53] : memref<1x128xf32, #tpu.memory_space<vmem>>, vector<1x128xf32>
    %60 = vector.broadcast %59 : vector<1x128xf32> to vector<7x128xf32>
    %61 = arith.addf %58, %60 : vector<7x128xf32>
    %cst_54 = arith.constant 0.000000e+00 : f32
    %62 = vector.broadcast %cst_54 : f32 to vector<7x128xf32>
    %63 = arith.maximumf %61, %62 : vector<7x128xf32>
    %64 = vector.extract_strided_slice %63 {offsets = [0, 0], sizes = [7, 48], strides = [1, 1]} : vector<7x128xf32> to vector<7x48xf32>
    %c0_55 = arith.constant 0 : index
    %c0_56 = arith.constant 0 : index
    %c0_57 = arith.constant 0 : index
    %c0_58 = arith.constant 0 : index
    %65 = vector.load %arg5[%c0_55, %c0_56, %c0_57, %c0_58] : memref<1x1x7x48xf32, #tpu.memory_space<vmem>>, vector<1x1x7x48xf32>
    %66 = vector.shape_cast %65 : vector<1x1x7x48xf32> to vector<7x48xf32>
    %67 = vector.shape_cast %64 : vector<7x48xf32> to vector<1x1x7x48xf32>
    tpu.vector_store %arg5[%c0_55, %c0_56, %c0_57, %c0_58], %67 {strides = array<i32>} : memref<1x1x7x48xf32, #tpu.memory_space<vmem>>, vector<1x1x7x48xf32>,
    return
  }
  func.func @transform_0(%arg0: i32, %arg1: i32) -> (i32, i32, i32, i32) {
    %c0_i32 = arith.constant 0 : i32
    %c0_i32_0 = arith.constant 0 : i32
    %c0_i32_1 = arith.constant 0 : i32
    %c0_i32_2 = arith.constant 0 : i32
    return %arg0, %c0_i32, %c0_i32_0, %c0_i32_1 : i32, i32, i32, i32
  }
  func.func @transform_1(%arg0: i32, %arg1: i32) -> (i32, i32, i32, i32) {
    %c0_i32 = arith.constant 0 : i32
    %c0_i32_0 = arith.constant 0 : i32
    %c0_i32_1 = arith.constant 0 : i32
    %c0_i32_2 = arith.constant 0 : i32
    %c0_i32_3 = arith.constant 0 : i32
    return %c0_i32, %c0_i32_0, %c0_i32_1, %c0_i32_2 : i32, i32, i32, i32
  }
  func.func @transform_2(%arg0: i32, %arg1: i32) -> (i32, i32) {
    %c0_i32 = arith.constant 0 : i32
    %c0_i32_0 = arith.constant 0 : i32
    %c0_i32_1 = arith.constant 0 : i32
    return %c0_i32, %c0_i32_0 : i32, i32
  }
  func.func @transform_3(%arg0: i32, %arg1: i32) -> (i32, i32, i32, i32) {
    %c0_i32 = arith.constant 0 : i32
    %c0_i32_0 = arith.constant 0 : i32
    %c0_i32_1 = arith.constant 0 : i32
    return %arg0, %arg1, %c0_i32, %c0_i32_0 : i32, i32, i32, i32
  }
}

module attributes {stable_mosaic.version = 11 : i64} {
  func.func @_conv_row_kernel(%arg0: i32, %arg1: i32, %arg2: memref<1x9x9x48xbf16, #tpu.memory_space<vmem>>, %arg3: memref<3x3x48x128xbf16, #tpu.memory_space<vmem>>, %arg4: memref<1x128xf32, #tpu.memory_space<vmem>>, %arg5: memref<1x1x7x32xf32, #tpu.memory_space<vmem>>) attributes {dimension_semantics = [#tpu.dimension_semantics<parallel>, #tpu.dimension_semantics<parallel>], iteration_bounds = array<i64: 2, 7>, scalar_prefetch = 0 : i64, scratch_operands = 0 : i64, tpu.core_type = #tpu.core_type<tc>, window_params = [{transform_indices = @transform_0, window_bounds = array<i64: 1, 9, 9, 48>}, {pipeline_mode = #tpu.pipeline_mode<synchronous>, transform_indices = @transform_1, window_bounds = array<i64: 3, 3, 48, 128>}, {pipeline_mode = #tpu.pipeline_mode<synchronous>, transform_indices = @transform_2, window_bounds = array<i64: 1, 128>}, {transform_indices = @transform_3, window_bounds = array<i64: 1, 1, 7, 32>}]} {
    %c1_i32 = arith.constant 1 : i32
    %0 = arith.muli %arg1, %c1_i32 : i32
    %cst = arith.constant 0.000000e+00 : f32
    %1 = vector.broadcast %cst : f32 to vector<7x128xf32>
    %c0_i32 = arith.constant 0 : i32
    %2 = arith.addi %0, %c0_i32 : i32
    %c0 = arith.constant 0 : index
    %3 = arith.index_cast %2 : i32 to index
    %c0_0 = arith.constant 0 : index
    %c0_1 = arith.constant 0 : index
    %4 = vector.load %arg2[%c0, %3, %c0_0, %c0_1] : memref<1x9x9x48xbf16, #tpu.memory_space<vmem>>, vector<1x1x9x48xbf16>
    %5 = vector.shape_cast %4 : vector<1x1x9x48xbf16> to vector<9x48xbf16>
    %6 = vector.extract_strided_slice %5 {offsets = [0, 0], sizes = [7, 48], strides = [1, 1]} : vector<9x48xbf16> to vector<7x48xbf16>
    %c0_2 = arith.constant 0 : index
    %c0_3 = arith.constant 0 : index
    %c0_4 = arith.constant 0 : index
    %c0_5 = arith.constant 0 : index
    %7 = vector.load %arg3[%c0_2, %c0_3, %c0_4, %c0_5] : memref<3x3x48x128xbf16, #tpu.memory_space<vmem>>, vector<1x1x48x128xbf16>
    %8 = vector.shape_cast %7 : vector<1x1x48x128xbf16> to vector<48x128xbf16>
    %cst_6 = arith.constant dense<0.000000e+00> : vector<7x128xf32>
    %9 = tpu.matmul %6, %8, %cst_6 {dimension_numbers = #tpu.dot_dimension_numbers<[1], [0], [0], [1], [0, 0, 1, 1], [], []>} : vector<7x48xbf16>, vector<48x128xbf16>, vector<7x128xf32> -> vector<7x128xf32>
    %10 = arith.addf %1, %9 : vector<7x128xf32>
    %11 = vector.extract_strided_slice %5 {offsets = [1, 0], sizes = [7, 48], strides = [1, 1]} : vector<9x48xbf16> to vector<7x48xbf16>
    %c0_7 = arith.constant 0 : index
    %c1 = arith.constant 1 : index
    %c0_8 = arith.constant 0 : index
    %c0_9 = arith.constant 0 : index
    %12 = vector.load %arg3[%c0_7, %c1, %c0_8, %c0_9] : memref<3x3x48x128xbf16, #tpu.memory_space<vmem>>, vector<1x1x48x128xbf16>
    %13 = vector.shape_cast %12 : vector<1x1x48x128xbf16> to vector<48x128xbf16>
    %cst_10 = arith.constant dense<0.000000e+00> : vector<7x128xf32>
    %14 = tpu.matmul %11, %13, %cst_10 {dimension_numbers = #tpu.dot_dimension_numbers<[1], [0], [0], [1], [0, 0, 1, 1], [], []>} : vector<7x48xbf16>, vector<48x128xbf16>, vector<7x128xf32> -> vector<7x128xf32>
    %15 = arith.addf %10, %14 : vector<7x128xf32>
    %16 = vector.extract_strided_slice %5 {offsets = [2, 0], sizes = [7, 48], strides = [1, 1]} : vector<9x48xbf16> to vector<7x48xbf16>
    %c0_11 = arith.constant 0 : index
    %c2 = arith.constant 2 : index
    %c0_12 = arith.constant 0 : index
    %c0_13 = arith.constant 0 : index
    %17 = vector.load %arg3[%c0_11, %c2, %c0_12, %c0_13] : memref<3x3x48x128xbf16, #tpu.memory_space<vmem>>, vector<1x1x48x128xbf16>
    %18 = vector.shape_cast %17 : vector<1x1x48x128xbf16> to vector<48x128xbf16>
    %cst_14 = arith.constant dense<0.000000e+00> : vector<7x128xf32>
    %19 = tpu.matmul %16, %18, %cst_14 {dimension_numbers = #tpu.dot_dimension_numbers<[1], [0], [0], [1], [0, 0, 1, 1], [], []>} : vector<7x48xbf16>, vector<48x128xbf16>, vector<7x128xf32> -> vector<7x128xf32>
    %20 = arith.addf %15, %19 : vector<7x128xf32>
    %c1_i32_15 = arith.constant 1 : i32
    %21 = arith.addi %0, %c1_i32_15 : i32
    %c0_16 = arith.constant 0 : index
    %22 = arith.index_cast %21 : i32 to index
    %c0_17 = arith.constant 0 : index
    %c0_18 = arith.constant 0 : index
    %23 = vector.load %arg2[%c0_16, %22, %c0_17, %c0_18] : memref<1x9x9x48xbf16, #tpu.memory_space<vmem>>, vector<1x1x9x48xbf16>
    %24 = vector.shape_cast %23 : vector<1x1x9x48xbf16> to vector<9x48xbf16>
    %25 = vector.extract_strided_slice %24 {offsets = [0, 0], sizes = [7, 48], strides = [1, 1]} : vector<9x48xbf16> to vector<7x48xbf16>
    %c1_19 = arith.constant 1 : index
    %c0_20 = arith.constant 0 : index
    %c0_21 = arith.constant 0 : index
    %c0_22 = arith.constant 0 : index
    %26 = vector.load %arg3[%c1_19, %c0_20, %c0_21, %c0_22] : memref<3x3x48x128xbf16, #tpu.memory_space<vmem>>, vector<1x1x48x128xbf16>
    %27 = vector.shape_cast %26 : vector<1x1x48x128xbf16> to vector<48x128xbf16>
    %cst_23 = arith.constant dense<0.000000e+00> : vector<7x128xf32>
    %28 = tpu.matmul %25, %27, %cst_23 {dimension_numbers = #tpu.dot_dimension_numbers<[1], [0], [0], [1], [0, 0, 1, 1], [], []>} : vector<7x48xbf16>, vector<48x128xbf16>, vector<7x128xf32> -> vector<7x128xf32>
    %29 = arith.addf %20, %28 : vector<7x128xf32>
    %30 = vector.extract_strided_slice %24 {offsets = [1, 0], sizes = [7, 48], strides = [1, 1]} : vector<9x48xbf16> to vector<7x48xbf16>
    %c1_24 = arith.constant 1 : index
    %c1_25 = arith.constant 1 : index
    %c0_26 = arith.constant 0 : index
    %c0_27 = arith.constant 0 : index
    %31 = vector.load %arg3[%c1_24, %c1_25, %c0_26, %c0_27] : memref<3x3x48x128xbf16, #tpu.memory_space<vmem>>, vector<1x1x48x128xbf16>
    %32 = vector.shape_cast %31 : vector<1x1x48x128xbf16> to vector<48x128xbf16>
    %cst_28 = arith.constant dense<0.000000e+00> : vector<7x128xf32>
    %33 = tpu.matmul %30, %32, %cst_28 {dimension_numbers = #tpu.dot_dimension_numbers<[1], [0], [0], [1], [0, 0, 1, 1], [], []>} : vector<7x48xbf16>, vector<48x128xbf16>, vector<7x128xf32> -> vector<7x128xf32>
    %34 = arith.addf %29, %33 : vector<7x128xf32>
    %35 = vector.extract_strided_slice %24 {offsets = [2, 0], sizes = [7, 48], strides = [1, 1]} : vector<9x48xbf16> to vector<7x48xbf16>
    %c1_29 = arith.constant 1 : index
    %c2_30 = arith.constant 2 : index
    %c0_31 = arith.constant 0 : index
    %c0_32 = arith.constant 0 : index
    %36 = vector.load %arg3[%c1_29, %c2_30, %c0_31, %c0_32] : memref<3x3x48x128xbf16, #tpu.memory_space<vmem>>, vector<1x1x48x128xbf16>
    %37 = vector.shape_cast %36 : vector<1x1x48x128xbf16> to vector<48x128xbf16>
    %cst_33 = arith.constant dense<0.000000e+00> : vector<7x128xf32>
    %38 = tpu.matmul %35, %37, %cst_33 {dimension_numbers = #tpu.dot_dimension_numbers<[1], [0], [0], [1], [0, 0, 1, 1], [], []>} : vector<7x48xbf16>, vector<48x128xbf16>, vector<7x128xf32> -> vector<7x128xf32>
    %39 = arith.addf %34, %38 : vector<7x128xf32>
    %c2_i32 = arith.constant 2 : i32
    %40 = arith.addi %0, %c2_i32 : i32
    %c0_34 = arith.constant 0 : index
    %41 = arith.index_cast %40 : i32 to index
    %c0_35 = arith.constant 0 : index
    %c0_36 = arith.constant 0 : index
    %42 = vector.load %arg2[%c0_34, %41, %c0_35, %c0_36] : memref<1x9x9x48xbf16, #tpu.memory_space<vmem>>, vector<1x1x9x48xbf16>
    %43 = vector.shape_cast %42 : vector<1x1x9x48xbf16> to vector<9x48xbf16>
    %44 = vector.extract_strided_slice %43 {offsets = [0, 0], sizes = [7, 48], strides = [1, 1]} : vector<9x48xbf16> to vector<7x48xbf16>
    %c2_37 = arith.constant 2 : index
    %c0_38 = arith.constant 0 : index
    %c0_39 = arith.constant 0 : index
    %c0_40 = arith.constant 0 : index
    %45 = vector.load %arg3[%c2_37, %c0_38, %c0_39, %c0_40] : memref<3x3x48x128xbf16, #tpu.memory_space<vmem>>, vector<1x1x48x128xbf16>
    %46 = vector.shape_cast %45 : vector<1x1x48x128xbf16> to vector<48x128xbf16>
    %cst_41 = arith.constant dense<0.000000e+00> : vector<7x128xf32>
    %47 = tpu.matmul %44, %46, %cst_41 {dimension_numbers = #tpu.dot_dimension_numbers<[1], [0], [0], [1], [0, 0, 1, 1], [], []>} : vector<7x48xbf16>, vector<48x128xbf16>, vector<7x128xf32> -> vector<7x128xf32>
    %48 = arith.addf %39, %47 : vector<7x128xf32>
    %49 = vector.extract_strided_slice %43 {offsets = [1, 0], sizes = [7, 48], strides = [1, 1]} : vector<9x48xbf16> to vector<7x48xbf16>
    %c2_42 = arith.constant 2 : index
    %c1_43 = arith.constant 1 : index
    %c0_44 = arith.constant 0 : index
    %c0_45 = arith.constant 0 : index
    %50 = vector.load %arg3[%c2_42, %c1_43, %c0_44, %c0_45] : memref<3x3x48x128xbf16, #tpu.memory_space<vmem>>, vector<1x1x48x128xbf16>
    %51 = vector.shape_cast %50 : vector<1x1x48x128xbf16> to vector<48x128xbf16>
    %cst_46 = arith.constant dense<0.000000e+00> : vector<7x128xf32>
    %52 = tpu.matmul %49, %51, %cst_46 {dimension_numbers = #tpu.dot_dimension_numbers<[1], [0], [0], [1], [0, 0, 1, 1], [], []>} : vector<7x48xbf16>, vector<48x128xbf16>, vector<7x128xf32> -> vector<7x128xf32>
    %53 = arith.addf %48, %52 : vector<7x128xf32>
    %54 = vector.extract_strided_slice %43 {offsets = [2, 0], sizes = [7, 48], strides = [1, 1]} : vector<9x48xbf16> to vector<7x48xbf16>
    %c2_47 = arith.constant 2 : index
    %c2_48 = arith.constant 2 : index
    %c0_49 = arith.constant 0 : index
    %c0_50 = arith.constant 0 : index
    %55 = vector.load %arg3[%c2_47, %c2_48, %c0_49, %c0_50] : memref<3x3x48x128xbf16, #tpu.memory_space<vmem>>, vector<1x1x48x128xbf16>
    %56 = vector.shape_cast %55 : vector<1x1x48x128xbf16> to vector<48x128xbf16>
    %cst_51 = arith.constant dense<0.000000e+00> : vector<7x128xf32>
    %57 = tpu.matmul %54, %56, %cst_51 {dimension_numbers = #tpu.dot_dimension_numbers<[1], [0], [0], [1], [0, 0, 1, 1], [], []>} : vector<7x48xbf16>, vector<48x128xbf16>, vector<7x128xf32> -> vector<7x128xf32>
    %58 = arith.addf %53, %57 : vector<7x128xf32>
    %c0_52 = arith.constant 0 : index
    %c0_53 = arith.constant 0 : index
    %59 = vector.load %arg4[%c0_52, %c0_53] : memref<1x128xf32, #tpu.memory_space<vmem>>, vector<1x128xf32>
    %60 = vector.broadcast %59 : vector<1x128xf32> to vector<7x128xf32>
    %61 = arith.addf %58, %60 : vector<7x128xf32>
    %cst_54 = arith.constant 0.000000e+00 : f32
    %62 = vector.broadcast %cst_54 : f32 to vector<7x128xf32>
    %63 = arith.maximumf %61, %62 : vector<7x128xf32>
    %64 = vector.extract_strided_slice %63 {offsets = [0, 0], sizes = [7, 32], strides = [1, 1]} : vector<7x128xf32> to vector<7x32xf32>
    %c0_55 = arith.constant 0 : index
    %c0_56 = arith.constant 0 : index
    %c0_57 = arith.constant 0 : index
    %c0_58 = arith.constant 0 : index
    %65 = vector.load %arg5[%c0_55, %c0_56, %c0_57, %c0_58] : memref<1x1x7x32xf32, #tpu.memory_space<vmem>>, vector<1x1x7x32xf32>
    %66 = vector.shape_cast %65 : vector<1x1x7x32xf32> to vector<7x32xf32>
    %67 = vector.shape_cast %64 : vector<7x32xf32> to vector<1x1x7x32xf32>
    tpu.vector_store %arg5[%c0_55, %c0_56, %c0_57, %c0_58], %67 {strides = array<i32>} : memref<1x1x7x32xf32, #tpu.memory_space<vmem>>, vector<1x1x7x32xf32>,
    return
  }
  func.func @transform_0(%arg0: i32, %arg1: i32) -> (i32, i32, i32, i32) {
    %c0_i32 = arith.constant 0 : i32
    %c0_i32_0 = arith.constant 0 : i32
    %c0_i32_1 = arith.constant 0 : i32
    %c0_i32_2 = arith.constant 0 : i32
    return %arg0, %c0_i32, %c0_i32_0, %c0_i32_1 : i32, i32, i32, i32
  }
  func.func @transform_1(%arg0: i32, %arg1: i32) -> (i32, i32, i32, i32) {
    %c0_i32 = arith.constant 0 : i32
    %c0_i32_0 = arith.constant 0 : i32
    %c0_i32_1 = arith.constant 0 : i32
    %c0_i32_2 = arith.constant 0 : i32
    %c0_i32_3 = arith.constant 0 : i32
    return %c0_i32, %c0_i32_0, %c0_i32_1, %c0_i32_2 : i32, i32, i32, i32
  }
  func.func @transform_2(%arg0: i32, %arg1: i32) -> (i32, i32) {
    %c0_i32 = arith.constant 0 : i32
    %c0_i32_0 = arith.constant 0 : i32
    %c0_i32_1 = arith.constant 0 : i32
    return %c0_i32, %c0_i32_0 : i32, i32
  }
  func.func @transform_3(%arg0: i32, %arg1: i32) -> (i32, i32, i32, i32) {
    %c0_i32 = arith.constant 0 : i32
    %c0_i32_0 = arith.constant 0 : i32
    %c0_i32_1 = arith.constant 0 : i32
    return %arg0, %arg1, %c0_i32, %c0_i32_0 : i32, i32, i32, i32
  }
}

module attributes {stable_mosaic.version = 11 : i64} {
  func.func @_maxpool_row_kernel(%arg0: i32, %arg1: i32, %arg2: memref<1x7x4x64xf32, #tpu.memory_space<vmem>>, %arg3: memref<1x1x3x32xf32, #tpu.memory_space<vmem>>) attributes {dimension_semantics = [#tpu.dimension_semantics<parallel>, #tpu.dimension_semantics<parallel>], iteration_bounds = array<i64: 2, 3>, scalar_prefetch = 0 : i64, scratch_operands = 0 : i64, tpu.core_type = #tpu.core_type<tc>, window_params = [{transform_indices = @transform_0, window_bounds = array<i64: 1, 7, 4, 64>}, {transform_indices = @transform_1, window_bounds = array<i64: 1, 1, 3, 32>}]} {
    %c2_i32 = arith.constant 2 : i32
    %0 = arith.muli %arg1, %c2_i32 : i32
    %c0_i32 = arith.constant 0 : i32
    %1 = arith.addi %0, %c0_i32 : i32
    %c0 = arith.constant 0 : index
    %2 = arith.index_cast %1 : i32 to index
    %c0_0 = arith.constant 0 : index
    %c0_1 = arith.constant 0 : index
    %3 = vector.load %arg2[%c0, %2, %c0_0, %c0_1] : memref<1x7x4x64xf32, #tpu.memory_space<vmem>>, vector<1x1x4x64xf32>
    %4 = vector.shape_cast %3 : vector<1x1x4x64xf32> to vector<4x64xf32>
    %5 = vector.extract_strided_slice %4 {offsets = [0, 0], sizes = [3, 32], strides = [1, 1]} : vector<4x64xf32> to vector<3x32xf32>
    %6 = vector.extract_strided_slice %4 {offsets = [0, 32], sizes = [3, 32], strides = [1, 1]} : vector<4x64xf32> to vector<3x32xf32>
    %7 = arith.maximumf %5, %6 : vector<3x32xf32>
    %8 = vector.extract_strided_slice %4 {offsets = [1, 0], sizes = [3, 32], strides = [1, 1]} : vector<4x64xf32> to vector<3x32xf32>
    %9 = arith.maximumf %7, %8 : vector<3x32xf32>
    %c1_i32 = arith.constant 1 : i32
    %10 = arith.addi %0, %c1_i32 : i32
    %c0_2 = arith.constant 0 : index
    %11 = arith.index_cast %10 : i32 to index
    %c0_3 = arith.constant 0 : index
    %c0_4 = arith.constant 0 : index
    %12 = vector.load %arg2[%c0_2, %11, %c0_3, %c0_4] : memref<1x7x4x64xf32, #tpu.memory_space<vmem>>, vector<1x1x4x64xf32>
    %13 = vector.shape_cast %12 : vector<1x1x4x64xf32> to vector<4x64xf32>
    %14 = vector.extract_strided_slice %13 {offsets = [0, 0], sizes = [3, 32], strides = [1, 1]} : vector<4x64xf32> to vector<3x32xf32>
    %15 = arith.maximumf %9, %14 : vector<3x32xf32>
    %16 = vector.extract_strided_slice %13 {offsets = [0, 32], sizes = [3, 32], strides = [1, 1]} : vector<4x64xf32> to vector<3x32xf32>
    %17 = arith.maximumf %15, %16 : vector<3x32xf32>
    %18 = vector.extract_strided_slice %13 {offsets = [1, 0], sizes = [3, 32], strides = [1, 1]} : vector<4x64xf32> to vector<3x32xf32>
    %19 = arith.maximumf %17, %18 : vector<3x32xf32>
    %c2_i32_5 = arith.constant 2 : i32
    %20 = arith.addi %0, %c2_i32_5 : i32
    %c0_6 = arith.constant 0 : index
    %21 = arith.index_cast %20 : i32 to index
    %c0_7 = arith.constant 0 : index
    %c0_8 = arith.constant 0 : index
    %22 = vector.load %arg2[%c0_6, %21, %c0_7, %c0_8] : memref<1x7x4x64xf32, #tpu.memory_space<vmem>>, vector<1x1x4x64xf32>
    %23 = vector.shape_cast %22 : vector<1x1x4x64xf32> to vector<4x64xf32>
    %24 = vector.extract_strided_slice %23 {offsets = [0, 0], sizes = [3, 32], strides = [1, 1]} : vector<4x64xf32> to vector<3x32xf32>
    %25 = arith.maximumf %19, %24 : vector<3x32xf32>
    %26 = vector.extract_strided_slice %23 {offsets = [0, 32], sizes = [3, 32], strides = [1, 1]} : vector<4x64xf32> to vector<3x32xf32>
    %27 = arith.maximumf %25, %26 : vector<3x32xf32>
    %28 = vector.extract_strided_slice %23 {offsets = [1, 0], sizes = [3, 32], strides = [1, 1]} : vector<4x64xf32> to vector<3x32xf32>
    %29 = arith.maximumf %27, %28 : vector<3x32xf32>
    %c0_9 = arith.constant 0 : index
    %c0_10 = arith.constant 0 : index
    %c0_11 = arith.constant 0 : index
    %c0_12 = arith.constant 0 : index
    %30 = vector.load %arg3[%c0_9, %c0_10, %c0_11, %c0_12] : memref<1x1x3x32xf32, #tpu.memory_space<vmem>>, vector<1x1x3x32xf32>
    %31 = vector.shape_cast %30 : vector<1x1x3x32xf32> to vector<3x32xf32>
    %32 = vector.shape_cast %29 : vector<3x32xf32> to vector<1x1x3x32xf32>
    tpu.vector_store %arg3[%c0_9, %c0_10, %c0_11, %c0_12], %32 {strides = array<i32>} : memref<1x1x3x32xf32, #tpu.memory_space<vmem>>, vector<1x1x3x32xf32>,
    return
  }
  func.func @transform_0(%arg0: i32, %arg1: i32) -> (i32, i32, i32, i32) {
    %c0_i32 = arith.constant 0 : i32
    %c0_i32_0 = arith.constant 0 : i32
    %c0_i32_1 = arith.constant 0 : i32
    %c0_i32_2 = arith.constant 0 : i32
    return %arg0, %c0_i32, %c0_i32_0, %c0_i32_1 : i32, i32, i32, i32
  }
  func.func @transform_1(%arg0: i32, %arg1: i32) -> (i32, i32, i32, i32) {
    %c0_i32 = arith.constant 0 : i32
    %c0_i32_0 = arith.constant 0 : i32
    %c0_i32_1 = arith.constant 0 : i32
    return %arg0, %arg1, %c0_i32, %c0_i32_0 : i32, i32, i32, i32
  }
}

module attributes {stable_mosaic.version = 11 : i64} {
  func.func @_fc_fused_kernel(%arg0: memref<8x128xf32, #tpu.memory_space<vmem>>, %arg1: memref<128x256xbf16, #tpu.memory_space<vmem>>, %arg2: memref<1x256xf32, #tpu.memory_space<vmem>>, %arg3: memref<256x256xbf16, #tpu.memory_space<vmem>>, %arg4: memref<1x256xf32, #tpu.memory_space<vmem>>, %arg5: memref<256x128xbf16, #tpu.memory_space<vmem>>, %arg6: memref<1x128xf32, #tpu.memory_space<vmem>>, %arg7: memref<8x128xf32, #tpu.memory_space<vmem>>) attributes {dimension_semantics = [], scalar_prefetch = 0 : i64, scratch_operands = 0 : i64, tpu.core_type = #tpu.core_type<tc>} {
    %c0 = arith.constant 0 : index
    %c0_0 = arith.constant 0 : index
    %0 = vector.load %arg0[%c0, %c0_0] : memref<8x128xf32, #tpu.memory_space<vmem>>, vector<8x128xf32>
    %1 = arith.truncf %0 : vector<8x128xf32> to vector<8x128xbf16>
    %c0_1 = arith.constant 0 : index
    %c0_2 = arith.constant 0 : index
    %2 = vector.load %arg1[%c0_1, %c0_2] : memref<128x256xbf16, #tpu.memory_space<vmem>>, vector<128x256xbf16>
    %cst = arith.constant dense<0.000000e+00> : vector<8x256xf32>
    %3 = tpu.matmul %1, %2, %cst {dimension_numbers = #tpu.dot_dimension_numbers<[1], [0], [0], [1], [0, 0, 1, 1], [], []>} : vector<8x128xbf16>, vector<128x256xbf16>, vector<8x256xf32> -> vector<8x256xf32>
    %c0_3 = arith.constant 0 : index
    %c0_4 = arith.constant 0 : index
    %4 = vector.load %arg2[%c0_3, %c0_4] : memref<1x256xf32, #tpu.memory_space<vmem>>, vector<1x256xf32>
    %5 = vector.broadcast %4 : vector<1x256xf32> to vector<8x256xf32>
    %6 = arith.addf %3, %5 : vector<8x256xf32>
    %cst_5 = arith.constant 0.000000e+00 : f32
    %7 = vector.broadcast %cst_5 : f32 to vector<8x256xf32>
    %8 = arith.maximumf %6, %7 : vector<8x256xf32>
    %9 = arith.truncf %8 : vector<8x256xf32> to vector<8x256xbf16>
    %c0_6 = arith.constant 0 : index
    %c0_7 = arith.constant 0 : index
    %10 = vector.load %arg3[%c0_6, %c0_7] : memref<256x256xbf16, #tpu.memory_space<vmem>>, vector<256x256xbf16>
    %cst_8 = arith.constant dense<0.000000e+00> : vector<8x256xf32>
    %11 = tpu.matmul %9, %10, %cst_8 {dimension_numbers = #tpu.dot_dimension_numbers<[1], [0], [0], [1], [0, 0, 1, 1], [], []>} : vector<8x256xbf16>, vector<256x256xbf16>, vector<8x256xf32> -> vector<8x256xf32>
    %c0_9 = arith.constant 0 : index
    %c0_10 = arith.constant 0 : index
    %12 = vector.load %arg4[%c0_9, %c0_10] : memref<1x256xf32, #tpu.memory_space<vmem>>, vector<1x256xf32>
    %13 = vector.broadcast %12 : vector<1x256xf32> to vector<8x256xf32>
    %14 = arith.addf %11, %13 : vector<8x256xf32>
    %cst_11 = arith.constant 0.000000e+00 : f32
    %15 = vector.broadcast %cst_11 : f32 to vector<8x256xf32>
    %16 = arith.maximumf %14, %15 : vector<8x256xf32>
    %17 = arith.truncf %16 : vector<8x256xf32> to vector<8x256xbf16>
    %c0_12 = arith.constant 0 : index
    %c0_13 = arith.constant 0 : index
    %18 = vector.load %arg5[%c0_12, %c0_13] : memref<256x128xbf16, #tpu.memory_space<vmem>>, vector<256x128xbf16>
    %cst_14 = arith.constant dense<0.000000e+00> : vector<8x128xf32>
    %19 = tpu.matmul %17, %18, %cst_14 {dimension_numbers = #tpu.dot_dimension_numbers<[1], [0], [0], [1], [0, 0, 1, 1], [], []>} : vector<8x256xbf16>, vector<256x128xbf16>, vector<8x128xf32> -> vector<8x128xf32>
    %c0_15 = arith.constant 0 : index
    %c0_16 = arith.constant 0 : index
    %20 = vector.load %arg6[%c0_15, %c0_16] : memref<1x128xf32, #tpu.memory_space<vmem>>, vector<1x128xf32>
    %21 = vector.broadcast %20 : vector<1x128xf32> to vector<8x128xf32>
    %22 = arith.addf %19, %21 : vector<8x128xf32>
    %c0_17 = arith.constant 0 : index
    %c0_18 = arith.constant 0 : index
    %23 = vector.load %arg7[%c0_17, %c0_18] : memref<8x128xf32, #tpu.memory_space<vmem>>, vector<8x128xf32>
    tpu.vector_store %arg7[%c0_17, %c0_18], %22 {strides = array<i32>} : memref<8x128xf32, #tpu.memory_space<vmem>>, vector<8x128xf32>,
    return
  }
}

</mosaic_0001>

<bundles_post_ra>
// kernel: alexnet_forward.9
= control target key start
LH: loop header
LB: loop body
LE: loop exit
PB: predicated region body
PF: predicated region fallthrough
CT: control target
= control target key end

     0   :  { %s4103_s12 = smov 0   ;;  %s4105_s13 = smov 0   ;;  %s4551_s0 = inlined_call_operand.vmem [shape: bf16[2,131,33,12], index: 0, kind: input, shape index: {}]   ;;  %s4552_s1 = inlined_call_operand.vmem [shape: bf16[11,3,12,128], index: 1, kind: input, shape index: {}]   ;;  %s4553_s2 = inlined_call_operand.vmem [shape: f32[1,128], index: 2, kind: input, shape index: {}]   ;;  %s4554_s3 = inlined_call_operand.vmem [shape: f32[2,31,31,16], index: 3, kind: output, shape index: {}]  }
   0x1   :  { %s4107_s14 = smov 0   ;;  %s4109_s15 = smov 0  }
   0x2   :  { %s4111_s16 = smov 0  }
   0x3 LB: > { %s22_s17 = sadd.s32 1, %s4069_s14  ;;  %s25_s18 = sadd.s32 1, %s4073_s15  ;;  %s4077_s16 = sphi %s4111_s16, %s13_s16   ;;  %s4073_s15 = sphi %s4109_s15, %s4558_s15   ;;  %s4069_s14 = sphi %s4107_s14, %s4557_s14   ;;  %s4065_s13 = sphi %s4105_s13, %s4556_s13   ;;  %s4061_s12 = sphi %s4103_s12, %s4555_s12  }
   0x4   : > { %p23_p0 = scmp.ge.s32.totalorder %s22_s17, 31  ;;  %p3176_p1 = scmp.ge.s32.totalorder %s4077_s16, 1 }
   0x5   : > { %p151_p2 = scmp.lt.s32.totalorder %s4077_s16, 63 }
   0x6   : > { %s4560_s17 = smov (%p23_p0, %s22_s17), 0  ;;  %s4562_s18 = smov (!%p23_p0, %s25_s18), %s4073_s15 }
   0x7   : > { %p152_p3 = pnand %p3176_p1, %p151_p2  ;;  %p27_p4 = scmp.ge.s32.totalorder %s4562_s18, 2 }
   0x8   : > { %vm246_vm0 = vcmask (!%p152_p3), 1045504   ;;  %p179_p5 = scmp.lt.s32.totalorder (!%p152_p3), %s4065_s13, 1  ;;  %v3957_v0 = vld [vmem:[%s4552_s1 + $0x80] sm:$0x3f] (!%p152_p3)   ;;  %v3958_v1 = vld [vmem:[%s4552_s1 + $0x8] sm:$0x3f] (!%p152_p3)  }
   0x9   : > { %s4564_s18 = smov (%p27_p4, %s4562_s18), 0  ;;  %155 = sbr.rel (%p152_p3) target bundleno = 625 (0x271), region = 32 }
   0xa   : > { %3894 = vmatprep.subr.msk.bf16.mxu0 (!%p152_p3), %vm246_vm0, %v3957_v0  ;;  %v1556_v2 = vsel (!%p152_p3), %vm246_vm0, %v3957_v0, 0  ;;  %s3452_s23 = smul.u32 (!%p152_p3), 80, %s4061_s12  ;;  %3878 = vmatprep.subr.msk.bf16.mxu1 (!%p152_p3), %vm246_vm0, %v3958_v1  ;;  %v248_v3 = vsel (!%p152_p3), %vm246_vm0, %v3958_v1, 0  ;;  %v3963_v4 = vld [vmem:[%s4552_s1 + $0x88] sm:$0x3f] (!%p152_p3)   ;;  %vm239_vm2 = vcmask (!%p152_p3), 97280  }
   0xb   : > { %3649 = vmatpush3.bf16.msra.mxu0 (!%p152_p3), %v1556_v2  ;;  %3553 = vmatpush3.bf16.msra.mxu1 (!%p152_p3), %v248_v3  ;;  %v3964_v5 = vld [vmem:[%s4552_s1] sm:$0x3f] (!%p152_p3)   ;;  %vm218_vm1 = vsmask.f32 (!%p152_p3), 7424  ;;  %vm366_vm3 = vcmask (!%p152_p3), 1046528   ;;  %v1634_v31 = vsel (!%p152_p3), %vm246_vm0, %v3963_v4, 0 }
   0xc   : > { %3895 = vmatprep.subr.msk.bf16.mxu0 (!%p152_p3), %vm246_vm0, %v3963_v4  ;;  %3879 = vmatprep.subr.msk.bf16.mxu1 (!%p152_p3), %vm246_vm0, %v3964_v5  ;;  %v309_v22 = vsel (!%p152_p3), %vm246_vm0, %v3964_v5, 0  ;;  %v3967_v28 = vld [vmem:[%s4552_s1 + $0x10] sm:$0x3f] (!%p152_p3)   ;;  %v3972_v41 = vld [vmem:[%s4552_s1 + $0x18] sm:$0x3f] (!%p152_p3)   ;;  %s4080_s9 = smov (!%p152_p3), 1  }
   0xd   : > { %v3965_v34 = vld [vmem:[%s4552_s1 + $0x90] sm:$0x3f] (!%p152_p3)   ;;  %v384_v39 = vsel (!%p152_p3), %vm246_vm0, %v3967_v28, 0  ;;  %v3969_v45 = vld [vmem:[%s4552_s1 + $0x98] sm:$0x3f] (!%p152_p3)   ;;  %v473_v57 = vsel (!%p152_p3), %vm246_vm0, %v3972_v41, 0 }
   0xe   : > { %v1723_v46 = vsel (!%p152_p3), %vm246_vm0, %v3965_v34, 0  ;;  %v3976_v58 = vld [vmem:[%s4552_s1 + $0x20] sm:$0x3f] (!%p152_p3)   ;;  %v1806_v61 = vsel (!%p152_p3), %vm246_vm0, %v3969_v45, 0  ;;  %s4081_s10 = smov (!%p152_p3), 126   ;;  %s4082_s11 = smov (!%p152_p3), 127  }
   0xf   : > { %v3974_v63 = vld [vmem:[%s4552_s1 + $0xa0] sm:$0x3f] (!%p152_p3)   ;;  %p186_p6 = scmp.lt.s32.totalorder (!%p152_p3), %s4061_s12, 30  ;;  %vm3038_vm4 = vcmask (!%p152_p3), 130048   ;;  %vm3042_vm5 = vcmask (!%p152_p3), 129024  }
  0x10   : > { %s4566_s13 = smov (!%p179_p5, %s4065_s13), 1 }
  0x11   : > { %s3911_s24 = smul.u32 2620, %s4566_s13  ;;  %s4568_s12 = smov (!%p186_p6, %s4061_s12), 30 }
  0x12   : > { %s3912_s19 = smul.u32 124, %s4566_s13  ;;  %s3178_s20 = sshll.u32 %s4568_s12, 2 }
  0x13   : > { %s183_s4 = scalar_lea.vmem %s4551_s0, %s3911_s24 }
  0x14   : > { %s4159_s5 = scalar_lea.vmem %s183_s4, %s3452_s23  ;;  %s190_s21 = sadd.s32 %s3912_s19, %s3178_s20 }
  0x15   : > { %v3959_v6 = vld [vmem:[%s4159_s5] sm:$0xff]   ;;  %v4164_v7 = vld [vmem:[%s4159_s5 + $0x8] sm:$0xff]   ;;  %v3966_v35 = vld [vmem:[%s4159_s5 + $0x74] ss:$0 sps:$4 sm:$0x11]   ;;  %s3179_s22 = sshll.u32 %s190_s21, 3 }
  0x16   : > { %v220_v8 = vshrl.u32 %v3959_v6, 16  ;;  %v222_v9 = vshll.u32 %v3959_v6, 16  ;;  %v227_v10 = vshll.u32 %v4164_v7, 16  ;;  %v231_v11 = vshrl.u32 %v4164_v7, 16  ;;  %v4169_v12 = vld [vmem:[%s4159_s5 + $0x64] sm:$0xff]   ;;  %v4172_v13 = vld [vmem:[%s4159_s5 + $0x6c] sm:$0xff]   ;;  %s192_s25 = scalar_lea.vmem %s4554_s3, %s3179_s22 }
  0x17   : > { %v1531_v16 = vshrl.u32 %v4169_v12, 16  ;;  %v1533_v17 = vshll.u32 %v4169_v12, 16  ;;  %v1537_v18 = vshll.u32 %v4172_v13, 16  ;;  %v1541_v19 = vshrl.u32 %v4172_v13, 16  ;;  %v3968_v42 = vld [vmem:[%s4159_s5 + $0x78] sm:$0xff]   ;;  %v4219_v48 = vld [vmem:[%s4159_s5 + $0x80] sm:$0xff]  }
  0x18   : > { %v224_v14 = vrot.slane %v222_v9, 1  ;;  %v229_v15 = vrot.slane %v227_v10, 1  ;;  %v1617_v25 = vrot.slane %v4169_v12, 1  ;;  %v1618_v26 = vrot.slane %v4172_v13, 1  ;;  %v3973_v53 = vld [vmem:[%s4159_s5 + $0x14] sm:$0xff]   ;;  %v4232_v60 = vld [vmem:[%s4159_s5 + $0x1c] sm:$0xff]  }
  0x19   : > { %v1535_v23 = vrot.slane %v1533_v17, 1  ;;  %v1539_v24 = vrot.slane %v1537_v18, 1  ;;  %v367_v36 = vrot.slane %v3959_v6, 1  ;;  %v368_v37 = vrot.slane %v4164_v7, 1  ;;  %v3979_v10 = vld [vmem:[%s4552_s1 + $0x28] sm:$0x3f]  }
  0x1a   : > { %v225_v20 = vor.u32 %v224_v14, %v220_v8  ;;  %v233_v21 = vor.u32 %v231_v11, %v229_v15  ;;  %v1619_v33 = vsel %vm366_vm3, %v1617_v25, %v1618_v26  ;;  %v1620_v38 = vrot.slane %v3966_v35, 1  ;;  %v3970_v43 = vld [vmem:[%s4159_s5 + $0x10] ss:$0 sps:$4 sm:$0x11]  }
  0x1b   : > { %v1536_v29 = vor.u32 %v1535_v23, %v1531_v16  ;;  %v1543_v30 = vor.u32 %v1541_v19, %v1539_v24  ;;  %v369_v40 = vsel %vm366_vm3, %v367_v36, %v368_v37  ;;  %v1783_v47 = vshll.u32 %v3968_v42, 16  ;;  %v3977_v16 = vld [vmem:[%s4552_s1 + $0xa8] sm:$0x3f]   ;;  %v3984_v25 = vld [vmem:[%s4552_s1 + $0x30] sm:$0x3f]  }
  0x1c   : > { %v230_v27 = vsel %vm218_vm1, %v225_v20, %v229_v15  ;;  %v1621_v44 = vsel %vm366_vm3, %v1618_v26, %v1620_v38  ;;  %v370_v49 = vrot.slane %v3970_v43, 1  ;;  %v1781_v50 = vshrl.u32 %v3968_v42, 16  ;;  %v3978_v18 = vld [vmem:[%s4159_s5 + $0x88] ss:$0 sps:$4 sm:$0x11]   ;;  %v3980_v26 = vld [vmem:[%s4159_s5 + $0x8c] sm:$0xff]  }
  0x1d   : > { %3554 = vmatprep.mubr.msk.bf16.mxu1 %vm239_vm2, %v230_v27  ;;  %v1540_v32 = vsel %vm218_vm1, %v1536_v29, %v1539_v24  ;;  %v1785_v51 = vrot.slane %v1783_v47, 1  ;;  %v1787_v52 = vshll.u32 %v4219_v48, 16  ;;  %v533_v59 = vshll.u32 %v3973_v53, 16  ;;  %v3982_v27 = vld [vmem:[%s4159_s5 + $0x24] ss:$0 sps:$4 sm:$0x11]  }
  0x1e   : > { %3555 = vmatmul.mubr.msk.bf16.vlgmr.msra.gmra.mrb[0].mxu1 %vm239_vm2, %v233_v21  ;;  %3650 = vmatprep.mubr.msk.bf16.mxu0 %vm239_vm2, %v1540_v32  ;;  %v371_v54 = vsel %vm366_vm3, %v368_v37, %v370_v49  ;;  %v531_v0 = vshrl.u32 %v3973_v53, 16  ;;  %v537_v2 = vshll.u32 %v4232_v60, 16  ;;  %v1791_v5 = vshrl.u32 %v4219_v48, 16  ;;  %v4285_v32 = vld [vmem:[%s4159_s5 + $0x94] sm:$0xff]   ;;  %v3985_v37 = vld [vmem:[%s4159_s5 + $0x28] sm:$0xff]  }
  0x1f   : > { %3559 = vmatpush3.bf16.msra.mxu1 %v309_v22  ;;  %3560 = vmatprep.mubr.msk.bf16.mxu1 %vm239_vm2, %v3959_v6  ;;  %v1786_v55 = vor.u32 %v1785_v51, %v1781_v50  ;;  %v1789_v56 = vrot.slane %v1787_v52, 1  ;;  %v535_v1 = vrot.slane %v533_v59, 1  ;;  %v1867_v6 = vrot.slane %v3968_v42, 1  ;;  %v3988_v43 = vld [vmem:[%s4552_s1 + $0x38] sm:$0x3f]  }
  0x20   : > { %3880 = vmatprep.subr.msk.bf16.mxu1 %vm246_vm0, %v3967_v28  ;;  %3651 = vmatmul.mubr.msk.bf16.vlgmr.msra.gmra.mrb[0].mxu0 %vm239_vm2, %v1543_v30  ;;  %v539_v4 = vrot.slane %v537_v2, 1  ;;  %v556_v8 = vsel %vm246_vm0, %v3976_v58, 0  ;;  %v1884_v14 = vsel %vm246_vm0, %v3974_v63, 0  ;;  %v541_v17 = vshrl.u32 %v4232_v60, 16  ;;  %v3981_v30 = vld [vmem:[%s4552_s1 + $0xb0] sm:$0x3f]  }
  0x21   : > { %3655 = vmatpush3.bf16.msra.mxu0 %v1634_v31  ;;  %3656 = vmatprep.mubr.msk.bf16.mxu0 %vm239_vm2, %v1619_v33  ;;  %v1790_v62 = vsel %vm218_vm1, %v1786_v55, %v1789_v56  ;;  %v536_v3 = vor.u32 %v535_v1, %v531_v0  ;;  %v1793_v11 = vor.u32 %v1791_v5, %v1789_v56  ;;  %v617_v19 = vrot.slane %v3973_v53, 1  ;;  %v3986_v47 = vld [vmem:[%s4552_s1 + $0xb8] sm:$0x3f]  }
  0x22   : > { %3896 = vmatprep.subr.msk.bf16.mxu0 %vm246_vm0, %v3965_v34  ;;  %v618_v20 = vrot.slane %v4232_v60, 1  ;;  %v543_v21 = vor.u32 %v541_v17, %v539_v4  ;;  %v1870_v22 = vrot.slane %v3978_v18, 1  ;;  %v634_v23 = vsel %vm246_vm0, %v3979_v10, 0  ;;  %v3990_v0 = vld [vmem:[%s4159_s5 + $0x9c] ss:$0 sps:$4 sm:$0x11]  }
  0x23   : > { %v540_v9 = vsel %vm218_vm1, %v536_v3, %v539_v4  ;;  %v1973_v29 = vsel %vm246_vm0, %v3977_v16, 0  ;;  %v2033_v31 = vshll.u32 %v3980_v26, 16  ;;  %v620_v33 = vrot.slane %v3982_v27, 1 }
  0x24   : > { %v619_v24 = vsel %vm366_vm3, %v617_v19, %v618_v20  ;;  %v2031_v34 = vshrl.u32 %v3980_v26, 16  ;;  %v2037_v36 = vshll.u32 %v4285_v32, 16  ;;  %v723_v38 = vsel %vm246_vm0, %v3984_v25, 0 }
  0x25   : > { %v2035_v35 = vrot.slane %v2033_v31, 1  ;;  %v2118_v55 = vrot.slane %v4285_v32, 1  ;;  %v806_v56 = vsel %vm246_vm0, %v3988_v43, 0  ;;  %v867_v1 = vrot.slane %v3985_v37, 1  ;;  %v3998_v31 = vld [vmem:[%s4552_s1 + $0xd0] sm:$0x3f]  }
  0x26   : > { %v2120_v4 = vrot.slane %v3990_v0, 1 }
  0x2a   : > { %3561 = vmatmul.mubr.msk.bf16.vlgmr.msra.gmra.mrb[0].mxu1 %vm239_vm2, %v4164_v7  ;;  %v1868_v7 = vrot.slane %v4219_v48, 1 }
  0x2b   : > { %3565 = vmatpush3.bf16.msra.mxu1 %v384_v39  ;;  %3566 = vmatprep.mubr.msk.bf16.mxu1 %vm239_vm2, %v369_v40  ;;  %v621_v39 = vsel %vm366_vm3, %v618_v20, %v620_v33  ;;  %v2036_v40 = vor.u32 %v2035_v35, %v2031_v34 }
  0x2c   : > { %3881 = vmatprep.subr.msk.bf16.mxu1 %vm246_vm0, %v3972_v41  ;;  %3657 = vmatmul.mubr.msk.bf16.vlgmr.msra.gmra.mrb[0].mxu0 %vm239_vm2, %v1621_v44  ;;  %v1869_v15 = vsel %vm366_vm3, %v1867_v6, %v1868_v7  ;;  %v1871_v28 = vsel %vm366_vm3, %v1868_v7, %v1870_v22  ;;  %v2039_v41 = vrot.slane %v2037_v36, 1  ;;  %v2056_v44 = vsel %vm246_vm0, %v3981_v30, 0  ;;  %v3996_v7 = vld [vmem:[%s4552_s1 + $0x48] sm:$0x3f]  }
  0x2d   : > { %3661 = vmatpush3.bf16.msra.mxu0 %v1723_v46  ;;  %3662 = vmatprep.mubr.msk.bf16.mxu0 %vm239_vm2, %v3968_v42  ;;  %v783_v42 = vshll.u32 %v3985_v37, 16 }
  0x2e   : > { %3897 = vmatprep.subr.msk.bf16.mxu0 %vm246_vm0, %v3969_v45  ;;  %v4299_v45 = vld [vmem:[%s4159_s5 + $0x30] sm:$0xff]   ;;  %v2040_v46 = vsel %vm218_vm1, %v2036_v40, %v2039_v41 }
  0x2f   : > { %v785_v49 = vrot.slane %v783_v42, 1  ;;  %v787_v50 = vshll.u32 %v4299_v45, 16  ;;  %v868_v2 = vrot.slane %v4299_v45, 1  ;;  %v4003_v42 = vld [vmem:[%s4552_s1 + $0x58] sm:$0x3f]  }
  0x31   : > { %v789_v52 = vrot.slane %v787_v50, 1  ;;  %v869_v6 = vsel %vm366_vm3, %v867_v1, %v868_v2 }
  0x36   : > { %3567 = vmatmul.mubr.msk.bf16.vlgmr.msra.gmra.mrb[0].mxu1 %vm239_vm2, %v371_v54  ;;  %v2117_v54 = vrot.slane %v3980_v26, 1 }
  0x37   : > { %3571 = vmatpush3.bf16.msra.mxu1 %v473_v57  ;;  %3572 = vmatprep.mubr.msk.bf16.mxu1 %vm239_vm2, %v3973_v53  ;;  %v2041_v53 = vshrl.u32 %v4285_v32, 16 }
  0x38   : > { %3882 = vmatprep.subr.msk.bf16.mxu1 %vm246_vm0, %v3976_v58  ;;  %3663 = vmatmul.mubr.msk.bf16.vlgmr.msra.gmra.mrb[0].mxu0 %vm239_vm2, %v4219_v48  ;;  %v781_v48 = vshrl.u32 %v3985_v37, 16  ;;  %v3991_v58 = vld [vmem:[%s4552_s1 + $0x40] sm:$0x3f]  }
  0x39   : > { %3667 = vmatpush3.bf16.msra.mxu0 %v1806_v61  ;;  %3668 = vmatprep.mubr.msk.bf16.mxu0 %vm239_vm2, %v1790_v62  ;;  %v2043_v59 = vor.u32 %v2041_v53, %v2039_v41  ;;  %v2119_v61 = vsel %vm366_vm3, %v2117_v54, %v2118_v55  ;;  %v3989_v62 = vld [vmem:[%s4552_s1 + $0xc0] sm:$0x3f]   ;;  %v884_v5 = vsel %vm246_vm0, %v3991_v58, 0  ;;  %v1134_v53 = vsel %vm246_vm0, %v4003_v42, 0 }
  0x3a   : > { %3898 = vmatprep.subr.msk.bf16.mxu0 %vm246_vm0, %v3974_v63  ;;  %v786_v51 = vor.u32 %v785_v49, %v781_v48  ;;  %v791_v63 = vshrl.u32 %v4299_v45, 16  ;;  %v4002_v48 = vld [vmem:[%s4159_s5 + $0xb0] ss:$0 sps:$4 sm:$0x11]  }
  0x3c   : > { %v790_v57 = vsel %vm218_vm1, %v786_v51, %v789_v52  ;;  %v793_v3 = vor.u32 %v791_v63, %v789_v52  ;;  %v2370_v52 = vrot.slane %v4002_v48, 1 }
  0x42   : > { %3573 = vmatmul.mubr.msk.bf16.vlgmr.msra.gmra.mrb[0].mxu1 %vm239_vm2, %v4232_v60  ;;  %v2134_v60 = vsel %vm246_vm0, %v3986_v47, 0 }
  0x43   : > { %3577 = vmatpush3.bf16.msra.mxu1 %v556_v8  ;;  %3578 = vmatprep.mubr.msk.bf16.mxu1 %vm239_vm2, %v540_v9  ;;  %v3992_v8 = vld [vmem:[%s4159_s5 + $0xa0] sm:$0xff]   ;;  %v2121_v9 = vsel %vm366_vm3, %v2118_v55, %v2120_v4 }
  0x44   : > { %3883 = vmatprep.subr.msk.bf16.mxu1 %vm246_vm0, %v3979_v10  ;;  %3669 = vmatmul.mubr.msk.bf16.vlgmr.msra.gmra.mrb[0].mxu0 %vm239_vm2, %v1793_v11  ;;  %v2223_v10 = vsel %vm246_vm0, %v3989_v62, 0  ;;  %v3993_v11 = vld [vmem:[%s4552_s1 + $0xc8] sm:$0x3f]   ;;  %v2281_v18 = vshrl.u32 %v3992_v8, 16  ;;  %v4008_v55 = vld [vmem:[%s4552_s1 + $0x60] sm:$0x3f]  }
  0x45   : > { %3673 = vmatpush3.bf16.msra.mxu0 %v1884_v14  ;;  %3674 = vmatprep.mubr.msk.bf16.mxu0 %vm239_vm2, %v1869_v15  ;;  %v3994_v14 = vld [vmem:[%s4159_s5 + $0x38] ss:$0 sps:$4 sm:$0x11]   ;;  %v2283_v15 = vshll.u32 %v3992_v8, 16 }
  0x46   : > { %3899 = vmatprep.subr.msk.bf16.mxu0 %vm246_vm0, %v3977_v16  ;;  %v4351_v16 = vld [vmem:[%s4159_s5 + $0xa8] sm:$0xff]   ;;  %v870_v17 = vrot.slane %v3994_v14, 1 }
  0x47   : > { %v2285_v19 = vrot.slane %v2283_v15, 1  ;;  %v2287_v20 = vshll.u32 %v4351_v16, 16  ;;  %v4010_v15 = vld [vmem:[%s4552_s1 + $0xe8] sm:$0x3f]  }
  0x48   : > { %v871_v22 = vsel %vm366_vm3, %v868_v2, %v870_v17 }
  0x4e   : > { %3579 = vmatmul.mubr.msk.bf16.vlgmr.msra.gmra.mrb[0].mxu1 %vm239_vm2, %v543_v21  ;;  %v3997_v21 = vld [vmem:[%s4159_s5 + $0x3c] sm:$0xff]  }
  0x4f   : > { %3583 = vmatpush3.bf16.msra.mxu1 %v634_v23  ;;  %3584 = vmatprep.mubr.msk.bf16.mxu1 %vm239_vm2, %v619_v24  ;;  %v2286_v23 = vor.u32 %v2285_v19, %v2281_v18  ;;  %v2289_v24 = vrot.slane %v2287_v20, 1  ;;  %v1033_v27 = vshll.u32 %v3997_v21, 16  ;;  %v1117_v49 = vrot.slane %v3997_v21, 1 }
  0x50   : > { %3884 = vmatprep.subr.msk.bf16.mxu1 %vm246_vm0, %v3984_v25  ;;  %3675 = vmatmul.mubr.msk.bf16.vlgmr.msra.gmra.mrb[0].mxu0 %vm239_vm2, %v1871_v28  ;;  %v973_v25 = vsel %vm246_vm0, %v3996_v7, 0  ;;  %v4364_v28 = vld [vmem:[%s4159_s5 + $0x44] sm:$0xff]  }
  0x51   : > { %3679 = vmatpush3.bf16.msra.mxu0 %v1973_v29  ;;  %3680 = vmatprep.mubr.msk.bf16.mxu0 %vm239_vm2, %v3980_v26  ;;  %v4000_v26 = vld [vmem:[%s4552_s1 + $0x50] sm:$0x3f]   ;;  %v2306_v29 = vsel %vm246_vm0, %v3993_v11, 0  ;;  %v1035_v33 = vrot.slane %v1033_v27, 1  ;;  %v1037_v34 = vshll.u32 %v4364_v28, 16  ;;  %v1118_v50 = vrot.slane %v4364_v28, 1 }
  0x52   : > { %3900 = vmatprep.subr.msk.bf16.mxu0 %vm246_vm0, %v3981_v30  ;;  %v2290_v30 = vsel %vm218_vm1, %v2286_v23, %v2289_v24  ;;  %v1056_v40 = vsel %vm246_vm0, %v4000_v26, 0 }
  0x53   : > { %v1039_v36 = vrot.slane %v1037_v34, 1  ;;  %v1119_v54 = vsel %vm366_vm3, %v1117_v49, %v1118_v50 }
  0x5a   : > { %3585 = vmatmul.mubr.msk.bf16.vlgmr.msra.gmra.mrb[0].mxu1 %vm239_vm2, %v621_v39  ;;  %v2368_v39 = vrot.slane %v4351_v16, 1 }
  0x5b   : > { %3589 = vmatpush3.bf16.msra.mxu1 %v723_v38  ;;  %3590 = vmatprep.mubr.msk.bf16.mxu1 %vm239_vm2, %v3985_v37  ;;  %v2291_v37 = vshrl.u32 %v4351_v16, 16  ;;  %v2367_v38 = vrot.slane %v3992_v8, 1 }
  0x5c   : > { %3885 = vmatprep.subr.msk.bf16.mxu1 %vm246_vm0, %v3988_v43  ;;  %3681 = vmatmul.mubr.msk.bf16.vlgmr.msra.gmra.mrb[0].mxu0 %vm239_vm2, %v4285_v32  ;;  %v1031_v32 = vshrl.u32 %v3997_v21, 16 }
  0x5d   : > { %3685 = vmatpush3.bf16.msra.mxu0 %v2056_v44  ;;  %3686 = vmatprep.mubr.msk.bf16.mxu0 %vm239_vm2, %v2040_v46  ;;  %v2293_v43 = vor.u32 %v2291_v37, %v2289_v24  ;;  %v2384_v44 = vsel %vm246_vm0, %v3998_v31, 0  ;;  %v4001_v46 = vld [vmem:[%s4552_s1 + $0xd8] sm:$0x3f]  }
  0x5e   : > { %3901 = vmatprep.subr.msk.bf16.mxu0 %vm246_vm0, %v3986_v47  ;;  %v1036_v35 = vor.u32 %v1035_v33, %v1031_v32  ;;  %v1041_v47 = vshrl.u32 %v4364_v28, 16  ;;  %v4014_v32 = vld [vmem:[%s4159_s5 + $0xc4] ss:$0 sps:$4 sm:$0x11]  }
  0x60   : > { %v1040_v41 = vsel %vm218_vm1, %v1036_v35, %v1039_v36  ;;  %v1043_v51 = vor.u32 %v1041_v47, %v1039_v36  ;;  %v2620_v36 = vrot.slane %v4014_v32, 1 }
  0x66   : > { %3591 = vmatmul.mubr.msk.bf16.vlgmr.msra.gmra.mrb[0].mxu1 %vm239_vm2, %v4299_v45  ;;  %v2369_v45 = vsel %vm366_vm3, %v2367_v38, %v2368_v39 }
  0x67   : > { %3595 = vmatpush3.bf16.msra.mxu1 %v806_v56  ;;  %3596 = vmatprep.mubr.msk.bf16.mxu1 %vm239_vm2, %v790_v57  ;;  %v4004_v56 = vld [vmem:[%s4159_s5 + $0xb4] sm:$0xff]   ;;  %v2371_v57 = vsel %vm366_vm3, %v2368_v39, %v2370_v52 }
  0x68   : > { %3886 = vmatprep.subr.msk.bf16.mxu1 %vm246_vm0, %v3991_v58  ;;  %3687 = vmatmul.mubr.msk.bf16.vlgmr.msra.gmra.mrb[0].mxu0 %vm239_vm2, %v2043_v59  ;;  %v2473_v58 = vsel %vm246_vm0, %v4001_v46, 0  ;;  %v4005_v59 = vld [vmem:[%s4552_s1 + $0xe0] sm:$0x3f]   ;;  %v2531_v0 = vshrl.u32 %v4004_v56, 16  ;;  %v4020_v39 = vld [vmem:[%s4552_s1 + $0x78] sm:$0x3f]  }
  0x69   : > { %3691 = vmatpush3.bf16.msra.mxu0 %v2134_v60  ;;  %3692 = vmatprep.mubr.msk.bf16.mxu0 %vm239_vm2, %v2119_v61  ;;  %v4006_v60 = vld [vmem:[%s4159_s5 + $0x4c] ss:$0 sps:$4 sm:$0x11]   ;;  %v2533_v61 = vshll.u32 %v4004_v56, 16 }
  0x6a   : > { %3902 = vmatprep.subr.msk.bf16.mxu0 %vm246_vm0, %v3989_v62  ;;  %v4417_v62 = vld [vmem:[%s4159_s5 + $0xbc] sm:$0xff]   ;;  %v1120_v63 = vrot.slane %v4006_v60, 1 }
  0x6b   : > { %v2535_v1 = vrot.slane %v2533_v61, 1  ;;  %v2537_v2 = vshll.u32 %v4417_v62, 16  ;;  %v2618_v23 = vrot.slane %v4417_v62, 1 }
  0x6c   : > { %v1121_v4 = vsel %vm366_vm3, %v1118_v50, %v1120_v63  ;;  %v4022_v63 = vld [vmem:[%s4159_s5 + $0xd8] ss:$0 sps:$4 sm:$0x11]  }
  0x72   : > { %3597 = vmatmul.mubr.msk.bf16.vlgmr.msra.gmra.mrb[0].mxu1 %vm239_vm2, %v793_v3  ;;  %v4009_v3 = vld [vmem:[%s4159_s5 + $0x50] sm:$0xff]  }
  0x73   : > { %3601 = vmatpush3.bf16.msra.mxu1 %v884_v5  ;;  %3602 = vmatprep.mubr.msk.bf16.mxu1 %vm239_vm2, %v869_v6  ;;  %v2536_v5 = vor.u32 %v2535_v1, %v2531_v0  ;;  %v2539_v6 = vrot.slane %v2537_v2, 1  ;;  %v1367_v33 = vrot.slane %v4009_v3, 1  ;;  %v2870_v0 = vrot.slane %v4022_v63, 1 }
  0x74   : > { %3887 = vmatprep.subr.msk.bf16.mxu1 %vm246_vm0, %v3996_v7  ;;  %3693 = vmatmul.mubr.msk.bf16.vlgmr.msra.gmra.mrb[0].mxu0 %vm239_vm2, %v2121_v9  ;;  %v1223_v7 = vsel %vm246_vm0, %v4008_v55, 0  ;;  %v1283_v9 = vshll.u32 %v4009_v3, 16 }
  0x75   : > { %3697 = vmatpush3.bf16.msra.mxu0 %v2223_v10  ;;  %3698 = vmatprep.mubr.msk.bf16.mxu0 %vm239_vm2, %v3992_v8  ;;  %v4012_v8 = vld [vmem:[%s4552_s1 + $0x68] sm:$0x3f]   ;;  %v4430_v10 = vld [vmem:[%s4159_s5 + $0x58] sm:$0xff]   ;;  %v2540_v14 = vsel %vm218_vm1, %v2536_v5, %v2539_v6 }
  0x76   : > { %3903 = vmatprep.subr.msk.bf16.mxu0 %vm246_vm0, %v3993_v11  ;;  %v2556_v11 = vsel %vm246_vm0, %v4005_v59, 0  ;;  %v1285_v17 = vrot.slane %v1283_v9, 1  ;;  %v1287_v18 = vshll.u32 %v4430_v10, 16  ;;  %v1306_v24 = vsel %vm246_vm0, %v4012_v8, 0 }
  0x77   : > { %v1368_v34 = vrot.slane %v4430_v10, 1 }
  0x78   : > { %v1289_v20 = vrot.slane %v1287_v18, 1 }
  0x79   : > { %v1369_v38 = vsel %vm366_vm3, %v1367_v33, %v1368_v34 }
  0x7e   : > { %3603 = vmatmul.mubr.msk.bf16.vlgmr.msra.gmra.mrb[0].mxu1 %vm239_vm2, %v871_v22  ;;  %v2617_v22 = vrot.slane %v4004_v56, 1 }
  0x7f   : > { %3607 = vmatpush3.bf16.msra.mxu1 %v973_v25  ;;  %3608 = vmatprep.mubr.msk.bf16.mxu1 %vm239_vm2, %v3997_v21  ;;  %v2541_v21 = vshrl.u32 %v4417_v62, 16 }
  0x80   : > { %3888 = vmatprep.subr.msk.bf16.mxu1 %vm246_vm0, %v4000_v26  ;;  %3699 = vmatmul.mubr.msk.bf16.vlgmr.msra.gmra.mrb[0].mxu0 %vm239_vm2, %v4351_v16  ;;  %v1281_v16 = vshrl.u32 %v4009_v3, 16  ;;  %v4015_v26 = vld [vmem:[%s4552_s1 + $0x70] sm:$0x3f]  }
  0x81   : > { %3703 = vmatpush3.bf16.msra.mxu0 %v2306_v29  ;;  %3704 = vmatprep.mubr.msk.bf16.mxu0 %vm239_vm2, %v2290_v30  ;;  %v2543_v27 = vor.u32 %v2541_v21, %v2539_v6  ;;  %v2619_v29 = vsel %vm366_vm3, %v2617_v22, %v2618_v23  ;;  %v4013_v30 = vld [vmem:[%s4552_s1 + $0xf0] sm:$0x3f]   ;;  %v1384_v37 = vsel %vm246_vm0, %v4015_v26, 0  ;;  %v3449_v6 = vld [vmem:[%s4553_s2] ss:$0 sm:$0xff] }
  0x82   : > { %3904 = vmatprep.subr.msk.bf16.mxu0 %vm246_vm0, %v3998_v31  ;;  %v1286_v19 = vor.u32 %v1285_v17, %v1281_v16  ;;  %v1291_v31 = vshrl.u32 %v4430_v10, 16 }
  0x84   : > { %v1290_v25 = vsel %vm218_vm1, %v1286_v19, %v1289_v20  ;;  %v1293_v35 = vor.u32 %v1291_v31, %v1289_v20 }
  0x8a   : > { %3609 = vmatmul.mubr.msk.bf16.vlgmr.msra.gmra.mrb[0].mxu1 %vm239_vm2, %v4364_v28  ;;  %v2634_v28 = vsel %vm246_vm0, %v4010_v15, 0 }
  0x8b   : > { %3613 = vmatpush3.bf16.msra.mxu1 %v1056_v40  ;;  %3614 = vmatprep.mubr.msk.bf16.mxu1 %vm239_vm2, %v1040_v41  ;;  %v4016_v40 = vld [vmem:[%s4159_s5 + $0xc8] sm:$0xff]   ;;  %v2621_v41 = vsel %vm366_vm3, %v2618_v23, %v2620_v36 }
  0x8c   : > { %3889 = vmatprep.subr.msk.bf16.mxu1 %vm246_vm0, %v4003_v42  ;;  %3705 = vmatmul.mubr.msk.bf16.vlgmr.msra.gmra.mrb[0].mxu0 %vm239_vm2, %v2293_v43  ;;  %v2723_v42 = vsel %vm246_vm0, %v4013_v30, 0  ;;  %v4017_v43 = vld [vmem:[%s4552_s1 + $0xf8] sm:$0x3f]   ;;  %v2781_v48 = vshrl.u32 %v4016_v40, 16 }
  0x8d   : > { %3709 = vmatpush3.bf16.msra.mxu0 %v2384_v44  ;;  %3710 = vmatprep.mubr.msk.bf16.mxu0 %vm239_vm2, %v2369_v45  ;;  %v4018_v44 = vld [vmem:[%s4159_s5 + $0x60] ss:$0 sps:$4 sm:$0x11]   ;;  %v2783_v45 = vshll.u32 %v4016_v40, 16 }
  0x8e   : > { %3905 = vmatprep.subr.msk.bf16.mxu0 %vm246_vm0, %v4001_v46  ;;  %v4019_v46 = vld [vmem:[%s4159_s5 + $0xd0] sm:$0xff]   ;;  %v1370_v47 = vrot.slane %v4018_v44, 1  ;;  %s4079_s5 = smov 2  }
  0x8f   : > { %v2785_v49 = vrot.slane %v2783_v45, 1  ;;  %v2787_v50 = vshll.u32 %v4019_v46, 16  ;;  %v2868_v60 = vrot.slane %v4019_v46, 1 }
  0x91   : > { %v2786_v52 = vor.u32 %v2785_v49, %v2781_v48  ;;  %v2871_v1 = vsel %vm366_vm3, %v2868_v60, %v2870_v0 }
  0x96   : > { %3615 = vmatmul.mubr.msk.bf16.vlgmr.msra.gmra.mrb[0].mxu1 %vm239_vm2, %v1043_v51  ;;  %v1371_v51 = vsel %vm366_vm3, %v1368_v34, %v1370_v47 }
  0x97   : > { %3619 = vmatpush3.bf16.msra.mxu1 %v1134_v53  ;;  %3620 = vmatprep.mubr.msk.bf16.mxu1 %vm239_vm2, %v1119_v54  ;;  %v2789_v53 = vrot.slane %v2787_v50, 1  ;;  %v1473_v54 = vsel %vm246_vm0, %v4020_v39, 0 }
  0x98   : > { %3890 = vmatprep.subr.msk.bf16.mxu1 %vm246_vm0, %v4008_v55  ;;  %3711 = vmatmul.mubr.msk.bf16.vlgmr.msra.gmra.mrb[0].mxu0 %vm239_vm2, %v2371_v57  ;;  %v2806_v55 = vsel %vm246_vm0, %v4017_v43, 0  ;;  %v4021_v57 = vld [vmem:[%s4552_s1 + $0x100] sm:$0x3f]  }
  0x99   : > { %3715 = vmatpush3.bf16.msra.mxu0 %v2473_v58  ;;  %3716 = vmatprep.mubr.msk.bf16.mxu0 %vm239_vm2, %v4004_v56  ;;  %v2790_v56 = vsel %vm218_vm1, %v2786_v52, %v2789_v53  ;;  %v2791_v58 = vshrl.u32 %v4019_v46, 16 }
  0x9a   : > { %3906 = vmatprep.subr.msk.bf16.mxu0 %vm246_vm0, %v4005_v59  ;;  %v2867_v59 = vrot.slane %v4016_v40, 1 }
  0x9b   : > { %v2793_v61 = vor.u32 %v2791_v58, %v2789_v53 }
  0xa2   : > { %3621 = vmatmul.mubr.msk.bf16.vlgmr.msra.gmra.mrb[0].mxu1 %vm239_vm2, %v1121_v4 }
  0xa3   : > { %3625 = vmatpush3.bf16.msra.mxu1 %v1223_v7  ;;  %3626 = vmatprep.mubr.msk.bf16.mxu1 %vm239_vm2, %v4009_v3 }
  0xa4   : > { %3891 = vmatprep.subr.msk.bf16.mxu1 %vm246_vm0, %v4012_v8  ;;  %3717 = vmatmul.mubr.msk.bf16.vlgmr.msra.gmra.mrb[0].mxu0 %vm239_vm2, %v4417_v62  ;;  %v2869_v62 = vsel %vm366_vm3, %v2867_v59, %v2868_v60 }
  0xa5   : > { %3721 = vmatpush3.bf16.msra.mxu0 %v2556_v11  ;;  %3722 = vmatprep.mubr.msk.bf16.mxu0 %vm239_vm2, %v2540_v14 }
  0xa6   : > { %3907 = vmatprep.subr.msk.bf16.mxu0 %vm246_vm0, %v4010_v15 }
  0xae   : > { %3627 = vmatmul.mubr.msk.bf16.vlgmr.msra.gmra.mrb[0].mxu1 %vm239_vm2, %v4430_v10 }
  0xaf   : > { %3631 = vmatpush3.bf16.msra.mxu1 %v1306_v24  ;;  %3632 = vmatprep.mubr.msk.bf16.mxu1 %vm239_vm2, %v1290_v25 }
  0xb0   : > { %3892 = vmatprep.subr.msk.bf16.mxu1 %vm246_vm0, %v4015_v26  ;;  %3723 = vmatmul.mubr.msk.bf16.vlgmr.msra.gmra.mrb[0].mxu0 %vm239_vm2, %v2543_v27 }
  0xb1   : > { %3727 = vmatpush3.bf16.msra.mxu0 %v2634_v28  ;;  %3728 = vmatprep.mubr.msk.bf16.mxu0 %vm239_vm2, %v2619_v29 }
  0xb2   : > { %3908 = vmatprep.subr.msk.bf16.mxu0 %vm246_vm0, %v4013_v30 }
  0xba   : > { %3633 = vmatmul.mubr.msk.bf16.vlgmr.msra.gmra.mrb[0].mxu1 %vm239_vm2, %v1293_v35 }
  0xbb   : > { %3637 = vmatpush3.bf16.msra.mxu1 %v1384_v37  ;;  %3638 = vmatprep.mubr.msk.bf16.mxu1 %vm239_vm2, %v1369_v38 }
  0xbc   : > { %3893 = vmatprep.subr.msk.bf16.mxu1 %vm246_vm0, %v4020_v39  ;;  %3729 = vmatmul.mubr.msk.bf16.vlgmr.msra.gmra.mrb[0].mxu0 %vm239_vm2, %v2621_v41 }
  0xbd   : > { %3733 = vmatpush3.bf16.msra.mxu0 %v2723_v42  ;;  %3734 = vmatprep.mubr.msk.bf16.mxu0 %vm239_vm2, %v4016_v40 }
  0xbe   : > { %3909 = vmatprep.subr.msk.bf16.mxu0 %vm246_vm0, %v4017_v43 }
  0xc6   : > { %3639 = vmatmul.mubr.msk.bf16.vlgmr.msra.gmra.mrb[0].mxu1 %vm239_vm2, %v1371_v51 }
  0xc7   : > { %3643 = vmatpush3.bf16.msra.mxu1 %v1473_v54  ;;  %3644 = vmatprep.mubr.msk.bf16.mxu1 %vm239_vm2, %v4169_v12  ;;  %v2884_v12 = vsel %vm246_vm0, %v4021_v57, 0 }
  0xc8   : > { %3735 = vmatmul.mubr.msk.bf16.vlgmr.msra.gmra.mrb[0].mxu0 %vm239_vm2, %v4019_v46 }
  0xc9   : > { %3739 = vmatpush3.bf16.msra.mxu0 %v2806_v55  ;;  %3740 = vmatprep.mubr.msk.bf16.mxu0 %vm239_vm2, %v2790_v56 }
  0xca   : > { %3910 = vmatprep.subr.msk.bf16.mxu0 %vm246_vm0, %v4021_v57 }
  0xd2   : > { %3645 = vmatmul.mubr.msk.bf16.vlgmr.msra.gmra.mrb[0].mxu1 %vm239_vm2, %v4172_v13 }
  0xd4   : > { %3741 = vmatmul.mubr.msk.bf16.vlgmr.msra.gmra.mrb[0].mxu0 %vm239_vm2, %v2793_v61 }
  0xd5   : > { %3745 = vmatpush3.bf16.msra.mxu0 %v2884_v12  ;;  %3746 = vmatprep.mubr.msk.bf16.mxu0 %vm239_vm2, %v2869_v62 }
  0xe0   : > { %3747 = vmatmul.mubr.msk.bf16.vlgmr.msra.gmra.mrb[0].mxu0 %vm239_vm2, %v2871_v1 }
 0x1a5   : > { %v3646_v2 = vpop.f32.mrb[0].mxu1 }
 0x1a6   : > { %v1509_v3 = vpop.f32.mrb[1].mxu1 }
 0x1a7   : > { %v3647_v4 = vpop.f32.mrb[2].mxu1 }
 0x1a8   : > { %v1512_v5 = vpop.f32.mrb[3].mxu1 }
 0x1b3   : > { %v3748_v13 = vpop.f32.mrb[0].mxu0 }
 0x1b4   : > { %v3750_v7 = vadd.f32 %v3748_v13, %v3646_v2  ;;  %v2920_v8 = vpop.f32.mrb[1].mxu0 }
 0x1b5   : > { %v3751_v9 = vadd.f32 %v2920_v8, %v1509_v3  ;;  %v3749_v10 = vpop.f32.mrb[2].mxu0 }
 0x1b6   : > { %v2948_v11 = vadd.f32 %v3750_v7, %v3449_v6  ;;  %v3752_v14 = vadd.f32 %v3749_v10, %v3647_v4  ;;  %v2923_v15 = vpop.f32.mrb[3].mxu0 }
 0x1b7   : > { %v3753_v16 = vadd.f32 %v2923_v15, %v1512_v5  ;;  %v2946_v20 = vadd.f32 %v3751_v9, %v3449_v6 }
 0x1b8   : > { %v4510_v17 = vmax.f32 %v2948_v11, 0.0  ;;  %v2949_v18 = vadd.f32 %v3752_v14, %v3449_v6 }
 0x1b9   : > { %v4516_v22 = vmax.f32 %v2946_v20, 0.0  ;;  %v2947_v25 = vadd.f32 %v3753_v16, %v3449_v6 }
 0x1ba   : > { %v2956_v19 = vmul.f32 %v4510_v17, %v4510_v17  ;;  %v4514_v21 = vmax.f32 %v2949_v18, 0.0 }
 0x1bb   : > { %v2954_v24 = vmul.f32 %v4516_v22, %v4516_v22  ;;  %v4522_v26 = vmax.f32 %v2947_v25, 0.0 }
 0x1bc   : > { %2974 = vrot.lane.b32.xlu0 %v2956_v19, %s4079_s5  ;;  %2962 = vrot.lane.b32.xlu1 %v2956_v19, %s4080_s9  ;;  %v2957_v23 = vmul.f32 %v4514_v21, %v4514_v21 }
 0x1bd   : > { %v2955_v27 = vmul.f32 %v4522_v26, %v4522_v26 }
 0x1c0   : > { %2986 = vrot.lane.b32.xlu0 %v2956_v19, %s4081_s10  ;;  %2964 = vrot.lane.b32.xlu1 %v2957_v23, %s4080_s9 }
 0x1c4   : > { %2958 = vrot.lane.b32.xlu0 %v2954_v24, %s4080_s9  ;;  %2976 = vrot.lane.b32.xlu1 %v2957_v23, %s4079_s5 }
 0x1c8   : > { %2970 = vrot.lane.b32.xlu0 %v2954_v24, %s4079_s5  ;;  %2988 = vrot.lane.b32.xlu1 %v2957_v23, %s4081_s10 }
 0x1cc   : > { %2982 = vrot.lane.b32.xlu0 %v2954_v24, %s4081_s10  ;;  %2972 = vrot.lane.b32.xlu1 %v2955_v27, %s4079_s5 }
 0x1d0   : > { %2984 = vrot.lane.b32.xlu1 %v2955_v27, %s4081_s10  ;;  %2960 = vrot.lane.b32.xlu0 %v2955_v27, %s4080_s9 }
 0x1d4   : > { %2996 = vrot.lane.b32.xlu1 %v2955_v27, %s4082_s11  ;;  %2994 = vrot.lane.b32.xlu0 %v2954_v24, %s4082_s11 }
 0x1d8   : > { %3000 = vrot.lane.b32.xlu1 %v2957_v23, %s4082_s11  ;;  %2998 = vrot.lane.b32.xlu0 %v2956_v19, %s4082_s11 }
 0x22e   : > { %v2975_v28 = vpop.permute.xlu0 %2974  ;;  %v2963_v29 = vpop.permute.xlu1 %2962 }
 0x22f   : > { %v2968_v38 = vadd.f32 %v2963_v29, %v2956_v19 }
 0x231   : > { %v2980_v44 = vadd.f32 %v2975_v28, %v2968_v38 }
 0x232   : > { %v2987_v30 = vpop.permute.xlu0 %2986  ;;  %v2965_v31 = vpop.permute.xlu1 %2964 }
 0x233   : > { %v2969_v45 = vadd.f32 %v2965_v31, %v2957_v23  ;;  %v2992_v53 = vadd.f32 %v2987_v30, %v2980_v44 }
 0x236   : > { %v2959_v32 = vpop.permute.xlu0 %2958  ;;  %v2977_v33 = vpop.permute.xlu1 %2976 }
 0x237   : > { %v2966_v39 = vadd.f32 %v2959_v32, %v2954_v24  ;;  %v2981_v50 = vadd.f32 %v2977_v33, %v2969_v45 }
 0x23a   : > { %v2971_v34 = vpop.permute.xlu0 %2970  ;;  %v2989_v35 = vpop.permute.xlu1 %2988 }
 0x23b   : > { %v2978_v42 = vadd.f32 %v2971_v34, %v2966_v39  ;;  %v2993_v54 = vadd.f32 %v2989_v35, %v2981_v50 }
 0x23e   : > { %v2983_v36 = vpop.permute.xlu0 %2982  ;;  %v2973_v37 = vpop.permute.xlu1 %2972 }
 0x23f   : > { %v2990_v46 = vadd.f32 %v2983_v36, %v2978_v42 }
 0x242   : > { %v2985_v40 = vpop.permute.xlu1 %2984  ;;  %v2961_v41 = vpop.permute.xlu0 %2960 }
 0x243   : > { %v2967_v43 = vadd.f32 %v2961_v41, %v2955_v27 }
 0x245   : > { %v2979_v47 = vadd.f32 %v2973_v37, %v2967_v43 }
 0x246   : > { %v2997_v48 = vpop.permute.xlu1 %2996  ;;  %v2995_v49 = vpop.permute.xlu0 %2994 }
 0x247   : > { %v2991_v51 = vadd.f32 %v2985_v40, %v2979_v47  ;;  %v3002_v52 = vadd.f32 %v2995_v49, %v2990_v46 }
 0x249   : > { %v3003_v55 = vadd.f32 %v2997_v48, %v2991_v51  ;;  %v3006_v56 = vmul.f32 2e-05, %v3002_v52 }
 0x24a   : > { %v3001_v57 = vpop.permute.xlu1 %3000  ;;  %v2999_v58 = vpop.permute.xlu0 %2998 }
 0x24b   : > { %v3007_v59 = vmul.f32 2e-05, %v3003_v55  ;;  %v3010_v60 = vadd.f32 2.0, %v3006_v56  ;;  %v3005_v61 = vadd.f32 %v3001_v57, %v2993_v54  ;;  %v3004_v12 = vadd.f32 %v2999_v58, %v2992_v53 }
 0x24d   : > { %v3011_v62 = vadd.f32 2.0, %v3007_v59  ;;  %4023 = vlog2.f32 %v3010_v60  ;;  %v3009_v63 = vmul.f32 2e-05, %v3005_v61  ;;  %v3008_v0 = vmul.f32 2e-05, %v3004_v12 }
 0x24f   : > { %4025 = vlog2.f32 %v3011_v62  ;;  %v3013_v1 = vadd.f32 2.0, %v3009_v63  ;;  %v3012_v2 = vadd.f32 2.0, %v3008_v0 }
 0x251   : > { %4027 = vlog2.f32 %v3013_v1 }
 0x252   : > { %4029 = vlog2.f32 %v3012_v2 }
 0x257   : > { %v4024_v3 = vpop.eup %4023 }
 0x258   : > { %v3015_v4 = vmul.f32 0.6931472, %v4024_v3 }
 0x259   : > { %v4026_v5 = vpop.eup %4025 }
 0x25a   : > { %v3017_v13 = vmul.f32 0.6931472, %v4026_v5  ;;  %v3022_v6 = vmul.f32 -0.75, %v3015_v4 }
 0x25b   : > { %v4028_v7 = vpop.eup %4027 }
 0x25c   : > { %v4030_v8 = vpop.eup %4029  ;;  %v3023_v9 = vmul.f32 -0.75, %v3017_v13  ;;  %v3026_v10 = vmul.f32 1.442695, %v3022_v6  ;;  %v3021_v11 = vmul.f32 0.6931472, %v4028_v7 }
 0x25d   : > { %v3019_v14 = vmul.f32 0.6931472, %v4030_v8 }
 0x25e   : > { %v3028_v15 = vmul.f32 1.442695, %v3023_v9  ;;  %4031 = vpow2.f32 %v3026_v10  ;;  %v3025_v16 = vmul.f32 -0.75, %v3021_v11 }
 0x25f   : > { %v3024_v18 = vmul.f32 -0.75, %v3019_v14 }
 0x260   : > { %4033 = vpow2.f32 %v3028_v15  ;;  %v3032_v19 = vmul.f32 1.442695, %v3025_v16 }
 0x261   : > { %v3030_v20 = vmul.f32 1.442695, %v3024_v18 }
 0x262   : > { %4035 = vpow2.f32 %v3032_v19 }
 0x263   : > { %4037 = vpow2.f32 %v3030_v20 }
 0x268   : > { %v4032_v23 = vpop.eup %4031 }
 0x269   : > { %v3034_v24 = vmul.f32 %v4032_v23, %v4516_v22 }
 0x26a   : > { %v4034_v25 = vpop.eup %4033 }
 0x26b   : > { %v3035_v27 = vmul.f32 %v4034_v25, %v4522_v26  ;;  %3039 = vst.msk [vmem:[%s192_s25] sm:$0xff] %vm3038_vm4, %v3034_v24 }
 0x26c   : > { %v4036_v28 = vpop.eup %4035 }
 0x26d   : > { %v4038_v29 = vpop.eup %4037  ;;  %3040 = vst.msk [vmem:[%s192_s25 + $0x8] sm:$0xff] %vm3038_vm4, %v3035_v27  ;;  %v3037_v30 = vmul.f32 %v4036_v28, %v4514_v21 }
 0x26e   : > { %v3036_v31 = vmul.f32 %v4038_v29, %v4510_v17 }
 0x26f   : > { %3043 = vst.msk [vmem:[%s192_s25 + $0x18] sm:$0x7f] %vm3042_vm5, %v3037_v30 }
 0x270   : > { %3041 = vst.msk [vmem:[%s192_s25 + $0x10] sm:$0xff] %vm3038_vm4, %v3036_v31 }
 0x271 PF: > { %s13_s16 = sadd.s32 1, %s4077_s16   ;;  %s4555_s12 = smov %s4069_s14 }
 0x272   : > { %p10_p7 = scmp.ge.s32.totalorder %s13_s16, 64   ;;  %s4556_s13 = smov %s4073_s15 }
 0x273   : > { %s4557_s14 = smov %s4560_s17  ;;  %s4558_s15 = smov %s4564_s18 }
 0x274   :  { %12 = sbr.rel (!%p10_p7) target bundleno = 3 (0x3), region = 105 }

// kernel: alexnet_forward.10
= control target key start
LH: loop header
LB: loop body
LE: loop exit
PB: predicated region body
PF: predicated region fallthrough
CT: control target
= control target key end

     0   :  { %s427_s6 = smov 0   ;;  %s429_s7 = smov 0   ;;  %s490_s0 = inlined_call_operand.vmem [shape: f32[2,31,16,32], index: 0, kind: input, shape index: {}]   ;;  %s491_s1 = inlined_call_operand.vmem [shape: f32[2,15,15,16], index: 1, kind: output, shape index: {}]  }
   0x1   :  { %s431_s8 = smov 0   ;;  %s433_s9 = smov 0  }
   0x2   :  { %s435_s10 = smov 0  }
   0x3 LB: > { %s20_s11 = sadd.s32 1, %s406_s8  ;;  %s23_s12 = sadd.s32 1, %s410_s9  ;;  %s414_s10 = sphi %s435_s10, %s11_s10   ;;  %s410_s9 = sphi %s433_s9, %s495_s9   ;;  %s406_s8 = sphi %s431_s8, %s494_s8   ;;  %s402_s7 = sphi %s429_s7, %s493_s7   ;;  %s398_s6 = sphi %s427_s6, %s492_s6  }
   0x4   : > { %p21_p0 = scmp.ge.s32.totalorder %s20_s11, 15  ;;  %p314_p1 = scmp.ge.s32.totalorder %s414_s10, 1 }
   0x5   : > { %p101_p2 = scmp.lt.s32.totalorder %s414_s10, 31 }
   0x6   : > { %s497_s11 = smov (%p21_p0, %s20_s11), 0  ;;  %s499_s12 = smov (!%p21_p0, %s23_s12), %s410_s9 }
   0x7   : > { %p102_p3 = pnand %p314_p1, %p101_p2  ;;  %p25_p4 = scmp.ge.s32.totalorder %s499_s12, 2 }
   0x8   : > { %p125_p5 = scmp.lt.s32.totalorder (!%p102_p3), %s402_s7, 1  ;;  %s330_s14 = sshll.u32 (!%p102_p3), %s398_s6, 5  ;;  %vm154_vm0 = vcmask (!%p102_p3), 1046528   ;;  %vm210_vm1 = vcmask (!%p102_p3), 130048   ;;  %vm212_vm2 = vcmask (!%p102_p3), 129024  }
   0x9   : > { %s501_s12 = smov (%p25_p4, %s499_s12), 0  ;;  %105 = sbr.rel (%p102_p3) target bundleno = 158 (0x9e), region = 24 }
   0xa   : > { %s416_s19 = smov (!%p102_p3), 112   ;;  %p132_p6 = scmp.lt.s32.totalorder (!%p102_p3), %s398_s6, 14 }
  0x10   : > { %s503_s7 = smov (!%p125_p5, %s402_s7), 1  ;;  %s505_s6 = smov (!%p132_p6, %s398_s6), 14 }
  0x11   : > { %s333_s13 = smul.u32 496, %s503_s7  ;;  %s316_s21 = sshll.u32 %s505_s6, 1 }
  0x12   : > { %s334_s20 = smul.u32 30, %s503_s7 }
  0x13   : > { %s129_s17 = scalar_lea.vmem %s490_s0, %s333_s13 }
  0x14   : > { %s141_s18 = scalar_lea.vmem %s129_s17, %s330_s14  ;;  %s136_s22 = sadd.s32 %s334_s20, %s316_s21 }
  0x15   : > { %v142_v0 = vld [vmem:[%s141_s18] sm:$0xff]  ;;  %v322_v1 = vld [vmem:[%s141_s18 + $0x10] sm:$0xff]  ;;  %v143_v2 = vld [vmem:[%s141_s18 + $0x8] sm:$0xff]  ;;  %s317_s23 = sshll.u32 %s136_s22, 3 }
  0x16   : > { %146 = vrot.lane.b32.xlu0 %v142_v0, %s416_s19  ;;  %171 = vrot.lane.b32.xlu1 %v322_v1, %s416_s19  ;;  %v323_v3 = vld [vmem:[%s141_s18 + $0x18] sm:$0xff]  ;;  %v326_v4 = vld [vmem:[%s141_s18 + $0x20] sm:$0xff]  ;;  %v155_v6 = vrot.slane %v142_v0, 1  ;;  %v156_v7 = vrot.slane %v143_v2, 1  ;;  %v179_v11 = vrot.slane %v322_v1, 1  ;;  %s138_s26 = scalar_lea.vmem %s491_s1, %s317_s23 }
  0x17   : > { %v327_v5 = vld [vmem:[%s141_s18 + $0x28] sm:$0xff]  ;;  %v180_v12 = vrot.slane %v323_v3, 1  ;;  %v203_v21 = vrot.slane %v326_v4, 1 }
  0x18   : > { %v157_v9 = vsel %vm154_vm0, %v155_v6, %v156_v7  ;;  %v204_v22 = vrot.slane %v327_v5, 1 }
  0x19   : > { %v181_v18 = vsel %vm154_vm0, %v179_v11, %v180_v12 }
  0x1a   : > { %148 = vrot.lane.b32.xlu0 %v143_v2, %s416_s19  ;;  %173 = vrot.lane.b32.xlu1 %v323_v3, %s416_s19  ;;  %v205_v29 = vsel %vm154_vm0, %v203_v21, %v204_v22 }
  0x1e   : > { %195 = vrot.lane.b32.xlu0 %v326_v4, %s416_s19  ;;  %197 = vrot.lane.b32.xlu1 %v327_v5, %s416_s19 }
  0x88   : > { %v147_v8 = vpop.permute.xlu0 %146  ;;  %v172_v13 = vpop.permute.xlu1 %171 }
  0x89   : > { %v152_v10 = vmax.f32 %v142_v0, %v147_v8 }
  0x8b   : > { %v160_v14 = vmax.f32 %v152_v10, %v157_v9 }
  0x8c   : > { %v149_v15 = vpop.permute.xlu0 %148  ;;  %v174_v23 = vpop.permute.xlu1 %173 }
  0x8d   : > { %v153_v16 = vmax.f32 %v143_v2, %v149_v15  ;;  %v167_v17 = vmax.f32 %v160_v14, %v322_v1 }
  0x8f   : > { %v161_v19 = vmax.f32 %v153_v16, %v156_v7  ;;  %v177_v20 = vmax.f32 %v167_v17, %v172_v13 }
  0x90   : > { %v196_v26 = vpop.permute.xlu0 %195  ;;  %v198_v32 = vpop.permute.xlu1 %197 }
  0x91   : > { %v184_v24 = vmax.f32 %v177_v20, %v181_v18  ;;  %v168_v25 = vmax.f32 %v161_v19, %v323_v3 }
  0x93   : > { %v178_v27 = vmax.f32 %v168_v25, %v174_v23  ;;  %v191_v28 = vmax.f32 %v184_v24, %v326_v4 }
  0x95   : > { %v185_v30 = vmax.f32 %v178_v27, %v180_v12  ;;  %v201_v31 = vmax.f32 %v191_v28, %v196_v26 }
  0x97   : > { %v208_v33 = vmax.f32 %v201_v31, %v205_v29  ;;  %v192_v34 = vmax.f32 %v185_v30, %v327_v5 }
  0x99   : > { %211 = vst.msk [vmem:[%s138_s26] sm:$0xff] %vm210_vm1, %v208_v33  ;;  %v202_v35 = vmax.f32 %v192_v34, %v198_v32 }
  0x9b   : > { %v209_v36 = vmax.f32 %v202_v35, %v204_v22 }
  0x9d   : > { %213 = vst.msk [vmem:[%s138_s26 + $0x8] sm:$0x7f] %vm212_vm2, %v209_v36 }
  0x9e PF: > { %s11_s10 = sadd.s32 1, %s414_s10   ;;  %s492_s6 = smov %s406_s8 }
  0x9f   : > { %p8_p7 = scmp.ge.s32.totalorder %s11_s10, 32   ;;  %s493_s7 = smov %s410_s9 }
  0xa0   : > { %s494_s8 = smov %s497_s11  ;;  %s495_s9 = smov %s501_s12 }
  0xa1   :  { %10 = sbr.rel (!%p8_p7) target bundleno = 3 (0x3), region = 57 }

// kernel: alexnet_forward.12
= control target key start
LH: loop header
LB: loop body
LE: loop exit
PB: predicated region body
PF: predicated region fallthrough
CT: control target
= control target key end

     0   :  { %s381_s6 = smov 0   ;;  %s383_s7 = smov 0   ;;  %s437_s0 = inlined_call_operand.vmem [shape: f32[2,15,8,64], index: 0, kind: input, shape index: {}]   ;;  %s438_s1 = inlined_call_operand.vmem [shape: f32[2,7,7,32], index: 1, kind: output, shape index: {}]  }
   0x1   :  { %s385_s8 = smov 0   ;;  %s387_s9 = smov 0  }
   0x2   :  { %s389_s10 = smov 0  }
   0x3 LB: > { %s20_s11 = sadd.s32 1, %s360_s8  ;;  %s23_s12 = sadd.s32 1, %s364_s9  ;;  %s368_s10 = sphi %s389_s10, %s11_s10   ;;  %s364_s9 = sphi %s387_s9, %s442_s9   ;;  %s360_s8 = sphi %s385_s8, %s441_s8   ;;  %s356_s7 = sphi %s383_s7, %s440_s7   ;;  %s352_s6 = sphi %s381_s6, %s439_s6  }
   0x4   : > { %p21_p0 = scmp.ge.s32.totalorder %s20_s11, 7  ;;  %p271_p1 = scmp.ge.s32.totalorder %s368_s10, 1 }
   0x5   : > { %p101_p2 = scmp.lt.s32.totalorder %s368_s10, 15 }
   0x6   : > { %s444_s11 = smov (%p21_p0, %s20_s11), 0  ;;  %s446_s12 = smov (!%p21_p0, %s23_s12), %s364_s9 }
   0x7   : > { %p102_p3 = pnand %p271_p1, %p101_p2  ;;  %p25_p4 = scmp.ge.s32.totalorder %s446_s12, 2 }
   0x8   : > { %p124_p5 = scmp.lt.s32.totalorder (!%p102_p3), %s356_s7, 1  ;;  %s284_s14 = sshll.u32 (!%p102_p3), %s352_s6, 4  ;;  %vm175_vm0 = vcmask (!%p102_p3), 260096  }
   0x9   : > { %s448_s12 = smov (%p25_p4, %s446_s12), 0  ;;  %105 = sbr.rel (%p102_p3) target bundleno = 154 (0x9a), region = 24 }
   0xa   : > { %s370_s19 = smov (!%p102_p3), 96   ;;  %p131_p6 = scmp.lt.s32.totalorder (!%p102_p3), %s352_s6, 6 }
  0x10   : > { %s450_s7 = smov (!%p124_p5, %s356_s7), 1  ;;  %s452_s6 = smov (!%p131_p6, %s352_s6), 6 }
  0x11   : > { %s287_s13 = smul.u32 120, %s450_s7 }
  0x12   : > { %s288_s20 = smul.u32 7, %s450_s7 }
  0x13   : > { %s128_s17 = scalar_lea.vmem %s437_s0, %s287_s13 }
  0x14   : > { %s139_s18 = scalar_lea.vmem %s128_s17, %s284_s14  ;;  %s134_s21 = sadd.s32 %s288_s20, %s452_s6 }
  0x15   : > { %v140_v0 = vld [vmem:[%s139_s18] sm:$0xff]  ;;  %v281_v1 = vld [vmem:[%s139_s18 + $0x10] sm:$0xff]  ;;  %v278_v2 = vld [vmem:[%s139_s18 + $0x8] sm:$0xff]  ;;  %s273_s22 = sshll.u32 %s134_s21, 3 }
  0x16   : > { %142 = vrot.lane.b32.xlu0 %v140_v0, %s370_s19  ;;  %168 = vrot.lane.b32.xlu1 %v281_v1, %s370_s19  ;;  %v146_v3 = vrot.slane %v140_v0, 1  ;;  %v159_v8 = vrot.slane %v278_v2, 1  ;;  %v172_v13 = vrot.slane %v281_v1, 1  ;;  %s136_s25 = scalar_lea.vmem %s438_s1, %s273_s22 }
  0x1a   : > { %155 = vrot.lane.b32.xlu0 %v278_v2, %s370_s19 }
  0x88   : > { %v143_v4 = vpop.permute.xlu0 %142  ;;  %v169_v12 = vpop.permute.xlu1 %168 }
  0x89   : > { %v145_v5 = vmax.f32 %v140_v0, %v143_v4 }
  0x8b   : > { %v148_v6 = vmax.f32 %v145_v5, %v146_v3 }
  0x8c   : > { %v156_v7 = vpop.permute.xlu0 %155 }
  0x8d   : > { %v153_v9 = vmax.f32 %v148_v6, %v278_v2 }
  0x8f   : > { %v158_v10 = vmax.f32 %v153_v9, %v156_v7 }
  0x91   : > { %v161_v11 = vmax.f32 %v158_v10, %v159_v8 }
  0x93   : > { %v166_v14 = vmax.f32 %v161_v11, %v281_v1 }
  0x95   : > { %v171_v15 = vmax.f32 %v166_v14, %v169_v12 }
  0x97   : > { %v174_v16 = vmax.f32 %v171_v15, %v172_v13 }
  0x99   : > { %176 = vst.msk [vmem:[%s136_s25] sm:$0x7f] %vm175_vm0, %v174_v16 }
  0x9a PF: > { %s11_s10 = sadd.s32 1, %s368_s10   ;;  %s439_s6 = smov %s360_s8 }
  0x9b   : > { %p8_p7 = scmp.ge.s32.totalorder %s11_s10, 16   ;;  %s440_s7 = smov %s364_s9 }
  0x9c   : > { %s441_s8 = smov %s444_s11  ;;  %s442_s9 = smov %s448_s12 }
  0x9d   :  { %10 = sbr.rel (!%p8_p7) target bundleno = 3 (0x3), region = 57 }

// kernel: alexnet_forward.11
= control target key start
LH: loop header
LB: loop body
LE: loop exit
PB: predicated region body
PF: predicated region fallthrough
CT: control target
= control target key end

     0   :  { %s2409_s12 = smov 0   ;;  %s2411_s13 = smov 0   ;;  %s2711_s0 = inlined_call_operand.vmem [shape: bf16[2,19,19,16], index: 0, kind: input, shape index: {}]   ;;  %s2712_s1 = inlined_call_operand.vmem [shape: bf16[5,5,16,128], index: 1, kind: input, shape index: {}]   ;;  %s2713_s2 = inlined_call_operand.vmem [shape: f32[1,128], index: 2, kind: input, shape index: {}]   ;;  %s2714_s3 = inlined_call_operand.vmem [shape: f32[2,15,15,32], index: 3, kind: output, shape index: {}]  }
   0x1   :  { %s2413_s14 = smov 0   ;;  %s2415_s15 = smov 0  }
   0x2   :  { %s2417_s16 = smov 0  }
   0x3 LB: > { %s22_s17 = sadd.s32 1, %s2373_s14  ;;  %s25_s18 = sadd.s32 1, %s2377_s15  ;;  %s2381_s16 = sphi %s2417_s16, %s13_s16   ;;  %s2377_s15 = sphi %s2415_s15, %s2718_s15   ;;  %s2373_s14 = sphi %s2413_s14, %s2717_s14   ;;  %s2369_s13 = sphi %s2411_s13, %s2716_s13   ;;  %s2365_s12 = sphi %s2409_s12, %s2715_s12  }
   0x4   : > { %p23_p0 = scmp.ge.s32.totalorder %s22_s17, 15  ;;  %p1923_p1 = scmp.ge.s32.totalorder %s2381_s16, 1 }
   0x5   : > { %p151_p2 = scmp.lt.s32.totalorder %s2381_s16, 31 }
   0x6   : > { %s2720_s17 = smov (%p23_p0, %s22_s17), 0  ;;  %s2722_s18 = smov (!%p23_p0, %s25_s18), %s2377_s15 }
   0x7   : > { %p152_p3 = pnand %p1923_p1, %p151_p2  ;;  %p27_p4 = scmp.ge.s32.totalorder %s2722_s18, 2 }
   0x8   : > { %v2300_v0 = vld [vmem:[%s2712_s1 + $0x8] sm:$0xff] (!%p152_p3)   ;;  %v2383_v1 = vmov (!%p152_p3), 0.0   ;;  %v2301_v2 = vld [vmem:[%s2712_s1] sm:$0xff] (!%p152_p3)   ;;  %vm2384_vm0 = vmmov (!%p152_p3), 0   ;;  %p179_p5 = scmp.lt.s32.totalorder (!%p152_p3), %s2369_s13, 1  ;;  %s2051_s23 = smul.u32 (!%p152_p3), 12, %s2365_s12 }
   0x9   : > { %s2724_s18 = smov (%p27_p4, %s2722_s18), 0  ;;  %155 = sbr.rel (%p152_p3) target bundleno = 509 (0x1fd), region = 32 }
   0xa   : > { %2102 = vmatprep.subr.bf16.mxu0 (!%p152_p3), %v2383_v1  ;;  %2108 = vmatprep.subr.bf16.mxu1 (!%p152_p3), %v2383_v1  ;;  %vm223_vm1 = vcmask (!%p152_p3), 130048   ;;  %v2304_v3 = vld [vmem:[%s2712_s1 + $0x18] sm:$0xff] (!%p152_p3)   ;;  %v2303_v13 = vld [vmem:[%s2712_s1 + $0x10] sm:$0xff] (!%p152_p3)   ;;  %vm382_vm2 = vsmask.f32 (!%p152_p3), 6400  ;;  %v2307_v19 = vld [vmem:[%s2712_s1 + $0x28] sm:$0xff] (!%p152_p3)  }
   0xb   : > { %2103 = vmatpush3.bf16.msra.mxu0 (!%p152_p3), %v2300_v0  ;;  %2104 = vmatprep.mubr.msk.bf16.mxu0 (!%p152_p3), %vm2384_vm0, %v2383_v1  ;;  %vm323_vm3 = vcmask (!%p152_p3), 1046528   ;;  %v2306_v24 = vld [vmem:[%s2712_s1 + $0x20] sm:$0xff] (!%p152_p3)   ;;  %v2310_v26 = vld [vmem:[%s2712_s1 + $0x38] sm:$0xff] (!%p152_p3)   ;;  %vm450_vm4 = vcmask (!%p152_p3), 1045504   ;;  %v2308_v34 = vld [vmem:[%s2712_s1 + $0x30] sm:$0xff] (!%p152_p3)   ;;  %s2385_s11 = smov (!%p152_p3), 2  }
   0xc   : > { %2109 = vmatpush3.bf16.msra.mxu1 (!%p152_p3), %v2301_v2  ;;  %2110 = vmatprep.mubr.msk.bf16.mxu1 (!%p152_p3), %vm2384_vm0, %v2383_v1  ;;  %v2313_v38 = vld [vmem:[%s2712_s1 + $0x48] sm:$0xff] (!%p152_p3)   ;;  %v2311_v47 = vld [vmem:[%s2712_s1 + $0x40] sm:$0xff] (!%p152_p3)   ;;  %v2315_v53 = vld [vmem:[%s2712_s1 + $0x58] sm:$0xff] (!%p152_p3)   ;;  %s2386_s19 = smov (!%p152_p3), 1   ;;  %s2388_s20 = smov (!%p152_p3), 127   ;;  %vm1817_vm5 = vcmask (!%p152_p3), 260096  }
   0xd   : > { %2114 = vmatprep.subr.bf16.mxu0 (!%p152_p3), %v2383_v1  ;;  %2120 = vmatprep.subr.bf16.mxu1 (!%p152_p3), %v2383_v1  ;;  %p186_p6 = scmp.lt.s32.totalorder (!%p152_p3), %s2365_s12, 14  ;;  %vm1815_vm6 = vcmask (!%p152_p3), 261120  }
  0x10   : > { %s2726_s13 = smov (!%p179_p5, %s2369_s13), 1  ;;  %s2728_s12 = smov (!%p186_p6, %s2365_s12), 14 }
  0x11   : > { %s2252_s24 = smul.u32 228, %s2726_s13  ;;  %s1925_s22 = sshll.u32 %s2728_s12, 1 }
  0x12   : > { %s2253_s21 = smul.u32 30, %s2726_s13 }
  0x13   : > { %s183_s27 = scalar_lea.vmem %s2711_s0, %s2252_s24 }
  0x14   : > { %s2462_s28 = scalar_lea.vmem %s183_s27, %s2051_s23  ;;  %s190_s23 = sadd.s32 %s2253_s21, %s1925_s22 }
  0x15   : > { %v2302_v4 = vld [vmem:[%s2462_s28] sm:$0xff]   ;;  %v2305_v5 = vld [vmem:[%s2462_s28 + $0x8] ss:$0 sps:$4 sm:$0x33]   ;;  %v2309_v25 = vld [vmem:[%s2462_s28 + $0xc] sm:$0xff]   ;;  %s1926_s24 = sshll.u32 %s190_s23, 3 }
  0x16   : > { %v211_v6 = vshrl.u32 %v2302_v4, 16  ;;  %v213_v7 = vshll.u32 %v2302_v4, 16  ;;  %2111 = vmatmul.mubr.msk.bf16.vlgmr.msra.gmra.mrb[0].mxu1 %vm223_vm1, %v2302_v4  ;;  %v387_v8 = vshrl.u32 %v2305_v5, 16  ;;  %v390_v9 = vshll.u32 %v2305_v5, 16  ;;  %v2517_v44 = vld [vmem:[%s2462_s28 + $0x30] sm:$0xff]   ;;  %v2522_v46 = vld [vmem:[%s2462_s28 + $0x18] sm:$0xff]   ;;  %s192_s27 = scalar_lea.vmem %s2714_s3, %s1926_s24 }
  0x17   : > { %2121 = vmatpush3.bf16.msra.mxu1 %v2304_v3  ;;  %2122 = vmatprep.mubr.msk.bf16.mxu1 %vm2384_vm0, %v2383_v1  ;;  %v324_v20 = vrot.slane %v2302_v4, 1  ;;  %v325_v21 = vrot.slane %v2305_v5, 1  ;;  %v2312_v27 = vld [vmem:[%s2462_s28 + $0x14] ss:$0 sps:$4 sm:$0x33]   ;;  %v451_v28 = vrot.slane %v2302_v4, 2 }
  0x18   : > { %v215_v10 = vrot.slane %v213_v7, 1  ;;  %v383_v11 = vrot.slane %v211_v6, 1  ;;  %v384_v12 = vrot.slane %v213_v7, 2  ;;  %2132 = vmatprep.subr.bf16.mxu1 %v2383_v1  ;;  %v389_v14 = vrot.slane %v387_v8, 1 }
  0x19   : > { %v392_v15 = vrot.slane %v390_v9, 2  ;;  %v326_v23 = vsel %vm323_vm3, %v324_v20, %v325_v21  ;;  %v452_v29 = vrot.slane %v2305_v5, 2  ;;  %v640_v30 = vrot.slane %v2309_v25, 1  ;;  %v2333_v54 = vld [vmem:[%s2462_s28 + $0x38] ss:$0 sps:$4 sm:$0x33]  }
  0x1a   : > { %v216_v16 = vor.u32 %v215_v10, %v211_v6  ;;  %v385_v17 = vor.u32 %v384_v12, %v383_v11  ;;  %v641_v31 = vrot.slane %v2312_v27, 1  ;;  %v578_v32 = vshll.u32 %v2309_v25, 16  ;;  %v2542_v59 = vld [vmem:[%s2462_s28 + $0x20] ss:$0 sps:$4 sm:$0x33]  }
  0x1b   : > { %v393_v18 = vor.u32 %v392_v15, %v389_v14  ;;  %v453_v33 = vsel %vm450_vm4, %v451_v28, %v452_v29  ;;  %v576_v35 = vshrl.u32 %v2309_v25, 16  ;;  %v702_v36 = vshrl.u32 %v2312_v27, 16  ;;  %v2321_v28 = vld [vmem:[%s2712_s1 + $0x78] sm:$0xff]  }
  0x1c   : > { %2105 = vmatmul.mubr.msk.bf16.vlgmr.msra.gmra.mrb[0].mxu0 %vm223_vm1, %v216_v16  ;;  %v642_v37 = vsel %vm323_vm3, %v640_v30, %v641_v31  ;;  %v705_v39 = vshll.u32 %v2312_v27, 16  ;;  %v580_v40 = vrot.slane %v578_v32, 1  ;;  %v699_v42 = vrot.slane %v578_v32, 2  ;;  %v2314_v16 = vld [vmem:[%s2712_s1 + $0x50] sm:$0xff]  }
  0x1d   : > { %2115 = vmatpush3.bf16.msra.mxu0 %v2303_v13  ;;  %2116 = vmatprep.mubr.msk.bf16.mxu0 %vm2384_vm0, %v2383_v1  ;;  %v394_v22 = vsel %vm382_vm2, %v385_v17, %v393_v18  ;;  %v698_v41 = vrot.slane %v576_v35, 1  ;;  %v765_v43 = vrot.slane %v2309_v25, 2  ;;  %v704_v45 = vrot.slane %v702_v36, 1  ;;  %v2320_v32 = vld [vmem:[%s2712_s1 + $0x70] sm:$0xff]  }
  0x1e   : > { %2126 = vmatprep.subr.bf16.mxu0 %v2383_v1  ;;  %2123 = vmatmul.mubr.msk.bf16.vlgmr.msra.gmra.mrb[4].mxu1 %vm223_vm1, %v394_v22  ;;  %v707_v48 = vrot.slane %v705_v39, 2  ;;  %v766_v49 = vrot.slane %v2312_v27, 2  ;;  %v581_v50 = vor.u32 %v580_v40, %v576_v35  ;;  %v1518_v51 = vshrl.u32 %v2517_v44, 16  ;;  %v2326_v35 = vld [vmem:[%s2462_s28 + $0x2c] ss:$0 sps:$4 sm:$0x33]  }
  0x1f   : > { %2133 = vmatpush3.bf16.msra.mxu1 %v2307_v19  ;;  %2134 = vmatprep.mubr.msk.bf16.mxu1 %vm2384_vm0, %v2383_v1  ;;  %v1520_v52 = vshll.u32 %v2517_v44, 16  ;;  %v1582_v55 = vrot.slane %v2517_v44, 1  ;;  %v892_v56 = vshll.u32 %v2522_v46, 16  ;;  %v1583_v60 = vrot.slane %v2333_v54, 1  ;;  %v2318_v19 = vld [vmem:[%s2712_s1 + $0x68] sm:$0xff]  }
  0x20   : > { %2144 = vmatprep.subr.bf16.mxu1 %v2383_v1  ;;  %v1640_v57 = vrot.slane %v1518_v51, 1  ;;  %v767_v58 = vsel %vm450_vm4, %v765_v43, %v766_v49  ;;  %v1644_v62 = vshrl.u32 %v2333_v54, 16  ;;  %v700_v63 = vor.u32 %v699_v42, %v698_v41  ;;  %v2322_v42 = vld [vmem:[%s2712_s1 + $0x80] sm:$0xff]  }
  0x21   : > { %v1641_v61 = vrot.slane %v1520_v52, 2  ;;  %v1647_v0 = vshll.u32 %v2333_v54, 16  ;;  %v1707_v2 = vrot.slane %v2517_v44, 2  ;;  %v1708_v3 = vrot.slane %v2333_v54, 2 }
  0x22   : > { %v708_v4 = vor.u32 %v707_v48, %v704_v45  ;;  %v890_v5 = vshrl.u32 %v2522_v46, 16  ;;  %v2552_v6 = vsel %vm323_vm3, %v1582_v55, %v1583_v60  ;;  %v1646_v7 = vrot.slane %v1644_v62, 1  ;;  %v2327_v45 = vld [vmem:[%s2712_s1 + $0x98] sm:$0xff]   ;;  %v2325_v55 = vld [vmem:[%s2712_s1 + $0x90] sm:$0xff]  }
  0x23   : > { %v894_v8 = vrot.slane %v892_v56, 1  ;;  %v1642_v9 = vor.u32 %v1641_v61, %v1640_v57  ;;  %v1649_v10 = vrot.slane %v1647_v0, 2  ;;  %v2557_v11 = vsel %vm450_vm4, %v1707_v2, %v1708_v3  ;;  %v2329_v61 = vld [vmem:[%s2712_s1 + $0xa8] sm:$0xff]   ;;  %v2328_v3 = vld [vmem:[%s2712_s1 + $0xa0] sm:$0xff]  }
  0x24   : > { %2117 = vmatmul.mubr.msk.bf16.vlgmr.msra.gmra.mrb[4].mxu0 %vm223_vm1, %v326_v23  ;;  %v1016_v12 = vshrl.u32 %v2542_v59, 16  ;;  %v1019_v13 = vshll.u32 %v2542_v59, 16  ;;  %v709_v15 = vsel %vm382_vm2, %v700_v63, %v708_v4  ;;  %v1012_v20 = vrot.slane %v890_v5, 1 }
  0x25   : > { %2127 = vmatpush3.bf16.msra.mxu0 %v2306_v24  ;;  %2128 = vmatprep.mubr.msk.bf16.mxu0 %vm2384_vm0, %v2383_v1  ;;  %v1650_v14 = vor.u32 %v1649_v10, %v1646_v7  ;;  %v895_v17 = vor.u32 %v894_v8, %v890_v5  ;;  %v1013_v21 = vrot.slane %v892_v56, 2  ;;  %v954_v29 = vrot.slane %v2522_v46, 1  ;;  %v2332_v5 = vld [vmem:[%s2712_s1 + $0xb8] sm:$0xff]  }
  0x26   : > { %2138 = vmatprep.subr.bf16.mxu0 %v2383_v1  ;;  %2135 = vmatmul.mubr.msk.bf16.vlgmr.msra.gmra.mrb[8].mxu1 %vm223_vm1, %v2309_v25  ;;  %v1018_v22 = vrot.slane %v1016_v12, 1  ;;  %v1021_v23 = vrot.slane %v1019_v13, 2  ;;  %v955_v30 = vrot.slane %v2542_v59, 1  ;;  %v1079_v36 = vrot.slane %v2522_v46, 2 }
  0x27   : > { %2145 = vmatpush3.bf16.msra.mxu1 %v2310_v26  ;;  %2146 = vmatprep.mubr.msk.bf16.mxu1 %vm2384_vm0, %v2383_v1  ;;  %v2569_v18 = vsel %vm382_vm2, %v1642_v9, %v1650_v14  ;;  %v1014_v24 = vor.u32 %v1013_v21, %v1012_v20  ;;  %v2317_v26 = vld [vmem:[%s2712_s1 + $0x60] sm:$0xff]   ;;  %v1269_v39 = vrot.slane %v2326_v35, 1  ;;  %v1330_v48 = vshrl.u32 %v2326_v35, 16 }
  0x28   : > { %2156 = vmatprep.subr.bf16.mxu1 %v2383_v1  ;;  %v1022_v25 = vor.u32 %v1021_v23, %v1018_v22  ;;  %v956_v31 = vsel %vm323_vm3, %v954_v29, %v955_v30  ;;  %v1333_v49 = vshll.u32 %v2326_v35, 16  ;;  %v1522_v0 = vrot.slane %v1520_v52, 1  ;;  %v2334_v52 = vld [vmem:[%s2712_s1 + $0xc0] sm:$0xff]  }
  0x2a   : > { %v1023_v27 = vsel %vm382_vm2, %v1014_v24, %v1022_v25  ;;  %v1523_v4 = vor.u32 %v1522_v0, %v1518_v51  ;;  %v2331_v51 = vld [vmem:[%s2712_s1 + $0xb0] sm:$0xff]  }
  0x2c   : > { %2129 = vmatmul.mubr.msk.bf16.vlgmr.msra.gmra.mrb[8].mxu0 %vm223_vm1, %v453_v33  ;;  %v2323_v33 = vld [vmem:[%s2462_s28 + $0x24] sm:$0xff]   ;;  %s2387_s28 = smov 126  }
  0x2d   : > { %2139 = vmatpush3.bf16.msra.mxu0 %v2308_v34  ;;  %2140 = vmatprep.mubr.msk.bf16.mxu0 %vm2384_vm0, %v2383_v1  ;;  %v2324_v34 = vld [vmem:[%s2712_s1 + $0x88] sm:$0xff]   ;;  %v1206_v40 = vshll.u32 %v2323_v33, 16 }
  0x2e   : > { %2150 = vmatprep.subr.bf16.mxu0 %v2383_v1  ;;  %2147 = vmatmul.mubr.msk.bf16.vlgmr.msra.gmra.mrb[12].mxu1 %vm223_vm1, %v642_v37  ;;  %v1080_v37 = vrot.slane %v2542_v59, 2  ;;  %v1335_v59 = vrot.slane %v1333_v49, 2 }
  0x2f   : > { %2157 = vmatpush3.bf16.msra.mxu1 %v2313_v38  ;;  %2158 = vmatprep.mubr.msk.bf16.mxu1 %vm2384_vm0, %v2383_v1  ;;  %v1268_v38 = vrot.slane %v2323_v33, 1  ;;  %v1327_v57 = vrot.slane %v1206_v40, 2 }
  0x30   : > { %2168 = vmatprep.subr.bf16.mxu1 %v2383_v1  ;;  %v1081_v41 = vsel %vm450_vm4, %v1079_v36, %v1080_v37 }
  0x31   : > { %v1270_v43 = vsel %vm323_vm3, %v1268_v38, %v1269_v39 }
  0x34   : > { %2141 = vmatmul.mubr.msk.bf16.vlgmr.msra.gmra.mrb[12].mxu0 %vm223_vm1, %v581_v50  ;;  %v1393_v50 = vrot.slane %v2323_v33, 2 }
  0x35   : > { %2151 = vmatpush3.bf16.msra.mxu0 %v2311_v47  ;;  %2152 = vmatprep.mubr.msk.bf16.mxu0 %vm2384_vm0, %v2383_v1  ;;  %v1208_v47 = vrot.slane %v1206_v40, 1 }
  0x36   : > { %2162 = vmatprep.subr.bf16.mxu0 %v2383_v1  ;;  %2159 = vmatmul.mubr.msk.bf16.vlgmr.msra.gmra.mrb[16].mxu1 %vm223_vm1, %v767_v58  ;;  %v1332_v58 = vrot.slane %v1330_v48, 1 }
  0x37   : > { %2169 = vmatpush3.bf16.msra.mxu1 %v2315_v53  ;;  %2170 = vmatprep.mubr.msk.bf16.mxu1 %vm2384_vm0, %v2383_v1  ;;  %v1394_v53 = vrot.slane %v2326_v35, 2 }
  0x38   : > { %2180 = vmatprep.subr.bf16.mxu1 %v2383_v1  ;;  %v1336_v63 = vor.u32 %v1335_v59, %v1332_v58 }
  0x39   : > { %v1395_v60 = vsel %vm450_vm4, %v1393_v50, %v1394_v53 }
  0x3c   : > { %2153 = vmatmul.mubr.msk.bf16.vlgmr.msra.gmra.mrb[16].mxu0 %vm223_vm1, %v709_v15 }
  0x3d   : > { %2163 = vmatpush3.bf16.msra.mxu0 %v2314_v16  ;;  %2164 = vmatprep.mubr.msk.bf16.mxu0 %vm2384_vm0, %v2383_v1 }
  0x3e   : > { %2174 = vmatprep.subr.bf16.mxu0 %v2383_v1  ;;  %2171 = vmatmul.mubr.msk.bf16.vlgmr.msra.gmra.mrb[20].mxu1 %vm223_vm1, %v895_v17 }
  0x3f   : > { %2181 = vmatpush3.bf16.msra.mxu1 %v2318_v19  ;;  %2182 = vmatprep.mubr.msk.bf16.mxu1 %vm2384_vm0, %v2383_v1 }
  0x40   : > { %2192 = vmatprep.subr.bf16.mxu1 %v2383_v1 }
  0x44   : > { %2165 = vmatmul.mubr.msk.bf16.vlgmr.msra.gmra.mrb[20].mxu0 %vm223_vm1, %v2522_v46  ;;  %v1204_v46 = vshrl.u32 %v2323_v33, 16 }
  0x45   : > { %2175 = vmatpush3.bf16.msra.mxu0 %v2317_v26  ;;  %2176 = vmatprep.mubr.msk.bf16.mxu0 %vm2384_vm0, %v2383_v1 }
  0x46   : > { %2186 = vmatprep.subr.bf16.mxu0 %v2383_v1  ;;  %2183 = vmatmul.mubr.msk.bf16.vlgmr.msra.gmra.mrb[24].mxu1 %vm223_vm1, %v1023_v27  ;;  %v1209_v54 = vor.u32 %v1208_v47, %v1204_v46  ;;  %v1326_v56 = vrot.slane %v1204_v46, 1 }
  0x47   : > { %2193 = vmatpush3.bf16.msra.mxu1 %v2321_v28  ;;  %2194 = vmatprep.mubr.msk.bf16.mxu1 %vm2384_vm0, %v2383_v1 }
  0x48   : > { %2204 = vmatprep.subr.bf16.mxu1 %v2383_v1  ;;  %v1328_v62 = vor.u32 %v1327_v57, %v1326_v56 }
  0x4a   : > { %v1337_v2 = vsel %vm382_vm2, %v1328_v62, %v1336_v63 }
  0x4c   : > { %2177 = vmatmul.mubr.msk.bf16.vlgmr.msra.gmra.mrb[24].mxu0 %vm223_vm1, %v956_v31 }
  0x4d   : > { %2187 = vmatpush3.bf16.msra.mxu0 %v2320_v32  ;;  %2188 = vmatprep.mubr.msk.bf16.mxu0 %vm2384_vm0, %v2383_v1 }
  0x4e   : > { %2198 = vmatprep.subr.bf16.mxu0 %v2383_v1  ;;  %2195 = vmatmul.mubr.msk.bf16.vlgmr.msra.gmra.mrb[28].mxu1 %vm223_vm1, %v2323_v33 }
  0x4f   : > { %2205 = vmatpush3.bf16.msra.mxu1 %v2324_v34  ;;  %2206 = vmatprep.mubr.msk.bf16.mxu1 %vm2384_vm0, %v2383_v1 }
  0x50   : > { %2216 = vmatprep.subr.bf16.mxu1 %v2383_v1 }
  0x54   : > { %2189 = vmatmul.mubr.msk.bf16.vlgmr.msra.gmra.mrb[28].mxu0 %vm223_vm1, %v1081_v41 }
  0x55   : > { %2199 = vmatpush3.bf16.msra.mxu0 %v2322_v42  ;;  %2200 = vmatprep.mubr.msk.bf16.mxu0 %vm2384_vm0, %v2383_v1 }
  0x56   : > { %2210 = vmatprep.subr.bf16.mxu0 %v2383_v1  ;;  %2207 = vmatmul.mubr.msk.bf16.vlgmr.msra.gmra.mrb[32].mxu1 %vm223_vm1, %v1270_v43 }
  0x57   : > { %2217 = vmatpush3.bf16.msra.mxu1 %v2327_v45  ;;  %2218 = vmatprep.mubr.msk.bf16.mxu1 %vm2384_vm0, %v2383_v1 }
  0x58   : > { %2228 = vmatprep.subr.bf16.mxu1 %v2383_v1 }
  0x5c   : > { %2201 = vmatmul.mubr.msk.bf16.vlgmr.msra.gmra.mrb[32].mxu0 %vm223_vm1, %v1209_v54 }
  0x5d   : > { %2211 = vmatpush3.bf16.msra.mxu0 %v2325_v55  ;;  %2212 = vmatprep.mubr.msk.bf16.mxu0 %vm2384_vm0, %v2383_v1 }
  0x5e   : > { %2222 = vmatprep.subr.bf16.mxu0 %v2383_v1  ;;  %2219 = vmatmul.mubr.msk.bf16.vlgmr.msra.gmra.mrb[36].mxu1 %vm223_vm1, %v1395_v60 }
  0x5f   : > { %2229 = vmatpush3.bf16.msra.mxu1 %v2329_v61  ;;  %2230 = vmatprep.mubr.msk.bf16.mxu1 %vm2384_vm0, %v2383_v1 }
  0x60   : > { %2240 = vmatprep.subr.bf16.mxu1 %v2383_v1 }
  0x64   : > { %2213 = vmatmul.mubr.msk.bf16.vlgmr.msra.gmra.mrb[36].mxu0 %vm223_vm1, %v1337_v2 }
  0x65   : > { %2223 = vmatpush3.bf16.msra.mxu0 %v2328_v3  ;;  %2224 = vmatprep.mubr.msk.bf16.mxu0 %vm2384_vm0, %v2383_v1 }
  0x66   : > { %2234 = vmatprep.subr.bf16.mxu0 %v2383_v1  ;;  %2231 = vmatmul.mubr.msk.bf16.vlgmr.msra.gmra.mrb[40].mxu1 %vm223_vm1, %v1523_v4 }
  0x67   : > { %2241 = vmatpush3.bf16.msra.mxu1 %v2332_v5  ;;  %2242 = vmatprep.mubr.msk.bf16.mxu1 %vm2384_vm0, %v2383_v1 }
  0x6c   : > { %2225 = vmatmul.mubr.msk.bf16.vlgmr.msra.gmra.mrb[40].mxu0 %vm223_vm1, %v2517_v44 }
  0x6d   : > { %2235 = vmatpush3.bf16.msra.mxu0 %v2331_v51  ;;  %2236 = vmatprep.mubr.msk.bf16.mxu0 %vm2384_vm0, %v2383_v1 }
  0x6e   : > { %2246 = vmatprep.subr.bf16.mxu0 %v2383_v1  ;;  %2243 = vmatmul.mubr.msk.bf16.vlgmr.msra.gmra.mrb[44].mxu1 %vm223_vm1, %v2569_v18 }
  0x74   : > { %2237 = vmatmul.mubr.msk.bf16.vlgmr.msra.gmra.mrb[44].mxu0 %vm223_vm1, %v2552_v6 }
  0x75   : > { %2247 = vmatpush3.bf16.msra.mxu0 %v2334_v52  ;;  %2248 = vmatprep.mubr.msk.bf16.mxu0 %vm2384_vm0, %v2383_v1 }
  0x7c   : > { %2249 = vmatmul.mubr.msk.bf16.vlgmr.msra.gmra.mrb[48].mxu0 %vm223_vm1, %v2557_v11 }
  0xe9   : > { %v310_v44 = vpop.f32.mrb[0].mxu1 }
  0xea   : > { %v2112_v7 = vpop.f32.mrb[1].mxu1 }
  0xeb   : > { %v313_v8 = vpop.f32.mrb[2].mxu1 }
  0xec   : > { %v2113_v9 = vpop.f32.mrb[3].mxu1 }
  0xef   : > { %v261_v10 = vpop.f32.mrb[0].mxu0 }
  0xf0   : > { %v311_v12 = vadd.f32 %v310_v44, %v261_v10  ;;  %v2106_v13 = vpop.f32.mrb[1].mxu0 }
  0xf1   : > { %v264_v14 = vpop.f32.mrb[2].mxu0  ;;  %v438_v15 = vpop.f32.mrb[4].mxu1 }
  0xf2   : > { %v314_v16 = vadd.f32 %v313_v8, %v264_v14  ;;  %v2107_v17 = vpop.f32.mrb[3].mxu0  ;;  %v2124_v18 = vpop.f32.mrb[5].mxu1 }
  0xf3   : > { %v441_v6 = vpop.f32.mrb[6].mxu1 }
  0xf4   : > { %v2125_v19 = vpop.f32.mrb[7].mxu1 }
  0xf7   : > { %v370_v20 = vpop.f32.mrb[4].mxu0 }
  0xf8   : > { %v377_v21 = vadd.f32 %v370_v20, %v311_v12  ;;  %v2118_v1 = vpop.f32.mrb[5].mxu0 }
  0xf9   : > { %v373_v22 = vpop.f32.mrb[6].mxu0  ;;  %v564_v23 = vpop.f32.mrb[8].mxu1 }
  0xfa   : > { %v378_v11 = vadd.f32 %v373_v22, %v314_v16  ;;  %v445_v24 = vadd.f32 %v438_v15, %v377_v21  ;;  %v2119_v25 = vpop.f32.mrb[7].mxu0  ;;  %v2136_v26 = vpop.f32.mrb[9].mxu1 }
  0xfb   : > { %v567_v27 = vpop.f32.mrb[10].mxu1 }
  0xfc   : > { %v446_v28 = vadd.f32 %v441_v6, %v378_v11  ;;  %v2137_v29 = vpop.f32.mrb[11].mxu1 }
  0xff   : > { %v497_v30 = vpop.f32.mrb[8].mxu0 }
 0x100   : > { %v504_v31 = vadd.f32 %v497_v30, %v445_v24  ;;  %v2130_v32 = vpop.f32.mrb[9].mxu0 }
 0x101   : > { %v500_v33 = vpop.f32.mrb[10].mxu0  ;;  %v686_v34 = vpop.f32.mrb[12].mxu1 }
 0x102   : > { %v505_v35 = vadd.f32 %v500_v33, %v446_v28  ;;  %v571_v36 = vadd.f32 %v564_v23, %v504_v31  ;;  %v2131_v37 = vpop.f32.mrb[11].mxu0  ;;  %v2148_v38 = vpop.f32.mrb[13].mxu1 }
 0x103   : > { %v689_v39 = vpop.f32.mrb[14].mxu1 }
 0x104   : > { %v572_v40 = vadd.f32 %v567_v27, %v505_v35  ;;  %v2149_v41 = vpop.f32.mrb[15].mxu1 }
 0x107   : > { %v625_v42 = vpop.f32.mrb[12].mxu0 }
 0x108   : > { %v632_v43 = vadd.f32 %v625_v42, %v571_v36  ;;  %v2142_v45 = vpop.f32.mrb[13].mxu0 }
 0x109   : > { %v628_v46 = vpop.f32.mrb[14].mxu0  ;;  %v811_v47 = vpop.f32.mrb[16].mxu1 }
 0x10a   : > { %v633_v48 = vadd.f32 %v628_v46, %v572_v40  ;;  %v693_v49 = vadd.f32 %v686_v34, %v632_v43  ;;  %v2143_v50 = vpop.f32.mrb[15].mxu0  ;;  %v2160_v53 = vpop.f32.mrb[17].mxu1 }
 0x10b   : > { %v814_v54 = vpop.f32.mrb[18].mxu1 }
 0x10c   : > { %v694_v55 = vadd.f32 %v689_v39, %v633_v48  ;;  %v2161_v56 = vpop.f32.mrb[19].mxu1 }
 0x10f   : > { %v753_v57 = vpop.f32.mrb[16].mxu0 }
 0x110   : > { %v760_v58 = vadd.f32 %v753_v57, %v693_v49  ;;  %v2154_v59 = vpop.f32.mrb[17].mxu0 }
 0x111   : > { %v756_v60 = vpop.f32.mrb[18].mxu0  ;;  %v939_v61 = vpop.f32.mrb[20].mxu1 }
 0x112   : > { %v761_v62 = vadd.f32 %v756_v60, %v694_v55  ;;  %v818_v63 = vadd.f32 %v811_v47, %v760_v58  ;;  %v2155_v0 = vpop.f32.mrb[19].mxu0  ;;  %v2172_v2 = vpop.f32.mrb[21].mxu1 }
 0x113   : > { %v942_v3 = vpop.f32.mrb[22].mxu1 }
 0x114   : > { %v819_v4 = vadd.f32 %v814_v54, %v761_v62  ;;  %v2173_v5 = vpop.f32.mrb[23].mxu1 }
 0x117   : > { %v878_v51 = vpop.f32.mrb[20].mxu0 }
 0x118   : > { %v885_v52 = vadd.f32 %v878_v51, %v818_v63  ;;  %v2166_v44 = vpop.f32.mrb[21].mxu0 }
 0x119   : > { %v881_v7 = vpop.f32.mrb[22].mxu0  ;;  %v1067_v8 = vpop.f32.mrb[24].mxu1 }
 0x11a   : > { %v886_v9 = vadd.f32 %v881_v7, %v819_v4  ;;  %v946_v10 = vadd.f32 %v939_v61, %v885_v52  ;;  %v2167_v12 = vpop.f32.mrb[23].mxu0  ;;  %v2184_v13 = vpop.f32.mrb[25].mxu1 }
 0x11b   : > { %v1070_v14 = vpop.f32.mrb[26].mxu1 }
 0x11c   : > { %v947_v15 = vadd.f32 %v942_v3, %v886_v9  ;;  %v2185_v16 = vpop.f32.mrb[27].mxu1 }
 0x11f   : > { %v1000_v17 = vpop.f32.mrb[24].mxu0 }
 0x120   : > { %v1007_v18 = vadd.f32 %v1000_v17, %v946_v10  ;;  %v2178_v6 = vpop.f32.mrb[25].mxu0 }
 0x121   : > { %v1003_v19 = vpop.f32.mrb[26].mxu0  ;;  %v1192_v20 = vpop.f32.mrb[28].mxu1 }
 0x122   : > { %v1008_v21 = vadd.f32 %v1003_v19, %v947_v15  ;;  %v1074_v1 = vadd.f32 %v1067_v8, %v1007_v18  ;;  %v2179_v22 = vpop.f32.mrb[27].mxu0  ;;  %v2196_v23 = vpop.f32.mrb[29].mxu1 }
 0x123   : > { %v1195_v11 = vpop.f32.mrb[30].mxu1 }
 0x124   : > { %v1075_v24 = vadd.f32 %v1070_v14, %v1008_v21  ;;  %v2197_v25 = vpop.f32.mrb[31].mxu1  ;;  %v2048_v21 = vld [vmem:[%s2713_s2] ss:$0 sm:$0xff] }
 0x127   : > { %v1125_v26 = vpop.f32.mrb[28].mxu0 }
 0x128   : > { %v1132_v27 = vadd.f32 %v1125_v26, %v1074_v1  ;;  %v2190_v28 = vpop.f32.mrb[29].mxu0 }
 0x129   : > { %v1128_v29 = vpop.f32.mrb[30].mxu0  ;;  %v1314_v30 = vpop.f32.mrb[32].mxu1 }
 0x12a   : > { %v1133_v31 = vadd.f32 %v1128_v29, %v1075_v24  ;;  %v1199_v32 = vadd.f32 %v1192_v20, %v1132_v27  ;;  %v2191_v33 = vpop.f32.mrb[31].mxu0  ;;  %v2208_v34 = vpop.f32.mrb[33].mxu1 }
 0x12b   : > { %v1317_v35 = vpop.f32.mrb[34].mxu1 }
 0x12c   : > { %v1200_v36 = vadd.f32 %v1195_v11, %v1133_v31  ;;  %v2209_v37 = vpop.f32.mrb[35].mxu1 }
 0x12f   : > { %v1253_v38 = vpop.f32.mrb[32].mxu0 }
 0x130   : > { %v1260_v39 = vadd.f32 %v1253_v38, %v1199_v32  ;;  %v2202_v40 = vpop.f32.mrb[33].mxu0 }
 0x131   : > { %v1256_v41 = vpop.f32.mrb[34].mxu0  ;;  %v1439_v42 = vpop.f32.mrb[36].mxu1 }
 0x132   : > { %v1261_v43 = vadd.f32 %v1256_v41, %v1200_v36  ;;  %v1321_v45 = vadd.f32 %v1314_v30, %v1260_v39  ;;  %v2203_v46 = vpop.f32.mrb[35].mxu0  ;;  %v2220_v47 = vpop.f32.mrb[37].mxu1 }
 0x133   : > { %v1442_v48 = vpop.f32.mrb[38].mxu1 }
 0x134   : > { %v1322_v49 = vadd.f32 %v1317_v35, %v1261_v43  ;;  %v2221_v50 = vpop.f32.mrb[39].mxu1 }
 0x137   : > { %v1381_v53 = vpop.f32.mrb[36].mxu0 }
 0x138   : > { %v1388_v54 = vadd.f32 %v1381_v53, %v1321_v45  ;;  %v2214_v55 = vpop.f32.mrb[37].mxu0 }
 0x139   : > { %v1384_v56 = vpop.f32.mrb[38].mxu0  ;;  %v1567_v57 = vpop.f32.mrb[40].mxu1 }
 0x13a   : > { %v1389_v58 = vadd.f32 %v1384_v56, %v1322_v49  ;;  %v1446_v59 = vadd.f32 %v1439_v42, %v1388_v54  ;;  %v2215_v60 = vpop.f32.mrb[39].mxu0  ;;  %v2232_v61 = vpop.f32.mrb[41].mxu1 }
 0x13b   : > { %v1570_v62 = vpop.f32.mrb[42].mxu1 }
 0x13c   : > { %v1447_v63 = vadd.f32 %v1442_v48, %v1389_v58  ;;  %v2233_v0 = vpop.f32.mrb[43].mxu1 }
 0x13f   : > { %v1506_v2 = vpop.f32.mrb[40].mxu0 }
 0x140   : > { %v1513_v3 = vadd.f32 %v1506_v2, %v1446_v59  ;;  %v2226_v4 = vpop.f32.mrb[41].mxu0 }
 0x141   : > { %v1509_v5 = vpop.f32.mrb[42].mxu0  ;;  %v1695_v51 = vpop.f32.mrb[44].mxu1 }
 0x142   : > { %v1514_v52 = vadd.f32 %v1509_v5, %v1447_v63  ;;  %v1574_v44 = vadd.f32 %v1567_v57, %v1513_v3  ;;  %v2227_v7 = vpop.f32.mrb[43].mxu0  ;;  %v2244_v8 = vpop.f32.mrb[45].mxu1 }
 0x143   : > { %v1698_v9 = vpop.f32.mrb[46].mxu1 }
 0x144   : > { %v1575_v10 = vadd.f32 %v1570_v62, %v1514_v52  ;;  %v2245_v12 = vpop.f32.mrb[47].mxu1 }
 0x147   : > { %v1628_v13 = vpop.f32.mrb[44].mxu0 }
 0x148   : > { %v1635_v14 = vadd.f32 %v1628_v13, %v1574_v44  ;;  %v2238_v15 = vpop.f32.mrb[45].mxu0 }
 0x149   : > { %v1631_v16 = vpop.f32.mrb[46].mxu0 }
 0x14a   : > { %v1636_v17 = vadd.f32 %v1631_v16, %v1575_v10  ;;  %v1702_v18 = vadd.f32 %v1695_v51, %v1635_v14  ;;  %v2239_v6 = vpop.f32.mrb[47].mxu0 }
 0x14c   : > { %v1703_v19 = vadd.f32 %v1698_v9, %v1636_v17 }
 0x14f   : > { %v1753_v20 = vpop.f32.mrb[48].mxu0 }
 0x150   : > { %v1760_v1 = vadd.f32 %v1753_v20, %v1702_v18  ;;  %v2250_v22 = vpop.f32.mrb[49].mxu0 }
 0x151   : > { %v1756_v23 = vpop.f32.mrb[50].mxu0 }
 0x152   : > { %v1769_v11 = vadd.f32 %v2048_v21, %v1760_v1  ;;  %v1761_v24 = vadd.f32 %v1756_v23, %v1703_v19  ;;  %v2251_v25 = vpop.f32.mrb[51].mxu0 }
 0x154   : > { %v1771_v26 = vmax.f32 %v1769_v11, 0.0  ;;  %v1770_v27 = vadd.f32 %v2048_v21, %v1761_v24 }
 0x156   : > { %v1773_v28 = vmul.f32 %v1771_v26, %v1771_v26  ;;  %v1772_v29 = vmax.f32 %v1770_v27, 0.0 }
 0x158   : > { %1781 = vrot.lane.b32.xlu1 %v1773_v28, %s2385_s11  ;;  %1775 = vrot.lane.b32.xlu0 %v1773_v28, %s2386_s19  ;;  %v1774_v30 = vmul.f32 %v1772_v29, %v1772_v29 }
 0x15c   : > { %1783 = vrot.lane.b32.xlu1 %v1774_v30, %s2385_s11  ;;  %1777 = vrot.lane.b32.xlu0 %v1774_v30, %s2386_s19 }
 0x160   : > { %1789 = vrot.lane.b32.xlu1 %v1774_v30, %s2387_s28  ;;  %1787 = vrot.lane.b32.xlu0 %v1773_v28, %s2387_s28 }
 0x164   : > { %1795 = vrot.lane.b32.xlu1 %v1774_v30, %s2388_s20  ;;  %1793 = vrot.lane.b32.xlu0 %v1773_v28, %s2388_s20 }
 0x1ca   : > { %v1782_v31 = vpop.permute.xlu1 %1781  ;;  %v1776_v32 = vpop.permute.xlu0 %1775 }
 0x1cb   : > { %v1779_v35 = vadd.f32 %v1776_v32, %v1773_v28 }
 0x1cd   : > { %v1785_v40 = vadd.f32 %v1782_v31, %v1779_v35 }
 0x1ce   : > { %v1784_v33 = vpop.permute.xlu1 %1783  ;;  %v1778_v34 = vpop.permute.xlu0 %1777 }
 0x1cf   : > { %v1780_v36 = vadd.f32 %v1778_v34, %v1774_v30 }
 0x1d1   : > { %v1786_v37 = vadd.f32 %v1784_v33, %v1780_v36 }
 0x1d2   : > { %v1790_v38 = vpop.permute.xlu1 %1789  ;;  %v1788_v39 = vpop.permute.xlu0 %1787 }
 0x1d3   : > { %v1792_v41 = vadd.f32 %v1790_v38, %v1786_v37  ;;  %v1791_v42 = vadd.f32 %v1788_v39, %v1785_v40 }
 0x1d6   : > { %v1796_v43 = vpop.permute.xlu1 %1795  ;;  %v1794_v45 = vpop.permute.xlu0 %1793 }
 0x1d7   : > { %v1798_v46 = vadd.f32 %v1796_v43, %v1792_v41  ;;  %v1797_v47 = vadd.f32 %v1794_v45, %v1791_v42 }
 0x1d9   : > { %v1800_v48 = vmul.f32 2e-05, %v1798_v46  ;;  %v1799_v49 = vmul.f32 2e-05, %v1797_v47 }
 0x1db   : > { %v1802_v50 = vadd.f32 2.0, %v1800_v48  ;;  %v1801_v53 = vadd.f32 2.0, %v1799_v49 }
 0x1dd   : > { %2335 = vlog2.f32 %v1802_v50 }
 0x1de   : > { %2337 = vlog2.f32 %v1801_v53 }
 0x1e7   : > { %v2336_v54 = vpop.eup %2335 }
 0x1e8   : > { %v2338_v55 = vpop.eup %2337  ;;  %v1806_v56 = vmul.f32 0.6931472, %v2336_v54 }
 0x1e9   : > { %v1804_v57 = vmul.f32 0.6931472, %v2338_v55 }
 0x1ea   : > { %v1808_v58 = vmul.f32 -0.75, %v1806_v56 }
 0x1eb   : > { %v1807_v59 = vmul.f32 -0.75, %v1804_v57 }
 0x1ec   : > { %v1811_v60 = vmul.f32 1.442695, %v1808_v58 }
 0x1ed   : > { %v1809_v61 = vmul.f32 1.442695, %v1807_v59 }
 0x1ee   : > { %2339 = vpow2.f32 %v1811_v60 }
 0x1ef   : > { %2341 = vpow2.f32 %v1809_v61 }
 0x1f8   : > { %v2340_v62 = vpop.eup %2339 }
 0x1f9   : > { %v2342_v63 = vpop.eup %2341  ;;  %v1814_v0 = vmul.f32 %v2340_v62, %v1772_v29 }
 0x1fa   : > { %v1813_v2 = vmul.f32 %v2342_v63, %v1771_v26 }
 0x1fb   : > { %1818 = vst.msk [vmem:[%s192_s27 + $0x8] sm:$0x7f] %vm1817_vm5, %v1814_v0 }
 0x1fc   : > { %1816 = vst.msk [vmem:[%s192_s27] sm:$0xff] %vm1815_vm6, %v1813_v2 }
 0x1fd PF: > { %s13_s16 = sadd.s32 1, %s2381_s16   ;;  %s2715_s12 = smov %s2373_s14 }
 0x1fe   : > { %p10_p7 = scmp.ge.s32.totalorder %s13_s16, 32   ;;  %s2716_s13 = smov %s2377_s15 }
 0x1ff   : > { %s2717_s14 = smov %s2720_s17  ;;  %s2718_s15 = smov %s2724_s18 }
 0x200   :  { %12 = sbr.rel (!%p10_p7) target bundleno = 3 (0x3), region = 91 }

// kernel: alexnet_forward.13
= control target key start
LH: loop header
LB: loop body
LE: loop exit
PB: predicated region body
PF: predicated region fallthrough
CT: control target
= control target key end

     0   :  { %s1210_s12 = smov 0   ;;  %s1212_s13 = smov 0   ;;  %s1384_s0 = inlined_call_operand.vmem [shape: bf16[2,9,9,32], index: 0, kind: input, shape index: {}]   ;;  %s1385_s1 = inlined_call_operand.vmem [shape: bf16[3,3,32,128], index: 1, kind: input, shape index: {}]   ;;  %s1386_s2 = inlined_call_operand.vmem [shape: f32[1,128], index: 2, kind: input, shape index: {}]   ;;  %s1387_s3 = inlined_call_operand.vmem [shape: f32[2,7,7,48], index: 3, kind: output, shape index: {}]  }
   0x1   :  { %s1214_s14 = smov 0   ;;  %s1216_s15 = smov 0  }
   0x2   :  { %s1218_s16 = smov 0  }
   0x3 LB: > { %s22_s17 = sadd.s32 1, %s1178_s14  ;;  %s25_s18 = sadd.s32 1, %s1182_s15  ;;  %s1186_s16 = sphi %s1218_s16, %s13_s16   ;;  %s1182_s15 = sphi %s1216_s15, %s1391_s15   ;;  %s1178_s14 = sphi %s1214_s14, %s1390_s14   ;;  %s1174_s13 = sphi %s1212_s13, %s1389_s13   ;;  %s1170_s12 = sphi %s1210_s12, %s1388_s12  }
   0x4   : > { %p23_p0 = scmp.ge.s32.totalorder %s22_s17, 7  ;;  %p901_p1 = scmp.ge.s32.totalorder %s1186_s16, 1 }
   0x5   : > { %p151_p2 = scmp.lt.s32.totalorder %s1186_s16, 15 }
   0x6   : > { %s1393_s17 = smov (%p23_p0, %s22_s17), 0  ;;  %s1395_s18 = smov (!%p23_p0, %s25_s18), %s1182_s15 }
   0x7   : > { %p152_p3 = pnand %p901_p1, %p151_p2  ;;  %p27_p4 = scmp.ge.s32.totalorder %s1395_s18, 2 }
   0x8   : > { %v1124_v0 = vld [vmem:[%s1385_s1 + $0x10] sm:$0xff] (!%p152_p3)   ;;  %v1188_v1 = vmov (!%p152_p3), 0.0   ;;  %v1125_v2 = vld [vmem:[%s1385_s1] sm:$0xff] (!%p152_p3)   ;;  %v1126_v3 = vld [vmem:[%s1385_s1 + $0x18] sm:$0xff] (!%p152_p3)   ;;  %vm1189_vm0 = vmmov (!%p152_p3), 0   ;;  %p178_p5 = scmp.lt.s32.totalorder (!%p152_p3), %s1174_s13, 1 }
   0x9   : > { %s1397_s18 = smov (%p27_p4, %s1395_s18), 0  ;;  %155 = sbr.rel (%p152_p3) target bundleno = 281 (0x119), region = 32 }
   0xa   : > { %1008 = vmatprep.subr.bf16.mxu0 (!%p152_p3), %v1188_v1  ;;  %1016 = vmatprep.subr.bf16.mxu1 (!%p152_p3), %v1188_v1  ;;  %v1127_v4 = vld [vmem:[%s1385_s1 + $0x8] sm:$0xff] (!%p152_p3)   ;;  %s980_s28 = sshll.u32 (!%p152_p3), %s1170_s12, 3  ;;  %vm228_vm1 = vcmask (!%p152_p3), 261120   ;;  %v1130_v5 = vld [vmem:[%s1385_s1 + $0x30] sm:$0xff] (!%p152_p3)   ;;  %v1132_v8 = vld [vmem:[%s1385_s1 + $0x38] sm:$0xff] (!%p152_p3)   ;;  %p185_p6 = scmp.lt.s32.totalorder (!%p152_p3), %s1170_s12, 6 }
   0xb   : > { %1009 = vmatpush3.bf16.msra.mxu0 (!%p152_p3), %v1124_v0  ;;  %1012 = vmatprep.mubr.msk.bf16.mxu0 (!%p152_p3), %vm1189_vm0, %v1188_v1  ;;  %v1129_v14 = vld [vmem:[%s1385_s1 + $0x20] sm:$0xff] (!%p152_p3)   ;;  %v1137_v15 = vld [vmem:[%s1385_s1 + $0x50] sm:$0xff] (!%p152_p3)   ;;  %v1131_v21 = vld [vmem:[%s1385_s1 + $0x28] sm:$0xff] (!%p152_p3)   ;;  %vm807_vm2 = vcmask (!%p152_p3), 391168  }
   0xc   : > { %1017 = vmatpush3.bf16.msra.mxu1 (!%p152_p3), %v1125_v2  ;;  %1010 = vmatprep.subr.bf16.mxu0 (!%p152_p3), %v1188_v1  ;;  %v1139_v23 = vld [vmem:[%s1385_s1 + $0x58] sm:$0xff] (!%p152_p3)   ;;  %v1134_v27 = vld [vmem:[%s1385_s1 + $0x40] sm:$0xff] (!%p152_p3)   ;;  %v1141_v30 = vld [vmem:[%s1385_s1 + $0x70] sm:$0xff] (!%p152_p3)  }
   0xd   : > { %1018 = vmatprep.subr.bf16.mxu1 (!%p152_p3), %v1188_v1  ;;  %1020 = vmatprep.mubr.msk.bf16.mxu1 (!%p152_p3), %vm1189_vm0, %v1188_v1  ;;  %v1138_v33 = vld [vmem:[%s1385_s1 + $0x48] sm:$0xff] (!%p152_p3)   ;;  %v1143_v36 = vld [vmem:[%s1385_s1 + $0x78] sm:$0xff] (!%p152_p3)   ;;  %v1140_v38 = vld [vmem:[%s1385_s1 + $0x60] sm:$0xff] (!%p152_p3)  }
   0xe   : > { %v1142_v40 = vld [vmem:[%s1385_s1 + $0x68] sm:$0xff] (!%p152_p3)   ;;  %v1146_v42 = vld [vmem:[%s1385_s1 + $0x80] sm:$0xff] (!%p152_p3)  }
   0xf   : > { %1011 = vmatpush3.bf16.msra.mxu0 (!%p152_p3), %v1126_v3  ;;  %v1147_v44 = vld [vmem:[%s1385_s1 + $0x88] sm:$0xff] (!%p152_p3)  }
  0x10   : > { %s1399_s13 = smov (!%p178_p5, %s1174_s13), 1  ;;  %1019 = vmatpush3.bf16.msra.mxu1 %v1127_v4  ;;  %1024 = vmatprep.subr.bf16.mxu0 %v1188_v1  ;;  %s1401_s12 = smov (!%p185_p6, %s1170_s12), 6 }
  0x11   : > { %s1080_s27 = smul.u32 72, %s1399_s13  ;;  %1032 = vmatprep.subr.bf16.mxu1 %v1188_v1 }
  0x13   : > { %s182_s4 = scalar_lea.vmem %s1384_s0, %s1080_s27 }
  0x14   : > { %s1278_s7 = scalar_lea.vmem %s182_s4, %s980_s28 }
  0x15   : > { %v195_v6 = vld [vmem:[%s1278_s7] sm:$0xf]  ;;  %v196_v11 = vld [vmem:[%s1278_s7 + $0x4] sm:$0x1]  ;;  %v926_v12 = vld [vmem:[%s1278_s7 + $0x8] sm:$0xf] }
  0x16   : > { %v910_v7 = vcombine.low %v195_v6, %v195_v6  ;;  %1021 = vmatmul.mubr.msk.bf16.vlgmr.msra.gmra.mrb[0].mxu1 %vm228_vm1, %v195_v6  ;;  %v927_v17 = vld [vmem:[%s1278_s7 + $0xc] sm:$0x1]  ;;  %v952_v18 = vld [vmem:[%s1278_s7 + $0x10] sm:$0xf]  ;;  %v921_v19 = vcombine.low %v195_v6, %v196_v11  ;;  %v939_v20 = vcombine.low %v926_v12, %v926_v12  ;;  %v953_v41 = vld [vmem:[%s1278_s7 + $0x14] sm:$0x1] }
  0x17   : > { %1033 = vmatpush3.bf16.msra.mxu1 %v1130_v5  ;;  %1036 = vmatprep.mubr.msk.bf16.mxu1 %vm1189_vm0, %v1188_v1  ;;  %v947_v22 = vcombine.low %v926_v12, %v927_v17  ;;  %v965_v24 = vcombine.low %v952_v18, %v952_v18  ;;  %v973_v43 = vcombine.low %v952_v18, %v953_v41  ;;  %s1081_s7 = smul.u32 7, %s1399_s13 }
  0x18   : > { %v210_v9 = vshrl.u32 %v910_v7, 16  ;;  %v212_v10 = vshll.u32 %v910_v7, 16  ;;  %1034 = vmatprep.subr.bf16.mxu1 %v1188_v1  ;;  %v335_v25 = vrot.slane %v921_v19, 1  ;;  %v470_v26 = vshll.u32 %v939_v20, 16 }
  0x19   : > { %v538_v28 = vrot.slane %v947_v22, 1  ;;  %v673_v29 = vshll.u32 %v965_v24, 16  ;;  %v468_v31 = vshrl.u32 %v939_v20, 16  ;;  %v671_v34 = vshrl.u32 %v965_v24, 16  ;;  %s188_s22 = sadd.s32 %s1081_s7, %s1401_s12  ;;  %v977_v22 = vld [vmem:[%s1386_s2] ss:$0 sm:$0xff] }
  0x1a   : > { %v214_v13 = vrot.slane %v212_v10, 1  ;;  %v472_v32 = vrot.slane %v470_v26, 1  ;;  %v741_v45 = vrot.slane %v973_v43, 1  ;;  %s903_s25 = sshll.u32 %s188_s22, 3 }
  0x1b   : > { %1035 = vmatpush3.bf16.msra.mxu1 %v1132_v8  ;;  %v675_v35 = vrot.slane %v673_v29, 1  ;;  %s190_s13 = scalar_lea.vmem %s1387_s3, %s903_s25 }
  0x1c   : > { %v215_v16 = vor.u32 %v214_v13, %v210_v9  ;;  %1048 = vmatprep.subr.bf16.mxu1 %v1188_v1  ;;  %v473_v37 = vor.u32 %v472_v32, %v468_v31 }
  0x1d   : > { %v676_v39 = vor.u32 %v675_v35, %v671_v34 }
  0x1e   : > { %1013 = vmatmul.mubr.msk.bf16.vlgmr.msra.gmra.mrb[0].mxu0 %vm228_vm1, %v215_v16  ;;  %1037 = vmatmul.mubr.msk.bf16.vlgmr.msra.gmra.mrb[4].mxu1 %vm228_vm1, %v926_v12 }
  0x1f   : > { %1025 = vmatpush3.bf16.msra.mxu0 %v1129_v14  ;;  %1028 = vmatprep.mubr.msk.bf16.mxu0 %vm1189_vm0, %v1188_v1 }
  0x20   : > { %1026 = vmatprep.subr.bf16.mxu0 %v1188_v1  ;;  %1049 = vmatpush3.bf16.msra.mxu1 %v1137_v15 }
  0x21   : > { %1050 = vmatprep.subr.bf16.mxu1 %v1188_v1  ;;  %1052 = vmatprep.mubr.msk.bf16.mxu1 %vm1189_vm0, %v1188_v1 }
  0x23   : > { %1027 = vmatpush3.bf16.msra.mxu0 %v1131_v21 }
  0x24   : > { %1040 = vmatprep.subr.bf16.mxu0 %v1188_v1  ;;  %1051 = vmatpush3.bf16.msra.mxu1 %v1139_v23 }
  0x25   : > { %1064 = vmatprep.subr.bf16.mxu1 %v1188_v1 }
  0x26   : > { %1029 = vmatmul.mubr.msk.bf16.vlgmr.msra.gmra.mrb[4].mxu0 %vm228_vm1, %v335_v25 }
  0x27   : > { %1041 = vmatpush3.bf16.msra.mxu0 %v1134_v27  ;;  %1044 = vmatprep.mubr.msk.bf16.mxu0 %vm1189_vm0, %v1188_v1 }
  0x28   : > { %1042 = vmatprep.subr.bf16.mxu0 %v1188_v1  ;;  %1053 = vmatmul.mubr.msk.bf16.vlgmr.msra.gmra.mrb[8].mxu1 %vm228_vm1, %v538_v28 }
  0x29   : > { %1065 = vmatpush3.bf16.msra.mxu1 %v1141_v30  ;;  %1068 = vmatprep.mubr.msk.bf16.mxu1 %vm1189_vm0, %v1188_v1 }
  0x2a   : > { %1066 = vmatprep.subr.bf16.mxu1 %v1188_v1 }
  0x2b   : > { %1043 = vmatpush3.bf16.msra.mxu0 %v1138_v33 }
  0x2c   : > { %1056 = vmatprep.subr.bf16.mxu0 %v1188_v1 }
  0x2d   : > { %1067 = vmatpush3.bf16.msra.mxu1 %v1143_v36 }
  0x2e   : > { %1045 = vmatmul.mubr.msk.bf16.vlgmr.msra.gmra.mrb[8].mxu0 %vm228_vm1, %v473_v37 }
  0x2f   : > { %1057 = vmatpush3.bf16.msra.mxu0 %v1140_v38  ;;  %1060 = vmatprep.mubr.msk.bf16.mxu0 %vm1189_vm0, %v1188_v1 }
  0x30   : > { %1058 = vmatprep.subr.bf16.mxu0 %v1188_v1  ;;  %1069 = vmatmul.mubr.msk.bf16.vlgmr.msra.gmra.mrb[12].mxu1 %vm228_vm1, %v676_v39 }
  0x33   : > { %1059 = vmatpush3.bf16.msra.mxu0 %v1142_v40 }
  0x34   : > { %1072 = vmatprep.subr.bf16.mxu0 %v1188_v1 }
  0x36   : > { %1061 = vmatmul.mubr.msk.bf16.vlgmr.msra.gmra.mrb[12].mxu0 %vm228_vm1, %v952_v18 }
  0x37   : > { %1073 = vmatpush3.bf16.msra.mxu0 %v1146_v42  ;;  %1076 = vmatprep.mubr.msk.bf16.mxu0 %vm1189_vm0, %v1188_v1 }
  0x38   : > { %1074 = vmatprep.subr.bf16.mxu0 %v1188_v1 }
  0x3b   : > { %1075 = vmatpush3.bf16.msra.mxu0 %v1147_v44 }
  0x3e   : > { %1077 = vmatmul.mubr.msk.bf16.vlgmr.msra.gmra.mrb[16].mxu0 %vm228_vm1, %v741_v45 }
  0xe9   : > { %v321_v46 = vpop.f32.mrb[0].mxu1 }
  0xea   : > { %v1022_v47 = vpop.f32.mrb[1].mxu1 }
  0xeb   : > { %v324_v48 = vpop.f32.mrb[2].mxu1 }
  0xec   : > { %v1023_v49 = vpop.f32.mrb[3].mxu1 }
  0xf1   : > { %v266_v50 = vpop.f32.mrb[0].mxu0  ;;  %v452_v51 = vpop.f32.mrb[4].mxu1 }
  0xf2   : > { %v322_v52 = vadd.f32 %v321_v46, %v266_v50  ;;  %v1014_v53 = vpop.f32.mrb[1].mxu0  ;;  %v1038_v54 = vpop.f32.mrb[5].mxu1 }
  0xf3   : > { %v269_v55 = vpop.f32.mrb[2].mxu0  ;;  %v455_v56 = vpop.f32.mrb[6].mxu1 }
  0xf4   : > { %v1015_v57 = vpop.f32.mrb[3].mxu0  ;;  %v1039_v58 = vpop.f32.mrb[7].mxu1 }
  0xf9   : > { %v385_v59 = vpop.f32.mrb[4].mxu0 }
  0xfa   : > { %v391_v60 = vadd.f32 %v385_v59, %v322_v52  ;;  %v1030_v61 = vpop.f32.mrb[5].mxu0 }
  0xfb   : > { %v388_v62 = vpop.f32.mrb[6].mxu0  ;;  %v588_v63 = vpop.f32.mrb[8].mxu1 }
  0xfc   : > { %v458_v0 = vadd.f32 %v452_v51, %v391_v60  ;;  %v1031_v1 = vpop.f32.mrb[7].mxu0  ;;  %v1054_v2 = vpop.f32.mrb[9].mxu1 }
  0xfd   : > { %v591_v3 = vpop.f32.mrb[10].mxu1 }
  0xfe   : > { %v1055_v4 = vpop.f32.mrb[11].mxu1 }
 0x101   : > { %v523_v5 = vpop.f32.mrb[8].mxu0 }
 0x102   : > { %v529_v6 = vadd.f32 %v523_v5, %v458_v0  ;;  %v1046_v7 = vpop.f32.mrb[9].mxu0 }
 0x103   : > { %v526_v8 = vpop.f32.mrb[10].mxu0  ;;  %v726_v9 = vpop.f32.mrb[12].mxu1 }
 0x104   : > { %v594_v10 = vadd.f32 %v588_v63, %v529_v6  ;;  %v1047_v11 = vpop.f32.mrb[11].mxu0  ;;  %v1070_v12 = vpop.f32.mrb[13].mxu1 }
 0x105   : > { %v729_v13 = vpop.f32.mrb[14].mxu1 }
 0x106   : > { %v1071_v14 = vpop.f32.mrb[15].mxu1 }
 0x109   : > { %v655_v15 = vpop.f32.mrb[12].mxu0 }
 0x10a   : > { %v661_v16 = vadd.f32 %v655_v15, %v594_v10  ;;  %v1062_v17 = vpop.f32.mrb[13].mxu0 }
 0x10b   : > { %v658_v18 = vpop.f32.mrb[14].mxu0 }
 0x10c   : > { %v732_v19 = vadd.f32 %v726_v9, %v661_v16  ;;  %v1063_v20 = vpop.f32.mrb[15].mxu0 }
 0x111   : > { %v791_v21 = vpop.f32.mrb[16].mxu0 }
 0x112   : > { %v797_v23 = vadd.f32 %v791_v21, %v732_v19  ;;  %v1078_v24 = vpop.f32.mrb[17].mxu0 }
 0x113   : > { %v794_v25 = vpop.f32.mrb[18].mxu0 }
 0x114   : > { %v805_v26 = vadd.f32 %v977_v22, %v797_v23  ;;  %v1079_v27 = vpop.f32.mrb[19].mxu0 }
 0x116   : > { %v806_v28 = vmax.f32 %v805_v26, 0.0 }
 0x118   : > { %808 = vst.msk [vmem:[%s190_s13] sm:$0x7f] %vm807_vm2, %v806_v28 }
 0x119 PF: > { %s13_s16 = sadd.s32 1, %s1186_s16   ;;  %s1388_s12 = smov %s1178_s14 }
 0x11a   : > { %p10_p7 = scmp.ge.s32.totalorder %s13_s16, 16   ;;  %s1389_s13 = smov %s1182_s15 }
 0x11b   : > { %s1390_s14 = smov %s1393_s17  ;;  %s1391_s15 = smov %s1397_s18 }
 0x11c   :  { %12 = sbr.rel (!%p10_p7) target bundleno = 3 (0x3), region = 73 }

// kernel: alexnet_forward.14
= control target key start
LH: loop header
LB: loop body
LE: loop exit
PB: predicated region body
PF: predicated region fallthrough
CT: control target
= control target key end

     0   :  { %s1343_s12 = smov 0   ;;  %s1345_s13 = smov 0   ;;  %s1553_s0 = inlined_call_operand.vmem [shape: bf16[2,9,9,48], index: 0, kind: input, shape index: {}]   ;;  %s1554_s1 = inlined_call_operand.vmem [shape: bf16[3,3,48,128], index: 1, kind: input, shape index: {}]   ;;  %s1555_s2 = inlined_call_operand.vmem [shape: f32[1,128], index: 2, kind: input, shape index: {}]   ;;  %s1556_s3 = inlined_call_operand.vmem [shape: f32[2,7,7,48], index: 3, kind: output, shape index: {}]  }
   0x1   :  { %s1347_s14 = smov 0   ;;  %s1349_s15 = smov 0  }
   0x2   :  { %s1351_s16 = smov 0  }
   0x3 LB: > { %s22_s17 = sadd.s32 1, %s1311_s14  ;;  %s25_s18 = sadd.s32 1, %s1315_s15  ;;  %s1319_s16 = sphi %s1351_s16, %s13_s16   ;;  %s1315_s15 = sphi %s1349_s15, %s1560_s15   ;;  %s1311_s14 = sphi %s1347_s14, %s1559_s14   ;;  %s1307_s13 = sphi %s1345_s13, %s1558_s13   ;;  %s1303_s12 = sphi %s1343_s12, %s1557_s12  }
   0x4   : > { %p23_p0 = scmp.ge.s32.totalorder %s22_s17, 7  ;;  %p973_p1 = scmp.ge.s32.totalorder %s1319_s16, 1 }
   0x5   : > { %p151_p2 = scmp.lt.s32.totalorder %s1319_s16, 15 }
   0x6   : > { %s1562_s17 = smov (%p23_p0, %s22_s17), 0  ;;  %s1564_s18 = smov (!%p23_p0, %s25_s18), %s1315_s15 }
   0x7   : > { %p152_p3 = pnand %p973_p1, %p151_p2  ;;  %p27_p4 = scmp.ge.s32.totalorder %s1564_s18, 2 }
   0x8   : > { %v1248_v0 = vld [vmem:[%s1554_s1 + $0x18] sm:$0xff] (!%p152_p3)   ;;  %v1321_v1 = vmov (!%p152_p3), 0.0   ;;  %v1249_v2 = vld [vmem:[%s1554_s1] sm:$0xff] (!%p152_p3)   ;;  %vm1322_vm0 = vmmov (!%p152_p3), 0   ;;  %p178_p5 = scmp.lt.s32.totalorder (!%p152_p3), %s1307_s13, 1  ;;  %v1251_v4 = vld [vmem:[%s1554_s1 + $0x8] sm:$0xff] (!%p152_p3)  }
   0x9   : > { %s1566_s18 = smov (%p27_p4, %s1564_s18), 0  ;;  %155 = sbr.rel (%p152_p3) target bundleno = 297 (0x129), region = 32 }
   0xa   : > { %1114 = vmatprep.subr.bf16.mxu0 (!%p152_p3), %v1321_v1  ;;  %1124 = vmatprep.subr.bf16.mxu1 (!%p152_p3), %v1321_v1  ;;  %v1250_v3 = vld [vmem:[%s1554_s1 + $0x20] sm:$0xff] (!%p152_p3)   ;;  %s1077_s27 = sshll.u32 (!%p152_p3), %s1303_s12, 3  ;;  %v1252_v5 = vld [vmem:[%s1554_s1 + $0x28] sm:$0xff] (!%p152_p3)   ;;  %v1253_v6 = vld [vmem:[%s1554_s1 + $0x10] sm:$0xff] (!%p152_p3)   ;;  %vm238_vm1 = vcmask (!%p152_p3), 392192   ;;  %p185_p6 = scmp.lt.s32.totalorder (!%p152_p3), %s1303_s12, 6 }
   0xb   : > { %1115 = vmatpush3.bf16.msra.mxu0 (!%p152_p3), %v1248_v0  ;;  %1120 = vmatprep.mubr.msk.bf16.mxu0 (!%p152_p3), %vm1322_vm0, %v1321_v1  ;;  %v1256_v9 = vld [vmem:[%s1554_s1 + $0x48] sm:$0xff] (!%p152_p3)   ;;  %v1258_v13 = vld [vmem:[%s1554_s1 + $0x50] sm:$0xff] (!%p152_p3)   ;;  %v1257_v16 = vld [vmem:[%s1554_s1 + $0x38] sm:$0xff] (!%p152_p3)   ;;  %vm879_vm2 = vcmask (!%p152_p3), 391168  }
   0xc   : > { %1125 = vmatpush3.bf16.msra.mxu1 (!%p152_p3), %v1249_v2  ;;  %1116 = vmatprep.subr.bf16.mxu0 (!%p152_p3), %v1321_v1  ;;  %v1255_v14 = vld [vmem:[%s1554_s1 + $0x30] sm:$0xff] (!%p152_p3)   ;;  %v1260_v17 = vld [vmem:[%s1554_s1 + $0x58] sm:$0xff] (!%p152_p3)   ;;  %v1259_v22 = vld [vmem:[%s1554_s1 + $0x40] sm:$0xff] (!%p152_p3)  }
   0xd   : > { %1126 = vmatprep.subr.bf16.mxu1 (!%p152_p3), %v1321_v1  ;;  %1130 = vmatprep.mubr.msk.bf16.mxu1 (!%p152_p3), %vm1322_vm0, %v1321_v1  ;;  %v1265_v19 = vld [vmem:[%s1554_s1 + $0x78] sm:$0xff] (!%p152_p3)   ;;  %v1267_v26 = vld [vmem:[%s1554_s1 + $0x80] sm:$0xff] (!%p152_p3)   ;;  %v1269_v30 = vld [vmem:[%s1554_s1 + $0x88] sm:$0xff] (!%p152_p3)  }
   0xe   : > { %v1262_v27 = vld [vmem:[%s1554_s1 + $0x60] sm:$0xff] (!%p152_p3)   ;;  %v1266_v32 = vld [vmem:[%s1554_s1 + $0x68] sm:$0xff] (!%p152_p3)   ;;  %v1268_v38 = vld [vmem:[%s1554_s1 + $0x70] sm:$0xff] (!%p152_p3)  }
   0xf   : > { %1117 = vmatpush3.bf16.msra.mxu0 (!%p152_p3), %v1250_v3  ;;  %v1271_v37 = vld [vmem:[%s1554_s1 + $0xa8] sm:$0xff] (!%p152_p3)   ;;  %v1273_v41 = vld [vmem:[%s1554_s1 + $0xb0] sm:$0xff] (!%p152_p3)   ;;  %v1275_v45 = vld [vmem:[%s1554_s1 + $0xb8] sm:$0xff] (!%p152_p3)  }
  0x10   : > { %s1568_s13 = smov (!%p178_p5, %s1307_s13), 1  ;;  %1127 = vmatpush3.bf16.msra.mxu1 %v1251_v4  ;;  %1118 = vmatprep.subr.bf16.mxu0 %v1321_v1  ;;  %v1270_v42 = vld [vmem:[%s1554_s1 + $0x90] sm:$0xff]   ;;  %v1272_v46 = vld [vmem:[%s1554_s1 + $0x98] sm:$0xff]   ;;  %v1274_v48 = vld [vmem:[%s1554_s1 + $0xa0] sm:$0xff]   ;;  %s1570_s12 = smov (!%p185_p6, %s1303_s12), 6 }
  0x11   : > { %s1204_s30 = smul.u32 72, %s1568_s13  ;;  %1128 = vmatprep.subr.bf16.mxu1 %v1321_v1  ;;  %v1278_v49 = vld [vmem:[%s1554_s1 + $0xc0] sm:$0xff]   ;;  %v1279_v51 = vld [vmem:[%s1554_s1 + $0xc8] sm:$0xff]   ;;  %v1280_v53 = vld [vmem:[%s1554_s1 + $0xd0] sm:$0xff]  }
  0x13   : > { %s182_s8 = scalar_lea.vmem %s1553_s0, %s1204_s30  ;;  %1119 = vmatpush3.bf16.msra.mxu0 %v1252_v5 }
  0x14   : > { %s1414_s9 = scalar_lea.vmem %s182_s8, %s1077_s27  ;;  %1129 = vmatpush3.bf16.msra.mxu1 %v1253_v6  ;;  %1134 = vmatprep.subr.bf16.mxu0 %v1321_v1 }
  0x15   : > { %v195_v7 = vld [vmem:[%s1414_s9] sm:$0xf]  ;;  %1144 = vmatprep.subr.bf16.mxu1 %v1321_v1  ;;  %v196_v18 = vld [vmem:[%s1414_s9 + $0x4] sm:$0x1]  ;;  %v1005_v21 = vld [vmem:[%s1414_s9 + $0x8] sm:$0xf] }
  0x16   : > { %v984_v8 = vcombine.low %v195_v7, %v195_v7  ;;  %v999_v20 = vcombine.low %v195_v7, %v196_v18  ;;  %v1006_v23 = vld [vmem:[%s1414_s9 + $0xc] sm:$0x1]  ;;  %v1023_v25 = vcombine.low %v1005_v21, %v1005_v21  ;;  %v1040_v31 = vld [vmem:[%s1414_s9 + $0x10] sm:$0xf]  ;;  %v1041_v50 = vld [vmem:[%s1414_s9 + $0x14] sm:$0x1] }
  0x17   : > { %1131 = vmatmul.mubr.msk.bf16.vlgmr.msra.gmra.mrb[0].mxu1 %vm238_vm1, %v195_v7  ;;  %v1034_v28 = vcombine.low %v1005_v21, %v1006_v23  ;;  %v1058_v34 = vcombine.low %v1040_v31, %v1040_v31  ;;  %v1069_v52 = vcombine.low %v1040_v31, %v1041_v50  ;;  %s1205_s9 = smul.u32 7, %s1568_s13 }
  0x18   : > { %v214_v10 = vshrl.u32 %v984_v8, 16  ;;  %v216_v11 = vshll.u32 %v984_v8, 16  ;;  %1145 = vmatpush3.bf16.msra.mxu1 %v1256_v9  ;;  %1150 = vmatprep.mubr.msk.bf16.mxu1 %vm1322_vm0, %v1321_v1  ;;  %v353_v24 = vrot.slane %v999_v20, 1  ;;  %v504_v29 = vshll.u32 %v1023_v25, 16 }
  0x19   : > { %1146 = vmatprep.subr.bf16.mxu1 %v1321_v1  ;;  %v580_v33 = vrot.slane %v1034_v28, 1  ;;  %v502_v35 = vshrl.u32 %v1023_v25, 16  ;;  %v731_v39 = vshll.u32 %v1058_v34, 16  ;;  %v729_v43 = vshrl.u32 %v1058_v34, 16  ;;  %s188_s21 = sadd.s32 %s1205_s9, %s1570_s12 }
  0x1a   : > { %v218_v12 = vrot.slane %v216_v11, 1  ;;  %v506_v36 = vrot.slane %v504_v29, 1  ;;  %v807_v54 = vrot.slane %v1069_v52, 1  ;;  %s975_s24 = sshll.u32 %s188_s21, 3 }
  0x1b   : > { %v733_v44 = vrot.slane %v731_v39, 1  ;;  %s190_s27 = scalar_lea.vmem %s1556_s3, %s975_s24 }
  0x1c   : > { %v219_v15 = vor.u32 %v218_v12, %v214_v10  ;;  %1147 = vmatpush3.bf16.msra.mxu1 %v1258_v13  ;;  %v507_v40 = vor.u32 %v506_v36, %v502_v35 }
  0x1d   : > { %1148 = vmatprep.subr.bf16.mxu1 %v1321_v1  ;;  %v734_v47 = vor.u32 %v733_v44, %v729_v43 }
  0x1e   : > { %1121 = vmatmul.mubr.msk.bf16.vlgmr.msra.gmra.mrb[0].mxu0 %vm238_vm1, %v219_v15 }
  0x1f   : > { %1135 = vmatpush3.bf16.msra.mxu0 %v1255_v14  ;;  %1140 = vmatprep.mubr.msk.bf16.mxu0 %vm1322_vm0, %v1321_v1 }
  0x20   : > { %1136 = vmatprep.subr.bf16.mxu0 %v1321_v1  ;;  %1149 = vmatpush3.bf16.msra.mxu1 %v1260_v17 }
  0x21   : > { %1164 = vmatprep.subr.bf16.mxu1 %v1321_v1 }
  0x23   : > { %1137 = vmatpush3.bf16.msra.mxu0 %v1257_v16  ;;  %1151 = vmatmul.mubr.msk.bf16.vlgmr.msra.gmra.mrb[4].mxu1 %vm238_vm1, %v1005_v21 }
  0x24   : > { %1138 = vmatprep.subr.bf16.mxu0 %v1321_v1  ;;  %1165 = vmatpush3.bf16.msra.mxu1 %v1265_v19 }
  0x25   : > { %1170 = vmatprep.mubr.msk.bf16.mxu1 %vm1322_vm0, %v1321_v1  ;;  %1166 = vmatprep.subr.bf16.mxu1 %v1321_v1 }
  0x27   : > { %1139 = vmatpush3.bf16.msra.mxu0 %v1259_v22 }
  0x28   : > { %1154 = vmatprep.subr.bf16.mxu0 %v1321_v1  ;;  %1167 = vmatpush3.bf16.msra.mxu1 %v1267_v26 }
  0x29   : > { %1168 = vmatprep.subr.bf16.mxu1 %v1321_v1 }
  0x2a   : > { %1141 = vmatmul.mubr.msk.bf16.vlgmr.msra.gmra.mrb[4].mxu0 %vm238_vm1, %v353_v24 }
  0x2b   : > { %1155 = vmatpush3.bf16.msra.mxu0 %v1262_v27  ;;  %1160 = vmatprep.mubr.msk.bf16.mxu0 %vm1322_vm0, %v1321_v1 }
  0x2c   : > { %1156 = vmatprep.subr.bf16.mxu0 %v1321_v1  ;;  %1169 = vmatpush3.bf16.msra.mxu1 %v1269_v30 }
  0x2d   : > { %1184 = vmatprep.subr.bf16.mxu1 %v1321_v1 }
  0x2f   : > { %1157 = vmatpush3.bf16.msra.mxu0 %v1266_v32  ;;  %1171 = vmatmul.mubr.msk.bf16.vlgmr.msra.gmra.mrb[8].mxu1 %vm238_vm1, %v580_v33 }
  0x30   : > { %1158 = vmatprep.subr.bf16.mxu0 %v1321_v1  ;;  %1185 = vmatpush3.bf16.msra.mxu1 %v1271_v37 }
  0x31   : > { %1190 = vmatprep.mubr.msk.bf16.mxu1 %vm1322_vm0, %v1321_v1  ;;  %1186 = vmatprep.subr.bf16.mxu1 %v1321_v1 }
  0x33   : > { %1159 = vmatpush3.bf16.msra.mxu0 %v1268_v38 }
  0x34   : > { %1174 = vmatprep.subr.bf16.mxu0 %v1321_v1  ;;  %1187 = vmatpush3.bf16.msra.mxu1 %v1273_v41 }
  0x35   : > { %1188 = vmatprep.subr.bf16.mxu1 %v1321_v1 }
  0x36   : > { %1161 = vmatmul.mubr.msk.bf16.vlgmr.msra.gmra.mrb[8].mxu0 %vm238_vm1, %v507_v40 }
  0x37   : > { %1175 = vmatpush3.bf16.msra.mxu0 %v1270_v42  ;;  %1180 = vmatprep.mubr.msk.bf16.mxu0 %vm1322_vm0, %v1321_v1 }
  0x38   : > { %1176 = vmatprep.subr.bf16.mxu0 %v1321_v1  ;;  %1189 = vmatpush3.bf16.msra.mxu1 %v1275_v45 }
  0x3b   : > { %1177 = vmatpush3.bf16.msra.mxu0 %v1272_v46  ;;  %1191 = vmatmul.mubr.msk.bf16.vlgmr.msra.gmra.mrb[12].mxu1 %vm238_vm1, %v734_v47 }
  0x3c   : > { %1178 = vmatprep.subr.bf16.mxu0 %v1321_v1 }
  0x3f   : > { %1179 = vmatpush3.bf16.msra.mxu0 %v1274_v48 }
  0x40   : > { %1194 = vmatprep.subr.bf16.mxu0 %v1321_v1 }
  0x42   : > { %1181 = vmatmul.mubr.msk.bf16.vlgmr.msra.gmra.mrb[12].mxu0 %vm238_vm1, %v1040_v31  ;;  %v1074_v31 = vld [vmem:[%s1555_s2] ss:$0 sm:$0xff] }
  0x43   : > { %1195 = vmatpush3.bf16.msra.mxu0 %v1278_v49  ;;  %1200 = vmatprep.mubr.msk.bf16.mxu0 %vm1322_vm0, %v1321_v1 }
  0x44   : > { %1196 = vmatprep.subr.bf16.mxu0 %v1321_v1 }
  0x47   : > { %1197 = vmatpush3.bf16.msra.mxu0 %v1279_v51 }
  0x48   : > { %1198 = vmatprep.subr.bf16.mxu0 %v1321_v1 }
  0x4b   : > { %1199 = vmatpush3.bf16.msra.mxu0 %v1280_v53 }
  0x4e   : > { %1201 = vmatmul.mubr.msk.bf16.vlgmr.msra.gmra.mrb[16].mxu0 %vm238_vm1, %v807_v54 }
  0xea   : > { %v337_v55 = vpop.f32.mrb[0].mxu1 }
  0xeb   : > { %v1132_v56 = vpop.f32.mrb[1].mxu1 }
  0xec   : > { %v340_v57 = vpop.f32.mrb[2].mxu1 }
  0xed   : > { %v1133_v58 = vpop.f32.mrb[3].mxu1 }
  0xf1   : > { %v276_v59 = vpop.f32.mrb[0].mxu0 }
  0xf2   : > { %v338_v60 = vadd.f32 %v337_v55, %v276_v59  ;;  %v1122_v61 = vpop.f32.mrb[1].mxu0 }
  0xf3   : > { %v279_v62 = vpop.f32.mrb[2].mxu0 }
  0xf4   : > { %v1123_v63 = vpop.f32.mrb[3].mxu0 }
  0xf6   : > { %v484_v0 = vpop.f32.mrb[4].mxu1 }
  0xf7   : > { %v1152_v2 = vpop.f32.mrb[5].mxu1 }
  0xf8   : > { %v487_v3 = vpop.f32.mrb[6].mxu1 }
  0xf9   : > { %v1153_v4 = vpop.f32.mrb[7].mxu1 }
  0xfd   : > { %v409_v5 = vpop.f32.mrb[4].mxu0 }
  0xfe   : > { %v415_v6 = vadd.f32 %v409_v5, %v338_v60  ;;  %v1142_v1 = vpop.f32.mrb[5].mxu0 }
  0xff   : > { %v412_v7 = vpop.f32.mrb[6].mxu0 }
 0x100   : > { %v490_v8 = vadd.f32 %v484_v0, %v415_v6  ;;  %v1143_v9 = vpop.f32.mrb[7].mxu0 }
 0x102   : > { %v636_v10 = vpop.f32.mrb[8].mxu1 }
 0x103   : > { %v1172_v11 = vpop.f32.mrb[9].mxu1 }
 0x104   : > { %v639_v12 = vpop.f32.mrb[10].mxu1 }
 0x105   : > { %v1173_v13 = vpop.f32.mrb[11].mxu1 }
 0x109   : > { %v563_v14 = vpop.f32.mrb[8].mxu0 }
 0x10a   : > { %v569_v15 = vadd.f32 %v563_v14, %v490_v8  ;;  %v1162_v16 = vpop.f32.mrb[9].mxu0 }
 0x10b   : > { %v566_v17 = vpop.f32.mrb[10].mxu0 }
 0x10c   : > { %v642_v18 = vadd.f32 %v636_v10, %v569_v15  ;;  %v1163_v19 = vpop.f32.mrb[11].mxu0 }
 0x10e   : > { %v790_v20 = vpop.f32.mrb[12].mxu1 }
 0x10f   : > { %v1192_v21 = vpop.f32.mrb[13].mxu1 }
 0x110   : > { %v793_v22 = vpop.f32.mrb[14].mxu1 }
 0x111   : > { %v1193_v23 = vpop.f32.mrb[15].mxu1 }
 0x115   : > { %v711_v24 = vpop.f32.mrb[12].mxu0 }
 0x116   : > { %v717_v25 = vadd.f32 %v711_v24, %v642_v18  ;;  %v1182_v26 = vpop.f32.mrb[13].mxu0 }
 0x117   : > { %v714_v27 = vpop.f32.mrb[14].mxu0 }
 0x118   : > { %v796_v28 = vadd.f32 %v790_v20, %v717_v25  ;;  %v1183_v29 = vpop.f32.mrb[15].mxu0 }
 0x121   : > { %v863_v30 = vpop.f32.mrb[16].mxu0 }
 0x122   : > { %v869_v32 = vadd.f32 %v863_v30, %v796_v28  ;;  %v1202_v33 = vpop.f32.mrb[17].mxu0 }
 0x123   : > { %v866_v34 = vpop.f32.mrb[18].mxu0 }
 0x124   : > { %v877_v35 = vadd.f32 %v1074_v31, %v869_v32  ;;  %v1203_v36 = vpop.f32.mrb[19].mxu0 }
 0x126   : > { %v878_v37 = vmax.f32 %v877_v35, 0.0 }
 0x128   : > { %880 = vst.msk [vmem:[%s190_s27] sm:$0x7f] %vm879_vm2, %v878_v37 }
 0x129 PF: > { %s13_s16 = sadd.s32 1, %s1319_s16   ;;  %s1557_s12 = smov %s1311_s14 }
 0x12a   : > { %p10_p7 = scmp.ge.s32.totalorder %s13_s16, 16   ;;  %s1558_s13 = smov %s1315_s15 }
 0x12b   : > { %s1559_s14 = smov %s1562_s17  ;;  %s1560_s15 = smov %s1566_s18 }
 0x12c   :  { %12 = sbr.rel (!%p10_p7) target bundleno = 3 (0x3), region = 73 }

// kernel: alexnet_forward.15
= control target key start
LH: loop header
LB: loop body
LE: loop exit
PB: predicated region body
PF: predicated region fallthrough
CT: control target
= control target key end

     0   :  { %s1343_s12 = smov 0   ;;  %s1345_s13 = smov 0   ;;  %s1553_s0 = inlined_call_operand.vmem [shape: bf16[2,9,9,48], index: 0, kind: input, shape index: {}]   ;;  %s1554_s1 = inlined_call_operand.vmem [shape: bf16[3,3,48,128], index: 1, kind: input, shape index: {}]   ;;  %s1555_s2 = inlined_call_operand.vmem [shape: f32[1,128], index: 2, kind: input, shape index: {}]   ;;  %s1556_s3 = inlined_call_operand.vmem [shape: f32[2,7,7,32], index: 3, kind: output, shape index: {}]  }
   0x1   :  { %s1347_s14 = smov 0   ;;  %s1349_s15 = smov 0  }
   0x2   :  { %s1351_s16 = smov 0  }
   0x3 LB: > { %s22_s17 = sadd.s32 1, %s1311_s14  ;;  %s25_s18 = sadd.s32 1, %s1315_s15  ;;  %s1319_s16 = sphi %s1351_s16, %s13_s16   ;;  %s1315_s15 = sphi %s1349_s15, %s1560_s15   ;;  %s1311_s14 = sphi %s1347_s14, %s1559_s14   ;;  %s1307_s13 = sphi %s1345_s13, %s1558_s13   ;;  %s1303_s12 = sphi %s1343_s12, %s1557_s12  }
   0x4   : > { %p23_p0 = scmp.ge.s32.totalorder %s22_s17, 7  ;;  %p973_p1 = scmp.ge.s32.totalorder %s1319_s16, 1 }
   0x5   : > { %p151_p2 = scmp.lt.s32.totalorder %s1319_s16, 15 }
   0x6   : > { %s1562_s17 = smov (%p23_p0, %s22_s17), 0  ;;  %s1564_s18 = smov (!%p23_p0, %s25_s18), %s1315_s15 }
   0x7   : > { %p152_p3 = pnand %p973_p1, %p151_p2  ;;  %p27_p4 = scmp.ge.s32.totalorder %s1564_s18, 2 }
   0x8   : > { %v1248_v0 = vld [vmem:[%s1554_s1 + $0x18] sm:$0xff] (!%p152_p3)   ;;  %v1321_v1 = vmov (!%p152_p3), 0.0   ;;  %v1249_v2 = vld [vmem:[%s1554_s1] sm:$0xff] (!%p152_p3)   ;;  %vm1322_vm0 = vmmov (!%p152_p3), 0   ;;  %p178_p5 = scmp.lt.s32.totalorder (!%p152_p3), %s1307_s13, 1  ;;  %v1251_v4 = vld [vmem:[%s1554_s1 + $0x8] sm:$0xff] (!%p152_p3)  }
   0x9   : > { %s1566_s18 = smov (%p27_p4, %s1564_s18), 0  ;;  %155 = sbr.rel (%p152_p3) target bundleno = 297 (0x129), region = 32 }
   0xa   : > { %1114 = vmatprep.subr.bf16.mxu0 (!%p152_p3), %v1321_v1  ;;  %1124 = vmatprep.subr.bf16.mxu1 (!%p152_p3), %v1321_v1  ;;  %v1250_v3 = vld [vmem:[%s1554_s1 + $0x20] sm:$0xff] (!%p152_p3)   ;;  %s1077_s27 = sshll.u32 (!%p152_p3), %s1303_s12, 3  ;;  %v1252_v5 = vld [vmem:[%s1554_s1 + $0x28] sm:$0xff] (!%p152_p3)   ;;  %v1253_v6 = vld [vmem:[%s1554_s1 + $0x10] sm:$0xff] (!%p152_p3)   ;;  %vm238_vm1 = vcmask (!%p152_p3), 392192   ;;  %p185_p6 = scmp.lt.s32.totalorder (!%p152_p3), %s1303_s12, 6 }
   0xb   : > { %1115 = vmatpush3.bf16.msra.mxu0 (!%p152_p3), %v1248_v0  ;;  %1120 = vmatprep.mubr.msk.bf16.mxu0 (!%p152_p3), %vm1322_vm0, %v1321_v1  ;;  %v1256_v9 = vld [vmem:[%s1554_s1 + $0x48] sm:$0xff] (!%p152_p3)   ;;  %v1258_v13 = vld [vmem:[%s1554_s1 + $0x50] sm:$0xff] (!%p152_p3)   ;;  %v1257_v16 = vld [vmem:[%s1554_s1 + $0x38] sm:$0xff] (!%p152_p3)   ;;  %vm879_vm2 = vcmask (!%p152_p3), 260096  }
   0xc   : > { %1125 = vmatpush3.bf16.msra.mxu1 (!%p152_p3), %v1249_v2  ;;  %1116 = vmatprep.subr.bf16.mxu0 (!%p152_p3), %v1321_v1  ;;  %v1255_v14 = vld [vmem:[%s1554_s1 + $0x30] sm:$0xff] (!%p152_p3)   ;;  %v1260_v17 = vld [vmem:[%s1554_s1 + $0x58] sm:$0xff] (!%p152_p3)   ;;  %v1259_v22 = vld [vmem:[%s1554_s1 + $0x40] sm:$0xff] (!%p152_p3)  }
   0xd   : > { %1126 = vmatprep.subr.bf16.mxu1 (!%p152_p3), %v1321_v1  ;;  %1130 = vmatprep.mubr.msk.bf16.mxu1 (!%p152_p3), %vm1322_vm0, %v1321_v1  ;;  %v1265_v19 = vld [vmem:[%s1554_s1 + $0x78] sm:$0xff] (!%p152_p3)   ;;  %v1267_v26 = vld [vmem:[%s1554_s1 + $0x80] sm:$0xff] (!%p152_p3)   ;;  %v1269_v30 = vld [vmem:[%s1554_s1 + $0x88] sm:$0xff] (!%p152_p3)  }
   0xe   : > { %v1262_v27 = vld [vmem:[%s1554_s1 + $0x60] sm:$0xff] (!%p152_p3)   ;;  %v1266_v32 = vld [vmem:[%s1554_s1 + $0x68] sm:$0xff] (!%p152_p3)   ;;  %v1268_v38 = vld [vmem:[%s1554_s1 + $0x70] sm:$0xff] (!%p152_p3)  }
   0xf   : > { %1117 = vmatpush3.bf16.msra.mxu0 (!%p152_p3), %v1250_v3  ;;  %v1271_v37 = vld [vmem:[%s1554_s1 + $0xa8] sm:$0xff] (!%p152_p3)   ;;  %v1273_v41 = vld [vmem:[%s1554_s1 + $0xb0] sm:$0xff] (!%p152_p3)   ;;  %v1275_v45 = vld [vmem:[%s1554_s1 + $0xb8] sm:$0xff] (!%p152_p3)  }
  0x10   : > { %s1568_s13 = smov (!%p178_p5, %s1307_s13), 1  ;;  %1127 = vmatpush3.bf16.msra.mxu1 %v1251_v4  ;;  %1118 = vmatprep.subr.bf16.mxu0 %v1321_v1  ;;  %v1270_v42 = vld [vmem:[%s1554_s1 + $0x90] sm:$0xff]   ;;  %v1272_v46 = vld [vmem:[%s1554_s1 + $0x98] sm:$0xff]   ;;  %v1274_v48 = vld [vmem:[%s1554_s1 + $0xa0] sm:$0xff]   ;;  %s1570_s12 = smov (!%p185_p6, %s1303_s12), 6 }
  0x11   : > { %s1204_s30 = smul.u32 72, %s1568_s13  ;;  %1128 = vmatprep.subr.bf16.mxu1 %v1321_v1  ;;  %v1278_v49 = vld [vmem:[%s1554_s1 + $0xc0] sm:$0xff]   ;;  %v1279_v51 = vld [vmem:[%s1554_s1 + $0xc8] sm:$0xff]   ;;  %v1280_v53 = vld [vmem:[%s1554_s1 + $0xd0] sm:$0xff]  }
  0x13   : > { %s182_s8 = scalar_lea.vmem %s1553_s0, %s1204_s30  ;;  %1119 = vmatpush3.bf16.msra.mxu0 %v1252_v5 }
  0x14   : > { %s1414_s9 = scalar_lea.vmem %s182_s8, %s1077_s27  ;;  %1129 = vmatpush3.bf16.msra.mxu1 %v1253_v6  ;;  %1134 = vmatprep.subr.bf16.mxu0 %v1321_v1 }
  0x15   : > { %v195_v7 = vld [vmem:[%s1414_s9] sm:$0xf]  ;;  %1144 = vmatprep.subr.bf16.mxu1 %v1321_v1  ;;  %v196_v18 = vld [vmem:[%s1414_s9 + $0x4] sm:$0x1]  ;;  %v1005_v21 = vld [vmem:[%s1414_s9 + $0x8] sm:$0xf] }
  0x16   : > { %v984_v8 = vcombine.low %v195_v7, %v195_v7  ;;  %v999_v20 = vcombine.low %v195_v7, %v196_v18  ;;  %v1006_v23 = vld [vmem:[%s1414_s9 + $0xc] sm:$0x1]  ;;  %v1023_v25 = vcombine.low %v1005_v21, %v1005_v21  ;;  %v1040_v31 = vld [vmem:[%s1414_s9 + $0x10] sm:$0xf]  ;;  %v1041_v50 = vld [vmem:[%s1414_s9 + $0x14] sm:$0x1] }
  0x17   : > { %1131 = vmatmul.mubr.msk.bf16.vlgmr.msra.gmra.mrb[0].mxu1 %vm238_vm1, %v195_v7  ;;  %v1034_v28 = vcombine.low %v1005_v21, %v1006_v23  ;;  %v1058_v34 = vcombine.low %v1040_v31, %v1040_v31  ;;  %v1069_v52 = vcombine.low %v1040_v31, %v1041_v50  ;;  %s1205_s9 = smul.u32 7, %s1568_s13 }
  0x18   : > { %v214_v10 = vshrl.u32 %v984_v8, 16  ;;  %v216_v11 = vshll.u32 %v984_v8, 16  ;;  %1145 = vmatpush3.bf16.msra.mxu1 %v1256_v9  ;;  %1150 = vmatprep.mubr.msk.bf16.mxu1 %vm1322_vm0, %v1321_v1  ;;  %v353_v24 = vrot.slane %v999_v20, 1  ;;  %v504_v29 = vshll.u32 %v1023_v25, 16 }
  0x19   : > { %1146 = vmatprep.subr.bf16.mxu1 %v1321_v1  ;;  %v580_v33 = vrot.slane %v1034_v28, 1  ;;  %v502_v35 = vshrl.u32 %v1023_v25, 16  ;;  %v731_v39 = vshll.u32 %v1058_v34, 16  ;;  %v729_v43 = vshrl.u32 %v1058_v34, 16  ;;  %s188_s21 = sadd.s32 %s1205_s9, %s1570_s12 }
  0x1a   : > { %v218_v12 = vrot.slane %v216_v11, 1  ;;  %v506_v36 = vrot.slane %v504_v29, 1  ;;  %v807_v54 = vrot.slane %v1069_v52, 1  ;;  %s975_s24 = sshll.u32 %s188_s21, 3 }
  0x1b   : > { %v733_v44 = vrot.slane %v731_v39, 1  ;;  %s190_s27 = scalar_lea.vmem %s1556_s3, %s975_s24 }
  0x1c   : > { %v219_v15 = vor.u32 %v218_v12, %v214_v10  ;;  %1147 = vmatpush3.bf16.msra.mxu1 %v1258_v13  ;;  %v507_v40 = vor.u32 %v506_v36, %v502_v35 }
  0x1d   : > { %1148 = vmatprep.subr.bf16.mxu1 %v1321_v1  ;;  %v734_v47 = vor.u32 %v733_v44, %v729_v43 }
  0x1e   : > { %1121 = vmatmul.mubr.msk.bf16.vlgmr.msra.gmra.mrb[0].mxu0 %vm238_vm1, %v219_v15 }
  0x1f   : > { %1135 = vmatpush3.bf16.msra.mxu0 %v1255_v14  ;;  %1140 = vmatprep.mubr.msk.bf16.mxu0 %vm1322_vm0, %v1321_v1 }
  0x20   : > { %1136 = vmatprep.subr.bf16.mxu0 %v1321_v1  ;;  %1149 = vmatpush3.bf16.msra.mxu1 %v1260_v17 }
  0x21   : > { %1164 = vmatprep.subr.bf16.mxu1 %v1321_v1 }
  0x23   : > { %1137 = vmatpush3.bf16.msra.mxu0 %v1257_v16  ;;  %1151 = vmatmul.mubr.msk.bf16.vlgmr.msra.gmra.mrb[4].mxu1 %vm238_vm1, %v1005_v21 }
  0x24   : > { %1138 = vmatprep.subr.bf16.mxu0 %v1321_v1  ;;  %1165 = vmatpush3.bf16.msra.mxu1 %v1265_v19 }
  0x25   : > { %1170 = vmatprep.mubr.msk.bf16.mxu1 %vm1322_vm0, %v1321_v1  ;;  %1166 = vmatprep.subr.bf16.mxu1 %v1321_v1 }
  0x27   : > { %1139 = vmatpush3.bf16.msra.mxu0 %v1259_v22 }
  0x28   : > { %1154 = vmatprep.subr.bf16.mxu0 %v1321_v1  ;;  %1167 = vmatpush3.bf16.msra.mxu1 %v1267_v26 }
  0x29   : > { %1168 = vmatprep.subr.bf16.mxu1 %v1321_v1 }
  0x2a   : > { %1141 = vmatmul.mubr.msk.bf16.vlgmr.msra.gmra.mrb[4].mxu0 %vm238_vm1, %v353_v24 }
  0x2b   : > { %1155 = vmatpush3.bf16.msra.mxu0 %v1262_v27  ;;  %1160 = vmatprep.mubr.msk.bf16.mxu0 %vm1322_vm0, %v1321_v1 }
  0x2c   : > { %1156 = vmatprep.subr.bf16.mxu0 %v1321_v1  ;;  %1169 = vmatpush3.bf16.msra.mxu1 %v1269_v30 }
  0x2d   : > { %1184 = vmatprep.subr.bf16.mxu1 %v1321_v1 }
  0x2f   : > { %1157 = vmatpush3.bf16.msra.mxu0 %v1266_v32  ;;  %1171 = vmatmul.mubr.msk.bf16.vlgmr.msra.gmra.mrb[8].mxu1 %vm238_vm1, %v580_v33 }
  0x30   : > { %1158 = vmatprep.subr.bf16.mxu0 %v1321_v1  ;;  %1185 = vmatpush3.bf16.msra.mxu1 %v1271_v37 }
  0x31   : > { %1190 = vmatprep.mubr.msk.bf16.mxu1 %vm1322_vm0, %v1321_v1  ;;  %1186 = vmatprep.subr.bf16.mxu1 %v1321_v1 }
  0x33   : > { %1159 = vmatpush3.bf16.msra.mxu0 %v1268_v38 }
  0x34   : > { %1174 = vmatprep.subr.bf16.mxu0 %v1321_v1  ;;  %1187 = vmatpush3.bf16.msra.mxu1 %v1273_v41 }
  0x35   : > { %1188 = vmatprep.subr.bf16.mxu1 %v1321_v1 }
  0x36   : > { %1161 = vmatmul.mubr.msk.bf16.vlgmr.msra.gmra.mrb[8].mxu0 %vm238_vm1, %v507_v40 }
  0x37   : > { %1175 = vmatpush3.bf16.msra.mxu0 %v1270_v42  ;;  %1180 = vmatprep.mubr.msk.bf16.mxu0 %vm1322_vm0, %v1321_v1 }
  0x38   : > { %1176 = vmatprep.subr.bf16.mxu0 %v1321_v1  ;;  %1189 = vmatpush3.bf16.msra.mxu1 %v1275_v45 }
  0x3b   : > { %1177 = vmatpush3.bf16.msra.mxu0 %v1272_v46  ;;  %1191 = vmatmul.mubr.msk.bf16.vlgmr.msra.gmra.mrb[12].mxu1 %vm238_vm1, %v734_v47 }
  0x3c   : > { %1178 = vmatprep.subr.bf16.mxu0 %v1321_v1 }
  0x3f   : > { %1179 = vmatpush3.bf16.msra.mxu0 %v1274_v48 }
  0x40   : > { %1194 = vmatprep.subr.bf16.mxu0 %v1321_v1 }
  0x42   : > { %1181 = vmatmul.mubr.msk.bf16.vlgmr.msra.gmra.mrb[12].mxu0 %vm238_vm1, %v1040_v31  ;;  %v1074_v31 = vld [vmem:[%s1555_s2] ss:$0 sm:$0xff] }
  0x43   : > { %1195 = vmatpush3.bf16.msra.mxu0 %v1278_v49  ;;  %1200 = vmatprep.mubr.msk.bf16.mxu0 %vm1322_vm0, %v1321_v1 }
  0x44   : > { %1196 = vmatprep.subr.bf16.mxu0 %v1321_v1 }
  0x47   : > { %1197 = vmatpush3.bf16.msra.mxu0 %v1279_v51 }
  0x48   : > { %1198 = vmatprep.subr.bf16.mxu0 %v1321_v1 }
  0x4b   : > { %1199 = vmatpush3.bf16.msra.mxu0 %v1280_v53 }
  0x4e   : > { %1201 = vmatmul.mubr.msk.bf16.vlgmr.msra.gmra.mrb[16].mxu0 %vm238_vm1, %v807_v54 }
  0xea   : > { %v337_v55 = vpop.f32.mrb[0].mxu1 }
  0xeb   : > { %v1132_v56 = vpop.f32.mrb[1].mxu1 }
  0xec   : > { %v340_v57 = vpop.f32.mrb[2].mxu1 }
  0xed   : > { %v1133_v58 = vpop.f32.mrb[3].mxu1 }
  0xf1   : > { %v276_v59 = vpop.f32.mrb[0].mxu0 }
  0xf2   : > { %v338_v60 = vadd.f32 %v337_v55, %v276_v59  ;;  %v1122_v61 = vpop.f32.mrb[1].mxu0 }
  0xf3   : > { %v279_v62 = vpop.f32.mrb[2].mxu0 }
  0xf4   : > { %v1123_v63 = vpop.f32.mrb[3].mxu0 }
  0xf6   : > { %v484_v0 = vpop.f32.mrb[4].mxu1 }
  0xf7   : > { %v1152_v2 = vpop.f32.mrb[5].mxu1 }
  0xf8   : > { %v487_v3 = vpop.f32.mrb[6].mxu1 }
  0xf9   : > { %v1153_v4 = vpop.f32.mrb[7].mxu1 }
  0xfd   : > { %v409_v5 = vpop.f32.mrb[4].mxu0 }
  0xfe   : > { %v415_v6 = vadd.f32 %v409_v5, %v338_v60  ;;  %v1142_v1 = vpop.f32.mrb[5].mxu0 }
  0xff   : > { %v412_v7 = vpop.f32.mrb[6].mxu0 }
 0x100   : > { %v490_v8 = vadd.f32 %v484_v0, %v415_v6  ;;  %v1143_v9 = vpop.f32.mrb[7].mxu0 }
 0x102   : > { %v636_v10 = vpop.f32.mrb[8].mxu1 }
 0x103   : > { %v1172_v11 = vpop.f32.mrb[9].mxu1 }
 0x104   : > { %v639_v12 = vpop.f32.mrb[10].mxu1 }
 0x105   : > { %v1173_v13 = vpop.f32.mrb[11].mxu1 }
 0x109   : > { %v563_v14 = vpop.f32.mrb[8].mxu0 }
 0x10a   : > { %v569_v15 = vadd.f32 %v563_v14, %v490_v8  ;;  %v1162_v16 = vpop.f32.mrb[9].mxu0 }
 0x10b   : > { %v566_v17 = vpop.f32.mrb[10].mxu0 }
 0x10c   : > { %v642_v18 = vadd.f32 %v636_v10, %v569_v15  ;;  %v1163_v19 = vpop.f32.mrb[11].mxu0 }
 0x10e   : > { %v790_v20 = vpop.f32.mrb[12].mxu1 }
 0x10f   : > { %v1192_v21 = vpop.f32.mrb[13].mxu1 }
 0x110   : > { %v793_v22 = vpop.f32.mrb[14].mxu1 }
 0x111   : > { %v1193_v23 = vpop.f32.mrb[15].mxu1 }
 0x115   : > { %v711_v24 = vpop.f32.mrb[12].mxu0 }
 0x116   : > { %v717_v25 = vadd.f32 %v711_v24, %v642_v18  ;;  %v1182_v26 = vpop.f32.mrb[13].mxu0 }
 0x117   : > { %v714_v27 = vpop.f32.mrb[14].mxu0 }
 0x118   : > { %v796_v28 = vadd.f32 %v790_v20, %v717_v25  ;;  %v1183_v29 = vpop.f32.mrb[15].mxu0 }
 0x121   : > { %v863_v30 = vpop.f32.mrb[16].mxu0 }
 0x122   : > { %v869_v32 = vadd.f32 %v863_v30, %v796_v28  ;;  %v1202_v33 = vpop.f32.mrb[17].mxu0 }
 0x123   : > { %v866_v34 = vpop.f32.mrb[18].mxu0 }
 0x124   : > { %v877_v35 = vadd.f32 %v1074_v31, %v869_v32  ;;  %v1203_v36 = vpop.f32.mrb[19].mxu0 }
 0x126   : > { %v878_v37 = vmax.f32 %v877_v35, 0.0 }
 0x128   : > { %880 = vst.msk [vmem:[%s190_s27] sm:$0x7f] %vm879_vm2, %v878_v37 }
 0x129 PF: > { %s13_s16 = sadd.s32 1, %s1319_s16   ;;  %s1557_s12 = smov %s1311_s14 }
 0x12a   : > { %p10_p7 = scmp.ge.s32.totalorder %s13_s16, 16   ;;  %s1558_s13 = smov %s1315_s15 }
 0x12b   : > { %s1559_s14 = smov %s1562_s17  ;;  %s1560_s15 = smov %s1566_s18 }
 0x12c   :  { %12 = sbr.rel (!%p10_p7) target bundleno = 3 (0x3), region = 73 }

// kernel: alexnet_forward.16
= control target key start
LH: loop header
LB: loop body
LE: loop exit
PB: predicated region body
PF: predicated region fallthrough
CT: control target
= control target key end

     0   :  { %s381_s6 = smov 0   ;;  %s383_s7 = smov 0   ;;  %s437_s0 = inlined_call_operand.vmem [shape: f32[2,7,4,64], index: 0, kind: input, shape index: {}]   ;;  %s438_s1 = inlined_call_operand.vmem [shape: f32[2,3,3,32], index: 1, kind: output, shape index: {}]  }
   0x1   :  { %s385_s8 = smov 0   ;;  %s387_s9 = smov 0  }
   0x2   :  { %s389_s10 = smov 0  }
   0x3 LB: > { %s20_s11 = sadd.s32 1, %s360_s8  ;;  %s23_s12 = sadd.s32 1, %s364_s9  ;;  %s368_s10 = sphi %s389_s10, %s11_s10   ;;  %s364_s9 = sphi %s387_s9, %s442_s9   ;;  %s360_s8 = sphi %s385_s8, %s441_s8   ;;  %s356_s7 = sphi %s383_s7, %s440_s7   ;;  %s352_s6 = sphi %s381_s6, %s439_s6  }
   0x4   : > { %p21_p0 = scmp.ge.s32.totalorder %s20_s11, 3  ;;  %p271_p1 = scmp.ge.s32.totalorder %s368_s10, 1 }
   0x5   : > { %p101_p2 = scmp.lt.s32.totalorder %s368_s10, 7 }
   0x6   : > { %s444_s11 = smov (%p21_p0, %s20_s11), 0  ;;  %s446_s12 = smov (!%p21_p0, %s23_s12), %s364_s9 }
   0x7   : > { %p102_p3 = pnand %p271_p1, %p101_p2  ;;  %p25_p4 = scmp.ge.s32.totalorder %s446_s12, 2 }
   0x8   : > { %p124_p5 = scmp.lt.s32.totalorder (!%p102_p3), %s356_s7, 1  ;;  %s284_s14 = sshll.u32 (!%p102_p3), %s352_s6, 3  ;;  %vm175_vm0 = vcmask (!%p102_p3), 256000  }
   0x9   : > { %s448_s12 = smov (%p25_p4, %s446_s12), 0  ;;  %105 = sbr.rel (%p102_p3) target bundleno = 154 (0x9a), region = 24 }
   0xa   : > { %s370_s19 = smov (!%p102_p3), 96   ;;  %p131_p6 = scmp.lt.s32.totalorder (!%p102_p3), %s352_s6, 2 }
  0x10   : > { %s450_s7 = smov (!%p124_p5, %s356_s7), 1  ;;  %s452_s6 = smov (!%p131_p6, %s352_s6), 2 }
  0x11   : > { %s287_s13 = smul.u32 28, %s450_s7 }
  0x12   : > { %s288_s20 = smul.u32 3, %s450_s7 }
  0x13   : > { %s128_s17 = scalar_lea.vmem %s437_s0, %s287_s13 }
  0x14   : > { %s139_s18 = scalar_lea.vmem %s128_s17, %s284_s14  ;;  %s134_s21 = sadd.s32 %s288_s20, %s452_s6 }
  0x15   : > { %v140_v0 = vld [vmem:[%s139_s18] sm:$0xf]  ;;  %v281_v1 = vld [vmem:[%s139_s18 + $0x8] sm:$0xf]  ;;  %v278_v2 = vld [vmem:[%s139_s18 + $0x4] sm:$0xf] }
  0x16   : > { %142 = vrot.lane.b32.xlu0 %v140_v0, %s370_s19  ;;  %168 = vrot.lane.b32.xlu1 %v281_v1, %s370_s19  ;;  %v146_v3 = vrot.slane %v140_v0, 1  ;;  %v159_v8 = vrot.slane %v278_v2, 1  ;;  %v172_v13 = vrot.slane %v281_v1, 1  ;;  %s273_s22 = sshll.u32 %s134_s21, 2 }
  0x17   : > { %s136_s25 = scalar_lea.vmem %s438_s1, %s273_s22 }
  0x1a   : > { %155 = vrot.lane.b32.xlu0 %v278_v2, %s370_s19 }
  0x88   : > { %v143_v4 = vpop.permute.xlu0 %142  ;;  %v169_v12 = vpop.permute.xlu1 %168 }
  0x89   : > { %v145_v5 = vmax.f32 %v140_v0, %v143_v4 }
  0x8b   : > { %v148_v6 = vmax.f32 %v145_v5, %v146_v3 }
  0x8c   : > { %v156_v7 = vpop.permute.xlu0 %155 }
  0x8d   : > { %v153_v9 = vmax.f32 %v148_v6, %v278_v2 }
  0x8f   : > { %v158_v10 = vmax.f32 %v153_v9, %v156_v7 }
  0x91   : > { %v161_v11 = vmax.f32 %v158_v10, %v159_v8 }
  0x93   : > { %v166_v14 = vmax.f32 %v161_v11, %v281_v1 }
  0x95   : > { %v171_v15 = vmax.f32 %v166_v14, %v169_v12 }
  0x97   : > { %v174_v16 = vmax.f32 %v171_v15, %v172_v13 }
  0x99   : > { %176 = vst.msk [vmem:[%s136_s25] sm:$0x7] %vm175_vm0, %v174_v16 }
  0x9a PF: > { %s11_s10 = sadd.s32 1, %s368_s10   ;;  %s439_s6 = smov %s360_s8 }
  0x9b   : > { %p8_p7 = scmp.ge.s32.totalorder %s11_s10, 8   ;;  %s440_s7 = smov %s364_s9 }
  0x9c   : > { %s441_s8 = smov %s444_s11  ;;  %s442_s9 = smov %s448_s12 }
  0x9d   :  { %10 = sbr.rel (!%p8_p7) target bundleno = 3 (0x3), region = 57 }

// kernel: alexnet_forward.17
= control target key start
LH: loop header
LB: loop body
LE: loop exit
PB: predicated region body
PF: predicated region fallthrough
CT: control target
= control target key end

     0   :  { %v787_v1 = vmov 0   ;;  %v47_v63 = vlaneseq  ;;  %s1035_s1 = inlined_call_operand.vmem [shape: bf16[128,256], index: 1, kind: input, shape index: {}]   ;;  %s1036_s3 = inlined_call_operand.vmem [shape: bf16[256,256], index: 3, kind: input, shape index: {}]   ;;  %s1037_s0 = inlined_call_operand.vmem [shape: f32[8,128], index: 0, kind: input, shape index: {}]   ;;  %s1038_s5 = inlined_call_operand.vmem [shape: bf16[256,128], index: 5, kind: input, shape index: {}]   ;;  %s1039_s2 = inlined_call_operand.vmem [shape: f32[1,256], index: 2, kind: input, shape index: {}]   ;;  %s1040_s4 = inlined_call_operand.vmem [shape: f32[1,256], index: 4, kind: input, shape index: {}]   ;;  %s1041_s6 = inlined_call_operand.vmem [shape: f32[1,128], index: 6, kind: input, shape index: {}]   ;;  %s1042_s7 = inlined_call_operand.vmem [shape: f32[8,128], index: 7, kind: output, shape index: {}]  }
   0x1   :  { %v699_v0 = vld [vmem:[%s1035_s1 + $0x4] ss:$8 sps:$4 sm:$0xff]   ;;  %169 = vmatprep.mubr.bf16.mxu0 %v787_v1  ;;  %v701_v2 = vld [vmem:[%s1035_s1] ss:$8 sps:$4 sm:$0xff]   ;;  %v702_v3 = vld [vmem:[%s1035_s1 + $0x14] ss:$8 sps:$4 sm:$0xff]  }
   0x2   :  { %137 = vmatprep.subr.bf16.mxu0 %v699_v0  ;;  %v704_v4 = vld [vmem:[%s1035_s1 + $0x10] ss:$8 sps:$4 sm:$0xff]   ;;  %v705_v5 = vld [vmem:[%s1035_s1 + $0x24] ss:$8 sps:$4 sm:$0xff]   ;;  %v707_v6 = vld [vmem:[%s1035_s1 + $0x20] ss:$8 sps:$4 sm:$0xff]  }
   0x3   :  { %138 = vmatpush1.bf16.msra.mxu0 %v701_v2  ;;  %v708_v7 = vld [vmem:[%s1035_s1 + $0x34] ss:$8 sps:$4 sm:$0xff]   ;;  %v710_v8 = vld [vmem:[%s1035_s1 + $0x30] ss:$8 sps:$4 sm:$0xff]   ;;  %v711_v9 = vld [vmem:[%s1035_s1 + $0x44] ss:$8 sps:$4 sm:$0xff]  }
   0x4   :  { %139 = vmatprep.subr.bf16.mxu0 %v702_v3  ;;  %v723_v10 = vld [vmem:[%s1036_s3 + $0x4] ss:$8 sps:$4 sm:$0xff]   ;;  %v725_v11 = vld [vmem:[%s1036_s3] ss:$8 sps:$4 sm:$0xff]   ;;  %v726_v12 = vld [vmem:[%s1036_s3 + $0x14] ss:$8 sps:$4 sm:$0xff]  }
   0x5   :  { %386 = vmatprep.subr.bf16.mxu1 %v723_v10  ;;  %v713_v13 = vld [vmem:[%s1035_s1 + $0x40] ss:$8 sps:$4 sm:$0xff]   ;;  %v728_v14 = vld [vmem:[%s1036_s3 + $0x10] ss:$8 sps:$4 sm:$0xff]   ;;  %v729_v15 = vld [vmem:[%s1036_s3 + $0x24] ss:$8 sps:$4 sm:$0xff]  }
   0x6   :  { %387 = vmatpush1.bf16.msra.mxu1 %v725_v11  ;;  %v714_v16 = vld [vmem:[%s1035_s1 + $0x54] ss:$8 sps:$4 sm:$0xff]   ;;  %v716_v17 = vld [vmem:[%s1035_s1 + $0x50] ss:$8 sps:$4 sm:$0xff]   ;;  %v731_v18 = vld [vmem:[%s1036_s3 + $0x20] ss:$8 sps:$4 sm:$0xff]  }
   0x7   :  { %140 = vmatpush1.bf16.msra.mxu0 %v704_v4  ;;  %388 = vmatprep.subr.bf16.mxu1 %v726_v12  ;;  %v732_v19 = vld [vmem:[%s1036_s3 + $0x34] ss:$8 sps:$4 sm:$0xff]   ;;  %v717_v20 = vld [vmem:[%s1035_s1 + $0x64] ss:$8 sps:$4 sm:$0xff]   ;;  %v719_v21 = vld [vmem:[%s1035_s1 + $0x60] ss:$8 sps:$4 sm:$0xff]  }
   0x8   :  { %141 = vmatprep.subr.bf16.mxu0 %v705_v5  ;;  %v734_v22 = vld [vmem:[%s1036_s3 + $0x30] ss:$8 sps:$4 sm:$0xff]   ;;  %v735_v23 = vld [vmem:[%s1036_s3 + $0x44] ss:$8 sps:$4 sm:$0xff]   ;;  %v720_v24 = vld [vmem:[%s1035_s1 + $0x74] ss:$8 sps:$4 sm:$0xff]  }
   0x9   :  { %v722_v25 = vld [vmem:[%s1035_s1 + $0x70] ss:$8 sps:$4 sm:$0xff]   ;;  %v27_v26 = vld [vmem:[%s1037_s0] sm:$0xff]  ;;  %v738_v28 = vld [vmem:[%s1036_s3 + $0x54] ss:$8 sps:$4 sm:$0xff]   ;;  %v48_v0 = vshrl.u32 %v47_v63, 7 }
   0xa   :  { %389 = vmatpush1.bf16.msra.mxu1 %v728_v14  ;;  %v737_v27 = vld [vmem:[%s1036_s3 + $0x40] ss:$8 sps:$4 sm:$0xff]   ;;  %v740_v29 = vld [vmem:[%s1036_s3 + $0x50] ss:$8 sps:$4 sm:$0xff]   ;;  %v28_v30 = vpack.c.bf16 %v27_v26, %v27_v26  ;;  %v741_v31 = vld [vmem:[%s1036_s3 + $0x64] ss:$8 sps:$4 sm:$0xff]  }
   0xb   :  { %142 = vmatpush1.bf16.msra.mxu0 %v707_v6  ;;  %390 = vmatprep.subr.bf16.mxu1 %v729_v15  ;;  %v743_v32 = vld [vmem:[%s1036_s3 + $0x60] ss:$8 sps:$4 sm:$0xff]   ;;  %v744_v33 = vld [vmem:[%s1036_s3 + $0x74] ss:$8 sps:$4 sm:$0xff]   ;;  %v746_v34 = vld [vmem:[%s1036_s3 + $0x70] ss:$8 sps:$4 sm:$0xff]  }
   0xc   :  { %143 = vmatprep.subr.bf16.mxu0 %v708_v7  ;;  %v747_v35 = vld [vmem:[%s1036_s3 + $0x84] ss:$8 sps:$4 sm:$0xff]   ;;  %v749_v36 = vld [vmem:[%s1036_s3 + $0x80] ss:$8 sps:$4 sm:$0xff]   ;;  %v750_v37 = vld [vmem:[%s1036_s3 + $0x94] ss:$8 sps:$4 sm:$0xff]  }
   0xd   :  { %v752_v38 = vld [vmem:[%s1036_s3 + $0x90] ss:$8 sps:$4 sm:$0xff]   ;;  %v753_v39 = vld [vmem:[%s1036_s3 + $0xa4] ss:$8 sps:$4 sm:$0xff]   ;;  %v755_v40 = vld [vmem:[%s1036_s3 + $0xa0] ss:$8 sps:$4 sm:$0xff]  }
   0xe   :  { %391 = vmatpush1.bf16.msra.mxu1 %v731_v18  ;;  %v756_v41 = vld [vmem:[%s1036_s3 + $0xb4] ss:$8 sps:$4 sm:$0xff]   ;;  %v758_v42 = vld [vmem:[%s1036_s3 + $0xb0] ss:$8 sps:$4 sm:$0xff]   ;;  %v759_v43 = vld [vmem:[%s1036_s3 + $0xc4] ss:$8 sps:$4 sm:$0xff]  }
   0xf   :  { %144 = vmatpush1.bf16.msra.mxu0 %v710_v8  ;;  %392 = vmatprep.subr.bf16.mxu1 %v732_v19  ;;  %v761_v44 = vld [vmem:[%s1036_s3 + $0xc0] ss:$8 sps:$4 sm:$0xff]   ;;  %v762_v45 = vld [vmem:[%s1036_s3 + $0xd4] ss:$8 sps:$4 sm:$0xff]   ;;  %v764_v46 = vld [vmem:[%s1036_s3 + $0xd0] ss:$8 sps:$4 sm:$0xff]  }
  0x10   :  { %145 = vmatprep.subr.bf16.mxu0 %v711_v9  ;;  %v765_v47 = vld [vmem:[%s1036_s3 + $0xe4] ss:$8 sps:$4 sm:$0xff]   ;;  %v767_v48 = vld [vmem:[%s1036_s3 + $0xe0] ss:$8 sps:$4 sm:$0xff]   ;;  %v768_v49 = vld [vmem:[%s1036_s3 + $0xf4] ss:$8 sps:$4 sm:$0xff]  }
  0x11   :  { %v770_v50 = vld [vmem:[%s1036_s3 + $0xf0] ss:$8 sps:$4 sm:$0xff]   ;;  %v771_v51 = vld [vmem:[%s1038_s5 + $0x40] sm:$0xff]   ;;  %v773_v53 = vld [vmem:[%s1038_s5 + $0x48] sm:$0xff]   ;;  %v49_v1 = vsub.s32 0, %v48_v0  ;;  %v53_v3 = vsub.s32 1, %v48_v0 }
  0x12   :  { %393 = vmatpush1.bf16.msra.mxu1 %v734_v22  ;;  %v772_v52 = vld [vmem:[%s1038_s5] sm:$0xff]   ;;  %v774_v54 = vld [vmem:[%s1038_s5 + $0x8] sm:$0xff]   ;;  %v775_v55 = vld [vmem:[%s1038_s5 + $0x50] sm:$0xff]  }
  0x13   :  { %146 = vmatpush1.bf16.msra.mxu0 %v713_v13  ;;  %394 = vmatprep.subr.bf16.mxu1 %v735_v23  ;;  %v776_v56 = vld [vmem:[%s1038_s5 + $0x10] sm:$0xff]   ;;  %v777_v57 = vld [vmem:[%s1038_s5 + $0x58] sm:$0xff]   ;;  %v779_v59 = vld [vmem:[%s1038_s5 + $0x60] sm:$0xff]  }
  0x14   :  { %147 = vmatprep.subr.bf16.mxu0 %v714_v16  ;;  %v778_v58 = vld [vmem:[%s1038_s5 + $0x18] sm:$0xff]   ;;  %v780_v60 = vld [vmem:[%s1038_s5 + $0x20] sm:$0xff]   ;;  %v781_v61 = vld [vmem:[%s1038_s5 + $0x68] sm:$0xff]  }
  0x15   :  { %v782_v62 = vld [vmem:[%s1038_s5 + $0x28] sm:$0xff]   ;;  %v45_v2 = vld [vmem:[%s1039_s2] sm:$0x3]  ;;  %v783_v16 = vld [vmem:[%s1038_s5 + $0x70] sm:$0xff]  }
  0x16   :  { %395 = vmatpush1.bf16.msra.mxu1 %v737_v27  ;;  %v50_v4 = vrot.slane %v45_v2, %v49_v1  ;;  %v54_v5 = vrot.slane %v45_v2, %v53_v3  ;;  %v785_v18 = vld [vmem:[%s1038_s5 + $0x78] sm:$0xff]  }
  0x17   :  { %148 = vmatpush1.bf16.msra.mxu0 %v716_v17  ;;  %396 = vmatprep.subr.bf16.mxu1 %v738_v28  ;;  %v784_v17 = vld [vmem:[%s1038_s5 + $0x30] sm:$0xff]   ;;  %v786_v19 = vld [vmem:[%s1038_s5 + $0x38] sm:$0xff]  }
  0x18   :  { %149 = vmatprep.subr.bf16.mxu0 %v717_v20  ;;  %v214_v20 = vld [vmem:[%s1040_s4] sm:$0x3] }
  0x19   :  { %v223_v22 = vrot.slane %v214_v20, %v53_v3 }
  0x1a   :  { %397 = vmatpush1.bf16.msra.mxu1 %v740_v29 }
  0x1b   :  { %150 = vmatpush1.bf16.msra.mxu0 %v719_v21  ;;  %398 = vmatprep.subr.bf16.mxu1 %v741_v31  ;;  %v219_v21 = vrot.slane %v214_v20, %v49_v1 }
  0x1c   :  { %151 = vmatprep.subr.bf16.mxu0 %v720_v24 }
  0x1e   :  { %399 = vmatpush1.bf16.msra.mxu1 %v743_v32 }
  0x1f   :  { %152 = vmatpush1.bf16.msra.mxu0 %v722_v25  ;;  %400 = vmatprep.subr.bf16.mxu1 %v744_v33 }
  0x20   :  { %676 = vmatprep.subr.bf16.mxu0 %v771_v51 }
  0x22   :  { %170 = vmatmul.mubr.bf16.vlgmr.msra.gmra.mrb[0].mxu0 %v28_v30  ;;  %401 = vmatpush1.bf16.msra.mxu1 %v746_v34  ;;  %v659_v34 = vld [vmem:[%s1041_s6] ss:$0 sm:$0xff] }
  0x23   :  { %402 = vmatprep.subr.bf16.mxu1 %v747_v35  ;;  %677 = vmatpush3.bf16.msra.mxu0 %v772_v52 }
  0x24   :  { %678 = vmatprep.subr.bf16.mxu0 %v773_v53 }
  0x26   :  { %403 = vmatpush1.bf16.msra.mxu1 %v749_v36 }
  0x27   :  { %404 = vmatprep.subr.bf16.mxu1 %v750_v37  ;;  %679 = vmatpush3.bf16.msra.mxu0 %v774_v54 }
  0x28   :  { %680 = vmatprep.subr.bf16.mxu0 %v775_v55 }
  0x2a   :  { %405 = vmatpush1.bf16.msra.mxu1 %v752_v38 }
  0x2b   :  { %406 = vmatprep.subr.bf16.mxu1 %v753_v39  ;;  %681 = vmatpush3.bf16.msra.mxu0 %v776_v56 }
  0x2c   :  { %682 = vmatprep.subr.bf16.mxu0 %v777_v57 }
  0x2e   :  { %407 = vmatpush1.bf16.msra.mxu1 %v755_v40 }
  0x2f   :  { %408 = vmatprep.subr.bf16.mxu1 %v756_v41  ;;  %683 = vmatpush3.bf16.msra.mxu0 %v778_v58 }
  0x30   :  { %684 = vmatprep.subr.bf16.mxu0 %v779_v59 }
  0x32   :  { %409 = vmatpush1.bf16.msra.mxu1 %v758_v42 }
  0x33   :  { %410 = vmatprep.subr.bf16.mxu1 %v759_v43  ;;  %685 = vmatpush3.bf16.msra.mxu0 %v780_v60 }
  0x34   :  { %686 = vmatprep.subr.bf16.mxu0 %v781_v61 }
  0x36   :  { %411 = vmatpush1.bf16.msra.mxu1 %v761_v44 }
  0x37   :  { %412 = vmatprep.subr.bf16.mxu1 %v762_v45  ;;  %687 = vmatpush3.bf16.msra.mxu0 %v782_v62 }
  0x38   :  { %688 = vmatprep.subr.bf16.mxu0 %v783_v16 }
  0x3a   :  { %413 = vmatpush1.bf16.msra.mxu1 %v764_v46 }
  0x3b   :  { %414 = vmatprep.subr.bf16.mxu1 %v765_v47  ;;  %689 = vmatpush3.bf16.msra.mxu0 %v784_v17 }
  0x3c   :  { %690 = vmatprep.subr.bf16.mxu0 %v785_v18 }
  0x3e   :  { %415 = vmatpush1.bf16.msra.mxu1 %v767_v48 }
  0x3f   :  { %416 = vmatprep.subr.bf16.mxu1 %v768_v49  ;;  %691 = vmatpush3.bf16.msra.mxu0 %v786_v19 }
  0x42   :  { %417 = vmatpush1.bf16.msra.mxu1 %v770_v50 }
  0xf5   :  { %v171_v6 = vpop.f32.mrb[0].mxu0 }
  0xf6   :  { %v172_v7 = vadd.f32 %v171_v6, %v50_v4  ;;  %v173_v8 = vpop.f32.mrb[1].mxu0 }
  0xf7   :  { %v174_v9 = vadd.f32 %v173_v8, %v54_v5  ;;  %v175_v10 = vpop.f32.mrb[2].mxu0 }
  0xf8   :  { %v178_v11 = vmax.f32 %v172_v7, 0.0  ;;  %v176_v12 = vpop.f32.mrb[3].mxu0 }
  0xf9   :  { %v179_v13 = vmax.f32 %v174_v9, 0.0 }
  0xfa   :  { %v180_v15 = vpack.c.bf16 %v178_v11, %v178_v11 }
  0xfb   :  { %v181_v14 = vpack.c.bf16 %v179_v13, %v179_v13 }
  0xfd   :  { %418 = vmatprep.mubr.bf16.mxu1 %v181_v14 }
  0xfe   :  { %419 = vmatmul.mubr.bf16.vlgmr.msra.gmra.mrb[0].mxu1 %v180_v15 }
 0x1d1   :  { %v420_v23 = vpop.f32.mrb[0].mxu1 }
 0x1d2   :  { %v421_v24 = vadd.f32 %v420_v23, %v219_v21  ;;  %v422_v25 = vpop.f32.mrb[1].mxu1 }
 0x1d3   :  { %v423_v26 = vadd.f32 %v422_v25, %v223_v22  ;;  %v424_v27 = vpop.f32.mrb[2].mxu1 }
 0x1d4   :  { %v427_v28 = vmax.f32 %v421_v24, 0.0  ;;  %v425_v29 = vpop.f32.mrb[3].mxu1 }
 0x1d5   :  { %v428_v30 = vmax.f32 %v423_v26, 0.0 }
 0x1d6   :  { %v429_v32 = vpack.c.bf16 %v427_v28, %v427_v28 }
 0x1d7   :  { %v430_v31 = vpack.c.bf16 %v428_v30, %v428_v30 }
 0x1d9   :  { %598 = vmatprep.mubr.bf16.mxu0 %v430_v31 }
 0x1da   :  { %599 = vmatmul.mubr.bf16.vlgmr.msra.gmra.mrb[4].mxu0 %v429_v32 }
 0x2ad   :  { %v692_v33 = vpop.f32.mrb[4].mxu0 }
 0x2ae   :  { %v693_v35 = vpop.f32.mrb[5].mxu0 }
 0x2af   :  { %v694_v36 = vadd.f32 %v693_v35, %v692_v33  ;;  %v695_v37 = vpop.f32.mrb[6].mxu0 }
 0x2b0   :  { %v696_v38 = vpop.f32.mrb[7].mxu0 }
 0x2b1   :  { %v601_v39 = vadd.f32 %v694_v36, %v659_v34 }
 0x2b3   :  { %606 = vst [vmem:[%s1042_s7] sm:$0xff] %v601_v39 }

</bundles_post_ra>
